<compile_context>
chip_gen: v6e
topology: v6e:2x2x1
jax: 0.10.0
libtpu: 0.0.40
codegen_flags: <defaults>
</compile_context>

<pallas_src>
import functools

import jax
import jax.numpy as jnp
import numpy as np
from jax.experimental import pallas as pl
from jax.experimental.pallas import tpu as pltpu


def _round_up(x, m):
    return (x + m - 1) // m * m


def _pick_tile(n_pad, max_tile):
    """Largest (8,128)-friendly tile <= max_tile that divides the padded extent."""
    if n_pad <= max_tile:
        return n_pad
    for cand in (512, 384, 256, 128):
        if cand <= max_tile and n_pad % cand == 0:
            return cand
    return 128


def _layernorm(v, gamma, beta, eps=1e-5):
    mu = jnp.mean(v, axis=-1, keepdims=True)
    var = jnp.mean((v - mu) ** 2, axis=-1, keepdims=True)
    return (v - mu) * jax.lax.rsqrt(var + eps) * gamma + beta


def _allset_block_kernel(mask_ref, slab_ref, qres_ref, expand_ref, w_ref,
                         g0_ref, b0_ref, g1_ref, b1_ref, out_ref, acc_ref,
                         *, heads, nq, dh, transpose_mask, apply_relu):
    """Grid = (T tiles [parallel], S tiles [reduction]).

    mask_ref   : bf16 incidence tile  ([tT,tS] or [tS,tT] if transpose_mask)
    slab_ref   : f32  [tS, nq*hid + nq*heads]   = [w*xV | w] per source cell
    qres_ref   : f32  [1, nq*hid]               flattened Q_weight residual
    expand_ref : f32  [nq*heads, nq*hid]        one-hot (q,h) -> (q,h,d) expansion
    w_ref      : f32  [hid, hid]                MLP weight (y = x @ W)
    g*/b*      : f32  [1, hid]                  LayerNorm affine params
    out_ref    : f32  [tT, hid]
    acc_ref    : f32  [tT, nq*hid + nq*heads]   VMEM accumulator (num | den)
    """
    hid = heads * dh
    nqh = nq * heads
    j = pl.program_id(1)

    @pl.when(j == 0)
    def _init():
        acc_ref[...] = jnp.zeros_like(acc_ref)

    mask = mask_ref[...].astype(jnp.float32)   # bf16 0/1 -> f32 (exact)
    slab = slab_ref[...]
    if transpose_mask:
        # mask tile is an untransposed [tS, tT] block of the incidence matrix;
        # contract over the source axis (dim 0) so incidence^T never hits HBM.
        part = jax.lax.dot_general(mask, slab, (((0,), (0,)), ((), ())),
                                   preferred_element_type=jnp.float32)
    else:
        part = jnp.dot(mask, slab, preferred_element_type=jnp.float32)
    acc_ref[...] += part

    @pl.when(j == pl.num_programs(1) - 1)
    def _epilogue():
        acc = acc_ref[...]
        num = acc[:, : nq * hid]                       # [tT, nq*hid]
        den = acc[:, nq * hid: nq * hid + nqh]         # [tT, nq*heads]
        # den == 0 (empty / padded neighborhoods) -> msg = 0, matching the reference's
        # `e / where(denom > 0, denom, 1)` guard (num is 0 there too).
        inv = jnp.where(den > 0.0,
                        pl.reciprocal(jnp.where(den > 0.0, den, 1.0), approx=True),
                        0.0)
        inv_full = jnp.dot(inv, expand_ref[...],
                           preferred_element_type=jnp.float32)  # broadcast over d
        y = num * inv_full + qres_ref[...]             # msg + Q_weight residual

        g0 = g0_ref[...]
        b0 = b0_ref[...]
        g1 = g1_ref[...]
        b1 = b1_ref[...]
        w = w_ref[...]
        out = jnp.zeros(out_ref.shape, jnp.float32)
        for q in range(nq):                            # nq is typically 1
            z = _layernorm(y[:, q * hid:(q + 1) * hid], g0, b0)
            mlp = jnp.maximum(jnp.dot(z, w, preferred_element_type=jnp.float32), 0.0)
            out = out + _layernorm(z + mlp, g1, b1)    # sum over queries
        if apply_relu:                                  # layer-level ReLU
            out = jnp.maximum(out, 0.0)
        out_ref[...] = out


def allset_block(x, inc_padded, params, *, n_targets, n_sources, transpose_mask,
                 heads, number_queries, apply_relu=True,
                 max_tile_t=512, max_tile_s=512):
    """One AllSetTransformerBlock forward.

    x          : [n_sources, in_channels] source-cell features.
    inc_padded : [n_nodes_pad, n_edges_pad] bf16 0/1 incidence, zero padded.
                 transpose_mask=True  -> targets are edges (neighborhood = incidence^T)
                 transpose_mask=False -> targets are nodes (neighborhood = incidence)
    """
    H, Nq = heads, number_queries
    K, Q, V, W = params["K"], params["Q"], params["V"], params["W"]
    _, cin, dh = K.shape
    hid = H * dh
    csl = Nq * hid + Nq * H

    if transpose_mask:
        s_pad, t_pad = inc_padded.shape
    else:
        t_pad, s_pad = inc_padded.shape
    tile_t = _pick_tile(t_pad, max_tile_t)
    tile_s = _pick_tile(s_pad, max_tile_s)

    # ---- O(S*Hid) per-source prep (weight folding + projections). The O(T*S)
    #      attention aggregation below is what the Pallas kernel streams. ----
    xf = x.astype(jnp.float32)
    kq = jnp.einsum("hcd,hqd->cqh", K, Q).reshape(cin, Nq * H)   # fold Q into K
    vf = jnp.transpose(V, (1, 0, 2)).reshape(cin, hid)           # [Cin, Hid]
    qres = jnp.transpose(Q, (1, 0, 2)).reshape(1, Nq * hid)      # Q residual, flat
    alpha = xf @ kq                                              # [S, Nq*H]
    w = jnp.exp(alpha - jnp.max(alpha, axis=0, keepdims=True))   # global-max shift
    xv = xf @ vf                                                 # [S, Hid]
    wv = (w.reshape(-1, Nq, H, 1) * xv.reshape(-1, 1, H, dh)).reshape(-1, Nq * hid)
    slab = jnp.concatenate([wv, w], axis=1)                      # [S, csl]
    slab_p = jnp.zeros((s_pad, csl), jnp.float32).at[:n_sources].set(slab)
    # one-hot expansion (q*H + h) -> (q*Hid + h*Dh + d) for the denominator broadcast
    expand = jnp.repeat(jnp.eye(Nq * H, dtype=jnp.float32), dh, axis=1)

    if transpose_mask:
        mask_spec = pl.BlockSpec((tile_s, tile_t), lambda i, j: (j, i))
    else:
        mask_spec = pl.BlockSpec((tile_t, tile_s), lambda i, j: (i, j))

    def _const(shape):
        return pl.BlockSpec(shape, lambda i, j: (0, 0))

    kernel = functools.partial(
        _allset_block_kernel, heads=H, nq=Nq, dh=dh,
        transpose_mask=transpose_mask, apply_relu=apply_relu)

    out = pl.pallas_call(
        kernel,
        out_shape=jax.ShapeDtypeStruct((t_pad, hid), jnp.float32),
        grid=(t_pad // tile_t, s_pad // tile_s),   # (T parallel, S reduction last)
        in_specs=[
            mask_spec,
            pl.BlockSpec((tile_s, csl), lambda i, j: (j, 0)),
            _const((1, Nq * hid)),
            _const((Nq * H, Nq * hid)),
            _const((hid, hid)),
            _const((1, hid)),
            _const((1, hid)),
            _const((1, hid)),
            _const((1, hid)),
        ],
        out_specs=pl.BlockSpec((tile_t, hid), lambda i, j: (i, 0)),
        scratch_shapes=[pltpu.VMEM((tile_t, csl), jnp.float32)],
        compiler_params=pltpu.CompilerParams(
            dimension_semantics=("parallel", "arbitrary")),
    )(inc_padded, slab_p, qres, expand, W,
      params["g0"], params["b0"], params["g1"], params["b1"])
    return out[:n_targets]


def allset_transformer_layer(x, incidence, params_v2e, params_e2v, *, heads,
                             number_queries, max_tile_t=512, max_tile_s=512):
    """vertex->edge then edge->vertex, each followed by ReLU (dropout p=0.0)."""
    n_nodes, n_edges = incidence.shape
    n_pad = _round_up(n_nodes, 128)
    e_pad = _round_up(n_edges, 128)
    # Single padded bf16 copy of the incidence; both blocks reuse it (no HBM transpose).
    inc_p = jnp.zeros((n_pad, e_pad), jnp.bfloat16)
    inc_p = inc_p.at[:n_nodes, :n_edges].set(incidence.astype(jnp.bfloat16))

    x_e = allset_block(x, inc_p, params_v2e, n_targets=n_edges, n_sources=n_nodes,
                       transpose_mask=True, heads=heads, number_queries=number_queries,
                       max_tile_t=max_tile_t, max_tile_s=max_tile_s)
    x_v = allset_block(x_e, inc_p, params_e2v, n_targets=n_nodes, n_sources=n_edges,
                       transpose_mask=False, heads=heads, number_queries=number_queries,
                       max_tile_t=max_tile_t, max_tile_s=max_tile_s)
    return x_v


# ---------------- pure-JAX reference (faithful per-row masked softmax) ----------------
def block_ref(x, mask, p, heads, nq):
    xK = jnp.einsum('sc,hcd->hsd', x, p["K"])
    alpha = jnp.einsum('hqd,hsd->hqs', p["Q"], xK)                  # [H, Nq, S]
    logits = jnp.where(mask[:, None, None, :] > 0, alpha[None], -1e30)
    m = jnp.max(logits, -1, keepdims=True)
    e = jnp.exp(logits - m) * mask[:, None, None, :]
    denom = jnp.sum(e, -1, keepdims=True)
    att = e / jnp.where(denom > 0, denom, 1.0)                      # [T, H, Nq, S]
    xV = jnp.einsum('sc,hcd->hsd', x, p["V"])
    msg = jnp.einsum('thqs,hsd->thqd', att, xV) + p["Q"][None]
    T = mask.shape[0]
    hid = p["W"].shape[0]
    y = jnp.transpose(msg, (0, 2, 1, 3)).reshape(T, nq, hid)

    def ln(v, g, b):
        mu = v.mean(-1, keepdims=True)
        var = ((v - mu) ** 2).mean(-1, keepdims=True)
        return (v - mu) / jnp.sqrt(var + 1e-5) * g + b

    z = ln(y, p["g0"][0], p["b0"][0])
    mlp = jnp.maximum(z @ p["W"], 0.0)
    z2 = ln(z + mlp, p["g1"][0], p["b1"][0])
    return jnp.maximum(z2.sum(1), 0.0)


def layer_ref(x, incidence, pv, pe, heads, nq):
    x_e = block_ref(x, incidence.T, pv, heads, nq)
    return block_ref(x_e, incidence, pe, heads, nq)


# ---------------- parameter init (deterministic, xavier-uniform-like) ----------------
def make_block_params(key, in_channels, hidden, heads, nq):
    dh = hidden // heads
    ks = jax.random.split(key, 4)
    gain = 1.414

    def xavier(k, shape, fan_in, fan_out):
        bound = gain * np.sqrt(6.0 / (fan_in + fan_out))
        return jax.random.uniform(k, shape, jnp.float32, -bound, bound)

    K = xavier(ks[0], (heads, in_channels, dh), in_channels, heads)
    Q = xavier(ks[1], (heads, nq, dh), nq, heads)
    V = xavier(ks[2], (heads, in_channels, dh), in_channels, heads)
    # nn.Linear(hidden, hidden, bias=False) weight, stored transposed so y = x @ W.
    bound = 1.0 / np.sqrt(hidden)
    W = jax.random.uniform(ks[3], (hidden, hidden), jnp.float32, -bound, bound)
    return {
        "K": K, "Q": Q, "V": V, "W": W,
        "g0": jnp.ones((1, hidden), jnp.float32),
        "b0": jnp.zeros((1, hidden), jnp.float32),
        "g1": jnp.ones((1, hidden), jnp.float32),
        "b1": jnp.zeros((1, hidden), jnp.float32),
    }


if __name__ == "__main__":
    key = jax.random.PRNGKey(0)
    k_x, k_inc, k_p1, k_p2 = jax.random.split(key, 4)

    in_channels = 16
    hidden = 128            # multiple of 128 -> lane-dense epilogue & output
    heads = 4
    number_queries = 1
    n_nodes = 300
    n_edges = 200

    x = jax.random.normal(k_x, (n_nodes, in_channels), jnp.float32)

    # Dense binary incidence matrix [n_nodes, n_edges]; ensure no empty row/column.
    inc = (jax.random.uniform(k_inc, (n_nodes, n_edges)) < 0.15).astype(jnp.float32)
    rows = jnp.arange(n_nodes)
    cols = jnp.arange(n_edges)
    inc = inc.at[rows, rows % n_edges].set(1.0)
    inc = inc.at[cols % n_nodes, cols].set(1.0)

    params_v2e = make_block_params(k_p1, in_channels, hidden, heads, number_queries)
    params_e2v = make_block_params(k_p2, hidden, hidden, heads, number_queries)

    # Small tiles (128) so this small demo exercises a real multi-tile grid on both the
    # parallel (T) and reduction (S) axes; production defaults are 512.
    fwd = jax.jit(functools.partial(
        allset_transformer_layer, heads=heads, number_queries=number_queries,
        max_tile_t=128, max_tile_s=128))
    out = jax.block_until_ready(fwd(x, inc, params_v2e, params_e2v))

    ref = jax.block_until_ready(
        layer_ref(x, inc, params_v2e, params_e2v, heads, number_queries))

    np.testing.assert_allclose(np.asarray(out), np.asarray(ref), rtol=1e-2, atol=1e-2)
    assert out.shape == (n_nodes, hidden)
    print("KERNEL_OK")
</pallas_src>

<mosaic_0001>
module attributes {stable_mosaic.version = 11 : i64} {
  func.func @_allset_block_kernel(%arg0: i32, %arg1: i32, %arg2: memref<128x128xbf16, #tpu.memory_space<vmem>>, %arg3: memref<128x132xf32, #tpu.memory_space<vmem>>, %arg4: memref<1x128xf32, #tpu.memory_space<vmem>>, %arg5: memref<4x128xf32, #tpu.memory_space<vmem>>, %arg6: memref<128x128xf32, #tpu.memory_space<vmem>>, %arg7: memref<1x128xf32, #tpu.memory_space<vmem>>, %arg8: memref<1x128xf32, #tpu.memory_space<vmem>>, %arg9: memref<1x128xf32, #tpu.memory_space<vmem>>, %arg10: memref<1x128xf32, #tpu.memory_space<vmem>>, %arg11: memref<128x128xf32, #tpu.memory_space<vmem>>, %arg12: memref<128x132xf32, #tpu.memory_space<vmem>>) attributes {dimension_semantics = [#tpu.dimension_semantics<parallel>, #tpu.dimension_semantics<arbitrary>], iteration_bounds = array<i64: 2, 3>, scalar_prefetch = 0 : i64, scratch_operands = 1 : i64, tpu.core_type = #tpu.core_type<tc>, window_params = [{transform_indices = @transform_0, window_bounds = array<i64: 128, 128>}, {transform_indices = @transform_1, window_bounds = array<i64: 128, 132>}, {pipeline_mode = #tpu.pipeline_mode<synchronous>, transform_indices = @transform_2, window_bounds = array<i64: 1, 128>}, {pipeline_mode = #tpu.pipeline_mode<synchronous>, transform_indices = @transform_3, window_bounds = array<i64: 4, 128>}, {pipeline_mode = #tpu.pipeline_mode<synchronous>, transform_indices = @transform_4, window_bounds = array<i64: 128, 128>}, {pipeline_mode = #tpu.pipeline_mode<synchronous>, transform_indices = @transform_5, window_bounds = array<i64: 1, 128>}, {pipeline_mode = #tpu.pipeline_mode<synchronous>, transform_indices = @transform_6, window_bounds = array<i64: 1, 128>}, {pipeline_mode = #tpu.pipeline_mode<synchronous>, transform_indices = @transform_7, window_bounds = array<i64: 1, 128>}, {pipeline_mode = #tpu.pipeline_mode<synchronous>, transform_indices = @transform_8, window_bounds = array<i64: 1, 128>}, {transform_indices = @transform_9, window_bounds = array<i64: 128, 128>}]} {
    %c0_i32 = arith.constant 0 : i32
    %0 = arith.cmpi eq, %arg1, %c0_i32 : i32
    %1 = arith.extui %0 : i1 to i32
    %c0_i32_0 = arith.constant 0 : i32
    %2 = arith.cmpi ne, %1, %c0_i32_0 : i32
    scf.if %2 {
      %cst_9 = arith.constant 0.000000e+00 : f32
      %13 = vector.broadcast %cst_9 : f32 to vector<128x132xf32>
      %c0_10 = arith.constant 0 : index
      %c0_11 = arith.constant 0 : index
      %14 = vector.load %arg12[%c0_10, %c0_11] : memref<128x132xf32, #tpu.memory_space<vmem>>, vector<128x132xf32>
      tpu.vector_store %arg12[%c0_10, %c0_11], %13 {strides = array<i32>} : memref<128x132xf32, #tpu.memory_space<vmem>>, vector<128x132xf32>,
    } else {
    }
    %c0 = arith.constant 0 : index
    %c0_1 = arith.constant 0 : index
    %3 = vector.load %arg2[%c0, %c0_1] : memref<128x128xbf16, #tpu.memory_space<vmem>>, vector<128x128xbf16>
    %4 = arith.extf %3 : vector<128x128xbf16> to vector<128x128xf32>
    %c0_2 = arith.constant 0 : index
    %c0_3 = arith.constant 0 : index
    %5 = vector.load %arg3[%c0_2, %c0_3] : memref<128x132xf32, #tpu.memory_space<vmem>>, vector<128x132xf32>
    %cst = arith.constant dense<0.000000e+00> : vector<128x132xf32>
    %6 = tpu.matmul %4, %5, %cst {dimension_numbers = #tpu.dot_dimension_numbers<[0], [0], [1], [1], [0, 1, 1, 1], [], []>} : vector<128x128xf32>, vector<128x132xf32>, vector<128x132xf32> -> vector<128x132xf32>
    %c0_4 = arith.constant 0 : index
    %c0_5 = arith.constant 0 : index
    %7 = vector.load %arg12[%c0_4, %c0_5] : memref<128x132xf32, #tpu.memory_space<vmem>>, vector<128x132xf32>
    %8 = arith.addf %7, %6 : vector<128x132xf32>
    %c0_6 = arith.constant 0 : index
    %c0_7 = arith.constant 0 : index
    %9 = vector.load %arg12[%c0_6, %c0_7] : memref<128x132xf32, #tpu.memory_space<vmem>>, vector<128x132xf32>
    tpu.vector_store %arg12[%c0_6, %c0_7], %8 {strides = array<i32>} : memref<128x132xf32, #tpu.memory_space<vmem>>, vector<128x132xf32>,
    %c2_i32 = arith.constant 2 : i32
    %10 = arith.cmpi eq, %arg1, %c2_i32 : i32
    %11 = arith.extui %10 : i1 to i32
    %c0_i32_8 = arith.constant 0 : i32
    %12 = arith.cmpi ne, %11, %c0_i32_8 : i32
    scf.if %12 {
      %c0_9 = arith.constant 0 : index
      %c0_10 = arith.constant 0 : index
      %13 = vector.load %arg12[%c0_9, %c0_10] : memref<128x132xf32, #tpu.memory_space<vmem>>, vector<128x132xf32>
      %14 = vector.extract_strided_slice %13 {offsets = [0, 0], sizes = [128, 128], strides = [1, 1]} : vector<128x132xf32> to vector<128x128xf32>
      %15 = vector.extract_strided_slice %13 {offsets = [0, 128], sizes = [128, 4], strides = [1, 1]} : vector<128x132xf32> to vector<128x4xf32>
      %cst_11 = arith.constant 0.000000e+00 : f32
      %16 = vector.broadcast %cst_11 : f32 to vector<128x4xf32>
      %17 = arith.cmpf ogt, %15, %16 : vector<128x4xf32>
      %cst_12 = arith.constant 0.000000e+00 : f32
      %18 = vector.broadcast %cst_12 : f32 to vector<128x4xf32>
      %19 = arith.cmpf ogt, %15, %18 : vector<128x4xf32>
      %cst_13 = arith.constant 1.000000e+00 : f32
      %20 = vector.broadcast %cst_13 : f32 to vector<128x4xf32>
      %21 = arith.select %19, %15, %20 : vector<128x4xi1>, vector<128x4xf32>
      %22 = tpu.reciprocal %21 {approx = true} : vector<128x4xf32> -> vector<128x4xf32>
      %cst_14 = arith.constant 0.000000e+00 : f32
      %23 = vector.broadcast %cst_14 : f32 to vector<128x4xf32>
      %24 = arith.select %17, %22, %23 : vector<128x4xi1>, vector<128x4xf32>
      %c0_15 = arith.constant 0 : index
      %c0_16 = arith.constant 0 : index
      %25 = vector.load %arg5[%c0_15, %c0_16] : memref<4x128xf32, #tpu.memory_space<vmem>>, vector<4x128xf32>
      %cst_17 = arith.constant dense<0.000000e+00> : vector<128x128xf32>
      %26 = tpu.matmul %24, %25, %cst_17 {dimension_numbers = #tpu.dot_dimension_numbers<[1], [0], [0], [1], [0, 0, 1, 1], [], []>} : vector<128x4xf32>, vector<4x128xf32>, vector<128x128xf32> -> vector<128x128xf32>
      %27 = arith.mulf %14, %26 : vector<128x128xf32>
      %c0_18 = arith.constant 0 : index
      %c0_19 = arith.constant 0 : index
      %28 = vector.load %arg4[%c0_18, %c0_19] : memref<1x128xf32, #tpu.memory_space<vmem>>, vector<1x128xf32>
      %29 = vector.broadcast %28 : vector<1x128xf32> to vector<128x128xf32>
      %30 = arith.addf %27, %29 : vector<128x128xf32>
      %c0_20 = arith.constant 0 : index
      %c0_21 = arith.constant 0 : index
      %31 = vector.load %arg7[%c0_20, %c0_21] : memref<1x128xf32, #tpu.memory_space<vmem>>, vector<1x128xf32>
      %c0_22 = arith.constant 0 : index
      %c0_23 = arith.constant 0 : index
      %32 = vector.load %arg8[%c0_22, %c0_23] : memref<1x128xf32, #tpu.memory_space<vmem>>, vector<1x128xf32>
      %c0_24 = arith.constant 0 : index
      %c0_25 = arith.constant 0 : index
      %33 = vector.load %arg9[%c0_24, %c0_25] : memref<1x128xf32, #tpu.memory_space<vmem>>, vector<1x128xf32>
      %c0_26 = arith.constant 0 : index
      %c0_27 = arith.constant 0 : index
      %34 = vector.load %arg10[%c0_26, %c0_27] : memref<1x128xf32, #tpu.memory_space<vmem>>, vector<1x128xf32>
      %c0_28 = arith.constant 0 : index
      %c0_29 = arith.constant 0 : index
      %35 = vector.load %arg6[%c0_28, %c0_29] : memref<128x128xf32, #tpu.memory_space<vmem>>, vector<128x128xf32>
      %cst_30 = arith.constant 0.000000e+00 : f32
      %36 = vector.broadcast %cst_30 : f32 to vector<128x128xf32>
      %cst_31 = arith.constant dense<0.000000e+00> : vector<128xf32>
      %37 = vector.multi_reduction <add>, %30, %cst_31 [1] : vector<128x128xf32> to vector<128xf32>
      %38 = vector.shape_cast %37 : vector<128xf32> to vector<128x1xf32>
      %cst_32 = arith.constant 1.280000e+02 : f32
      %39 = vector.broadcast %cst_32 : f32 to vector<128x1xf32>
      %40 = arith.divf %38, %39 : vector<128x1xf32>
      %41 = vector.broadcast %40 : vector<128x1xf32> to vector<128x128xf32>
      %42 = arith.subf %30, %41 : vector<128x128xf32>
      %43 = arith.mulf %42, %42 : vector<128x128xf32>
      %cst_33 = arith.constant dense<0.000000e+00> : vector<128xf32>
      %44 = vector.multi_reduction <add>, %43, %cst_33 [1] : vector<128x128xf32> to vector<128xf32>
      %45 = vector.shape_cast %44 : vector<128xf32> to vector<128x1xf32>
      %cst_34 = arith.constant 1.280000e+02 : f32
      %46 = vector.broadcast %cst_34 : f32 to vector<128x1xf32>
      %47 = arith.divf %45, %46 : vector<128x1xf32>
      %48 = vector.broadcast %40 : vector<128x1xf32> to vector<128x128xf32>
      %49 = arith.subf %30, %48 : vector<128x128xf32>
      %cst_35 = arith.constant 9.99999974E-6 : f32
      %50 = vector.broadcast %cst_35 : f32 to vector<128x1xf32>
      %51 = arith.addf %47, %50 : vector<128x1xf32>
      %52 = math.rsqrt %51 : vector<128x1xf32>
      %53 = vector.broadcast %52 : vector<128x1xf32> to vector<128x128xf32>
      %54 = arith.mulf %49, %53 : vector<128x128xf32>
      %55 = vector.broadcast %31 : vector<1x128xf32> to vector<128x128xf32>
      %56 = arith.mulf %54, %55 : vector<128x128xf32>
      %57 = vector.broadcast %32 : vector<1x128xf32> to vector<128x128xf32>
      %58 = arith.addf %56, %57 : vector<128x128xf32>
      %cst_36 = arith.constant dense<0.000000e+00> : vector<128x128xf32>
      %59 = tpu.matmul %58, %35, %cst_36 {dimension_numbers = #tpu.dot_dimension_numbers<[1], [0], [0], [1], [0, 0, 1, 1], [], []>} : vector<128x128xf32>, vector<128x128xf32>, vector<128x128xf32> -> vector<128x128xf32>
      %cst_37 = arith.constant 0.000000e+00 : f32
      %60 = vector.broadcast %cst_37 : f32 to vector<128x128xf32>
      %61 = arith.maximumf %59, %60 : vector<128x128xf32>
      %62 = arith.addf %58, %61 : vector<128x128xf32>
      %cst_38 = arith.constant dense<0.000000e+00> : vector<128xf32>
      %63 = vector.multi_reduction <add>, %62, %cst_38 [1] : vector<128x128xf32> to vector<128xf32>
      %64 = vector.shape_cast %63 : vector<128xf32> to vector<128x1xf32>
      %cst_39 = arith.constant 1.280000e+02 : f32
      %65 = vector.broadcast %cst_39 : f32 to vector<128x1xf32>
      %66 = arith.divf %64, %65 : vector<128x1xf32>
      %67 = vector.broadcast %66 : vector<128x1xf32> to vector<128x128xf32>
      %68 = arith.subf %62, %67 : vector<128x128xf32>
      %69 = arith.mulf %68, %68 : vector<128x128xf32>
      %cst_40 = arith.constant dense<0.000000e+00> : vector<128xf32>
      %70 = vector.multi_reduction <add>, %69, %cst_40 [1] : vector<128x128xf32> to vector<128xf32>
      %71 = vector.shape_cast %70 : vector<128xf32> to vector<128x1xf32>
      %cst_41 = arith.constant 1.280000e+02 : f32
      %72 = vector.broadcast %cst_41 : f32 to vector<128x1xf32>
      %73 = arith.divf %71, %72 : vector<128x1xf32>
      %74 = vector.broadcast %66 : vector<128x1xf32> to vector<128x128xf32>
      %75 = arith.subf %62, %74 : vector<128x128xf32>
      %cst_42 = arith.constant 9.99999974E-6 : f32
      %76 = vector.broadcast %cst_42 : f32 to vector<128x1xf32>
      %77 = arith.addf %73, %76 : vector<128x1xf32>
      %78 = math.rsqrt %77 : vector<128x1xf32>
      %79 = vector.broadcast %78 : vector<128x1xf32> to vector<128x128xf32>
      %80 = arith.mulf %75, %79 : vector<128x128xf32>
      %81 = vector.broadcast %33 : vector<1x128xf32> to vector<128x128xf32>
      %82 = arith.mulf %80, %81 : vector<128x128xf32>
      %83 = vector.broadcast %34 : vector<1x128xf32> to vector<128x128xf32>
      %84 = arith.addf %82, %83 : vector<128x128xf32>
      %85 = arith.addf %36, %84 : vector<128x128xf32>
      %cst_43 = arith.constant 0.000000e+00 : f32
      %86 = vector.broadcast %cst_43 : f32 to vector<128x128xf32>
      %87 = arith.maximumf %85, %86 : vector<128x128xf32>
      %c0_44 = arith.constant 0 : index
      %c0_45 = arith.constant 0 : index
      %88 = vector.load %arg11[%c0_44, %c0_45] : memref<128x128xf32, #tpu.memory_space<vmem>>, vector<128x128xf32>
      tpu.vector_store %arg11[%c0_44, %c0_45], %87 {strides = array<i32>} : memref<128x128xf32, #tpu.memory_space<vmem>>, vector<128x128xf32>,
    } else {
    }
    return
  }
  func.func @transform_0(%arg0: i32, %arg1: i32) -> (i32, i32) {
    %c0_i32 = arith.constant 0 : i32
    return %arg1, %arg0 : i32, i32
  }
  func.func @transform_1(%arg0: i32, %arg1: i32) -> (i32, i32) {
    %c0_i32 = arith.constant 0 : i32
    %c0_i32_0 = arith.constant 0 : i32
    return %arg1, %c0_i32 : i32, i32
  }
  func.func @transform_2(%arg0: i32, %arg1: i32) -> (i32, i32) {
    %c0_i32 = arith.constant 0 : i32
    %c0_i32_0 = arith.constant 0 : i32
    %c0_i32_1 = arith.constant 0 : i32
    return %c0_i32, %c0_i32_0 : i32, i32
  }
  func.func @transform_3(%arg0: i32, %arg1: i32) -> (i32, i32) {
    %c0_i32 = arith.constant 0 : i32
    %c0_i32_0 = arith.constant 0 : i32
    %c0_i32_1 = arith.constant 0 : i32
    return %c0_i32, %c0_i32_0 : i32, i32
  }
  func.func @transform_4(%arg0: i32, %arg1: i32) -> (i32, i32) {
    %c0_i32 = arith.constant 0 : i32
    %c0_i32_0 = arith.constant 0 : i32
    %c0_i32_1 = arith.constant 0 : i32
    return %c0_i32, %c0_i32_0 : i32, i32
  }
  func.func @transform_5(%arg0: i32, %arg1: i32) -> (i32, i32) {
    %c0_i32 = arith.constant 0 : i32
    %c0_i32_0 = arith.constant 0 : i32
    %c0_i32_1 = arith.constant 0 : i32
    return %c0_i32, %c0_i32_0 : i32, i32
  }
  func.func @transform_6(%arg0: i32, %arg1: i32) -> (i32, i32) {
    %c0_i32 = arith.constant 0 : i32
    %c0_i32_0 = arith.constant 0 : i32
    %c0_i32_1 = arith.constant 0 : i32
    return %c0_i32, %c0_i32_0 : i32, i32
  }
  func.func @transform_7(%arg0: i32, %arg1: i32) -> (i32, i32) {
    %c0_i32 = arith.constant 0 : i32
    %c0_i32_0 = arith.constant 0 : i32
    %c0_i32_1 = arith.constant 0 : i32
    return %c0_i32, %c0_i32_0 : i32, i32
  }
  func.func @transform_8(%arg0: i32, %arg1: i32) -> (i32, i32) {
    %c0_i32 = arith.constant 0 : i32
    %c0_i32_0 = arith.constant 0 : i32
    %c0_i32_1 = arith.constant 0 : i32
    return %c0_i32, %c0_i32_0 : i32, i32
  }
  func.func @transform_9(%arg0: i32, %arg1: i32) -> (i32, i32) {
    %c0_i32 = arith.constant 0 : i32
    %c0_i32_0 = arith.constant 0 : i32
    return %arg0, %c0_i32 : i32, i32
  }
}

module attributes {stable_mosaic.version = 11 : i64} {
  func.func @_allset_block_kernel(%arg0: i32, %arg1: i32, %arg2: memref<128x128xbf16, #tpu.memory_space<vmem>>, %arg3: memref<128x132xf32, #tpu.memory_space<vmem>>, %arg4: memref<1x128xf32, #tpu.memory_space<vmem>>, %arg5: memref<4x128xf32, #tpu.memory_space<vmem>>, %arg6: memref<128x128xf32, #tpu.memory_space<vmem>>, %arg7: memref<1x128xf32, #tpu.memory_space<vmem>>, %arg8: memref<1x128xf32, #tpu.memory_space<vmem>>, %arg9: memref<1x128xf32, #tpu.memory_space<vmem>>, %arg10: memref<1x128xf32, #tpu.memory_space<vmem>>, %arg11: memref<128x128xf32, #tpu.memory_space<vmem>>, %arg12: memref<128x132xf32, #tpu.memory_space<vmem>>) attributes {dimension_semantics = [#tpu.dimension_semantics<parallel>, #tpu.dimension_semantics<arbitrary>], iteration_bounds = array<i64: 3, 2>, scalar_prefetch = 0 : i64, scratch_operands = 1 : i64, tpu.core_type = #tpu.core_type<tc>, window_params = [{transform_indices = @transform_0, window_bounds = array<i64: 128, 128>}, {transform_indices = @transform_1, window_bounds = array<i64: 128, 132>}, {pipeline_mode = #tpu.pipeline_mode<synchronous>, transform_indices = @transform_2, window_bounds = array<i64: 1, 128>}, {pipeline_mode = #tpu.pipeline_mode<synchronous>, transform_indices = @transform_3, window_bounds = array<i64: 4, 128>}, {pipeline_mode = #tpu.pipeline_mode<synchronous>, transform_indices = @transform_4, window_bounds = array<i64: 128, 128>}, {pipeline_mode = #tpu.pipeline_mode<synchronous>, transform_indices = @transform_5, window_bounds = array<i64: 1, 128>}, {pipeline_mode = #tpu.pipeline_mode<synchronous>, transform_indices = @transform_6, window_bounds = array<i64: 1, 128>}, {pipeline_mode = #tpu.pipeline_mode<synchronous>, transform_indices = @transform_7, window_bounds = array<i64: 1, 128>}, {pipeline_mode = #tpu.pipeline_mode<synchronous>, transform_indices = @transform_8, window_bounds = array<i64: 1, 128>}, {transform_indices = @transform_9, window_bounds = array<i64: 128, 128>}]} {
    %c0_i32 = arith.constant 0 : i32
    %0 = arith.cmpi eq, %arg1, %c0_i32 : i32
    %1 = arith.extui %0 : i1 to i32
    %c0_i32_0 = arith.constant 0 : i32
    %2 = arith.cmpi ne, %1, %c0_i32_0 : i32
    scf.if %2 {
      %cst_9 = arith.constant 0.000000e+00 : f32
      %13 = vector.broadcast %cst_9 : f32 to vector<128x132xf32>
      %c0_10 = arith.constant 0 : index
      %c0_11 = arith.constant 0 : index
      %14 = vector.load %arg12[%c0_10, %c0_11] : memref<128x132xf32, #tpu.memory_space<vmem>>, vector<128x132xf32>
      tpu.vector_store %arg12[%c0_10, %c0_11], %13 {strides = array<i32>} : memref<128x132xf32, #tpu.memory_space<vmem>>, vector<128x132xf32>,
    } else {
    }
    %c0 = arith.constant 0 : index
    %c0_1 = arith.constant 0 : index
    %3 = vector.load %arg2[%c0, %c0_1] : memref<128x128xbf16, #tpu.memory_space<vmem>>, vector<128x128xbf16>
    %4 = arith.extf %3 : vector<128x128xbf16> to vector<128x128xf32>
    %c0_2 = arith.constant 0 : index
    %c0_3 = arith.constant 0 : index
    %5 = vector.load %arg3[%c0_2, %c0_3] : memref<128x132xf32, #tpu.memory_space<vmem>>, vector<128x132xf32>
    %cst = arith.constant dense<0.000000e+00> : vector<128x132xf32>
    %6 = tpu.matmul %4, %5, %cst {dimension_numbers = #tpu.dot_dimension_numbers<[1], [0], [0], [1], [0, 0, 1, 1], [], []>} : vector<128x128xf32>, vector<128x132xf32>, vector<128x132xf32> -> vector<128x132xf32>
    %c0_4 = arith.constant 0 : index
    %c0_5 = arith.constant 0 : index
    %7 = vector.load %arg12[%c0_4, %c0_5] : memref<128x132xf32, #tpu.memory_space<vmem>>, vector<128x132xf32>
    %8 = arith.addf %7, %6 : vector<128x132xf32>
    %c0_6 = arith.constant 0 : index
    %c0_7 = arith.constant 0 : index
    %9 = vector.load %arg12[%c0_6, %c0_7] : memref<128x132xf32, #tpu.memory_space<vmem>>, vector<128x132xf32>
    tpu.vector_store %arg12[%c0_6, %c0_7], %8 {strides = array<i32>} : memref<128x132xf32, #tpu.memory_space<vmem>>, vector<128x132xf32>,
    %c1_i32 = arith.constant 1 : i32
    %10 = arith.cmpi eq, %arg1, %c1_i32 : i32
    %11 = arith.extui %10 : i1 to i32
    %c0_i32_8 = arith.constant 0 : i32
    %12 = arith.cmpi ne, %11, %c0_i32_8 : i32
    scf.if %12 {
      %c0_9 = arith.constant 0 : index
      %c0_10 = arith.constant 0 : index
      %13 = vector.load %arg12[%c0_9, %c0_10] : memref<128x132xf32, #tpu.memory_space<vmem>>, vector<128x132xf32>
      %14 = vector.extract_strided_slice %13 {offsets = [0, 0], sizes = [128, 128], strides = [1, 1]} : vector<128x132xf32> to vector<128x128xf32>
      %15 = vector.extract_strided_slice %13 {offsets = [0, 128], sizes = [128, 4], strides = [1, 1]} : vector<128x132xf32> to vector<128x4xf32>
      %cst_11 = arith.constant 0.000000e+00 : f32
      %16 = vector.broadcast %cst_11 : f32 to vector<128x4xf32>
      %17 = arith.cmpf ogt, %15, %16 : vector<128x4xf32>
      %cst_12 = arith.constant 0.000000e+00 : f32
      %18 = vector.broadcast %cst_12 : f32 to vector<128x4xf32>
      %19 = arith.cmpf ogt, %15, %18 : vector<128x4xf32>
      %cst_13 = arith.constant 1.000000e+00 : f32
      %20 = vector.broadcast %cst_13 : f32 to vector<128x4xf32>
      %21 = arith.select %19, %15, %20 : vector<128x4xi1>, vector<128x4xf32>
      %22 = tpu.reciprocal %21 {approx = true} : vector<128x4xf32> -> vector<128x4xf32>
      %cst_14 = arith.constant 0.000000e+00 : f32
      %23 = vector.broadcast %cst_14 : f32 to vector<128x4xf32>
      %24 = arith.select %17, %22, %23 : vector<128x4xi1>, vector<128x4xf32>
      %c0_15 = arith.constant 0 : index
      %c0_16 = arith.constant 0 : index
      %25 = vector.load %arg5[%c0_15, %c0_16] : memref<4x128xf32, #tpu.memory_space<vmem>>, vector<4x128xf32>
      %cst_17 = arith.constant dense<0.000000e+00> : vector<128x128xf32>
      %26 = tpu.matmul %24, %25, %cst_17 {dimension_numbers = #tpu.dot_dimension_numbers<[1], [0], [0], [1], [0, 0, 1, 1], [], []>} : vector<128x4xf32>, vector<4x128xf32>, vector<128x128xf32> -> vector<128x128xf32>
      %27 = arith.mulf %14, %26 : vector<128x128xf32>
      %c0_18 = arith.constant 0 : index
      %c0_19 = arith.constant 0 : index
      %28 = vector.load %arg4[%c0_18, %c0_19] : memref<1x128xf32, #tpu.memory_space<vmem>>, vector<1x128xf32>
      %29 = vector.broadcast %28 : vector<1x128xf32> to vector<128x128xf32>
      %30 = arith.addf %27, %29 : vector<128x128xf32>
      %c0_20 = arith.constant 0 : index
      %c0_21 = arith.constant 0 : index
      %31 = vector.load %arg7[%c0_20, %c0_21] : memref<1x128xf32, #tpu.memory_space<vmem>>, vector<1x128xf32>
      %c0_22 = arith.constant 0 : index
      %c0_23 = arith.constant 0 : index
      %32 = vector.load %arg8[%c0_22, %c0_23] : memref<1x128xf32, #tpu.memory_space<vmem>>, vector<1x128xf32>
      %c0_24 = arith.constant 0 : index
      %c0_25 = arith.constant 0 : index
      %33 = vector.load %arg9[%c0_24, %c0_25] : memref<1x128xf32, #tpu.memory_space<vmem>>, vector<1x128xf32>
      %c0_26 = arith.constant 0 : index
      %c0_27 = arith.constant 0 : index
      %34 = vector.load %arg10[%c0_26, %c0_27] : memref<1x128xf32, #tpu.memory_space<vmem>>, vector<1x128xf32>
      %c0_28 = arith.constant 0 : index
      %c0_29 = arith.constant 0 : index
      %35 = vector.load %arg6[%c0_28, %c0_29] : memref<128x128xf32, #tpu.memory_space<vmem>>, vector<128x128xf32>
      %cst_30 = arith.constant 0.000000e+00 : f32
      %36 = vector.broadcast %cst_30 : f32 to vector<128x128xf32>
      %cst_31 = arith.constant dense<0.000000e+00> : vector<128xf32>
      %37 = vector.multi_reduction <add>, %30, %cst_31 [1] : vector<128x128xf32> to vector<128xf32>
      %38 = vector.shape_cast %37 : vector<128xf32> to vector<128x1xf32>
      %cst_32 = arith.constant 1.280000e+02 : f32
      %39 = vector.broadcast %cst_32 : f32 to vector<128x1xf32>
      %40 = arith.divf %38, %39 : vector<128x1xf32>
      %41 = vector.broadcast %40 : vector<128x1xf32> to vector<128x128xf32>
      %42 = arith.subf %30, %41 : vector<128x128xf32>
      %43 = arith.mulf %42, %42 : vector<128x128xf32>
      %cst_33 = arith.constant dense<0.000000e+00> : vector<128xf32>
      %44 = vector.multi_reduction <add>, %43, %cst_33 [1] : vector<128x128xf32> to vector<128xf32>
      %45 = vector.shape_cast %44 : vector<128xf32> to vector<128x1xf32>
      %cst_34 = arith.constant 1.280000e+02 : f32
      %46 = vector.broadcast %cst_34 : f32 to vector<128x1xf32>
      %47 = arith.divf %45, %46 : vector<128x1xf32>
      %48 = vector.broadcast %40 : vector<128x1xf32> to vector<128x128xf32>
      %49 = arith.subf %30, %48 : vector<128x128xf32>
      %cst_35 = arith.constant 9.99999974E-6 : f32
      %50 = vector.broadcast %cst_35 : f32 to vector<128x1xf32>
      %51 = arith.addf %47, %50 : vector<128x1xf32>
      %52 = math.rsqrt %51 : vector<128x1xf32>
      %53 = vector.broadcast %52 : vector<128x1xf32> to vector<128x128xf32>
      %54 = arith.mulf %49, %53 : vector<128x128xf32>
      %55 = vector.broadcast %31 : vector<1x128xf32> to vector<128x128xf32>
      %56 = arith.mulf %54, %55 : vector<128x128xf32>
      %57 = vector.broadcast %32 : vector<1x128xf32> to vector<128x128xf32>
      %58 = arith.addf %56, %57 : vector<128x128xf32>
      %cst_36 = arith.constant dense<0.000000e+00> : vector<128x128xf32>
      %59 = tpu.matmul %58, %35, %cst_36 {dimension_numbers = #tpu.dot_dimension_numbers<[1], [0], [0], [1], [0, 0, 1, 1], [], []>} : vector<128x128xf32>, vector<128x128xf32>, vector<128x128xf32> -> vector<128x128xf32>
      %cst_37 = arith.constant 0.000000e+00 : f32
      %60 = vector.broadcast %cst_37 : f32 to vector<128x128xf32>
      %61 = arith.maximumf %59, %60 : vector<128x128xf32>
      %62 = arith.addf %58, %61 : vector<128x128xf32>
      %cst_38 = arith.constant dense<0.000000e+00> : vector<128xf32>
      %63 = vector.multi_reduction <add>, %62, %cst_38 [1] : vector<128x128xf32> to vector<128xf32>
      %64 = vector.shape_cast %63 : vector<128xf32> to vector<128x1xf32>
      %cst_39 = arith.constant 1.280000e+02 : f32
      %65 = vector.broadcast %cst_39 : f32 to vector<128x1xf32>
      %66 = arith.divf %64, %65 : vector<128x1xf32>
      %67 = vector.broadcast %66 : vector<128x1xf32> to vector<128x128xf32>
      %68 = arith.subf %62, %67 : vector<128x128xf32>
      %69 = arith.mulf %68, %68 : vector<128x128xf32>
      %cst_40 = arith.constant dense<0.000000e+00> : vector<128xf32>
      %70 = vector.multi_reduction <add>, %69, %cst_40 [1] : vector<128x128xf32> to vector<128xf32>
      %71 = vector.shape_cast %70 : vector<128xf32> to vector<128x1xf32>
      %cst_41 = arith.constant 1.280000e+02 : f32
      %72 = vector.broadcast %cst_41 : f32 to vector<128x1xf32>
      %73 = arith.divf %71, %72 : vector<128x1xf32>
      %74 = vector.broadcast %66 : vector<128x1xf32> to vector<128x128xf32>
      %75 = arith.subf %62, %74 : vector<128x128xf32>
      %cst_42 = arith.constant 9.99999974E-6 : f32
      %76 = vector.broadcast %cst_42 : f32 to vector<128x1xf32>
      %77 = arith.addf %73, %76 : vector<128x1xf32>
      %78 = math.rsqrt %77 : vector<128x1xf32>
      %79 = vector.broadcast %78 : vector<128x1xf32> to vector<128x128xf32>
      %80 = arith.mulf %75, %79 : vector<128x128xf32>
      %81 = vector.broadcast %33 : vector<1x128xf32> to vector<128x128xf32>
      %82 = arith.mulf %80, %81 : vector<128x128xf32>
      %83 = vector.broadcast %34 : vector<1x128xf32> to vector<128x128xf32>
      %84 = arith.addf %82, %83 : vector<128x128xf32>
      %85 = arith.addf %36, %84 : vector<128x128xf32>
      %cst_43 = arith.constant 0.000000e+00 : f32
      %86 = vector.broadcast %cst_43 : f32 to vector<128x128xf32>
      %87 = arith.maximumf %85, %86 : vector<128x128xf32>
      %c0_44 = arith.constant 0 : index
      %c0_45 = arith.constant 0 : index
      %88 = vector.load %arg11[%c0_44, %c0_45] : memref<128x128xf32, #tpu.memory_space<vmem>>, vector<128x128xf32>
      tpu.vector_store %arg11[%c0_44, %c0_45], %87 {strides = array<i32>} : memref<128x128xf32, #tpu.memory_space<vmem>>, vector<128x128xf32>,
    } else {
    }
    return
  }
  func.func @transform_0(%arg0: i32, %arg1: i32) -> (i32, i32) {
    %c0_i32 = arith.constant 0 : i32
    return %arg0, %arg1 : i32, i32
  }
  func.func @transform_1(%arg0: i32, %arg1: i32) -> (i32, i32) {
    %c0_i32 = arith.constant 0 : i32
    %c0_i32_0 = arith.constant 0 : i32
    return %arg1, %c0_i32 : i32, i32
  }
  func.func @transform_2(%arg0: i32, %arg1: i32) -> (i32, i32) {
    %c0_i32 = arith.constant 0 : i32
    %c0_i32_0 = arith.constant 0 : i32
    %c0_i32_1 = arith.constant 0 : i32
    return %c0_i32, %c0_i32_0 : i32, i32
  }
  func.func @transform_3(%arg0: i32, %arg1: i32) -> (i32, i32) {
    %c0_i32 = arith.constant 0 : i32
    %c0_i32_0 = arith.constant 0 : i32
    %c0_i32_1 = arith.constant 0 : i32
    return %c0_i32, %c0_i32_0 : i32, i32
  }
  func.func @transform_4(%arg0: i32, %arg1: i32) -> (i32, i32) {
    %c0_i32 = arith.constant 0 : i32
    %c0_i32_0 = arith.constant 0 : i32
    %c0_i32_1 = arith.constant 0 : i32
    return %c0_i32, %c0_i32_0 : i32, i32
  }
  func.func @transform_5(%arg0: i32, %arg1: i32) -> (i32, i32) {
    %c0_i32 = arith.constant 0 : i32
    %c0_i32_0 = arith.constant 0 : i32
    %c0_i32_1 = arith.constant 0 : i32
    return %c0_i32, %c0_i32_0 : i32, i32
  }
  func.func @transform_6(%arg0: i32, %arg1: i32) -> (i32, i32) {
    %c0_i32 = arith.constant 0 : i32
    %c0_i32_0 = arith.constant 0 : i32
    %c0_i32_1 = arith.constant 0 : i32
    return %c0_i32, %c0_i32_0 : i32, i32
  }
  func.func @transform_7(%arg0: i32, %arg1: i32) -> (i32, i32) {
    %c0_i32 = arith.constant 0 : i32
    %c0_i32_0 = arith.constant 0 : i32
    %c0_i32_1 = arith.constant 0 : i32
    return %c0_i32, %c0_i32_0 : i32, i32
  }
  func.func @transform_8(%arg0: i32, %arg1: i32) -> (i32, i32) {
    %c0_i32 = arith.constant 0 : i32
    %c0_i32_0 = arith.constant 0 : i32
    %c0_i32_1 = arith.constant 0 : i32
    return %c0_i32, %c0_i32_0 : i32, i32
  }
  func.func @transform_9(%arg0: i32, %arg1: i32) -> (i32, i32) {
    %c0_i32 = arith.constant 0 : i32
    %c0_i32_0 = arith.constant 0 : i32
    return %arg0, %c0_i32 : i32, i32
  }
}

</mosaic_0001>

<bundles_post_ra>
// kernel: allset_transformer_layer.3
= control target key start
LH: loop header
LB: loop body
LE: loop exit
PB: predicated region body
PF: predicated region fallthrough
CT: control target
= control target key end

     0   :  { %s3235_s0 = inlined_call_operand.vmem [shape: bf16[384,256], index: 0, kind: input, shape index: {}]   ;;  %s3236_s1 = inlined_call_operand.vmem [shape: f32[256,132], index: 1, kind: input, shape index: {}]   ;;  %s3237_s2 = inlined_call_operand.vmem [shape: f32[1,128], index: 2, kind: input, shape index: {}]   ;;  %s3238_s3 = inlined_call_operand.vmem [shape: f32[4,128], index: 3, kind: input, shape index: {}]   ;;  %s3239_s4 = inlined_call_operand.vmem [shape: f32[128,128], index: 4, kind: input, shape index: {}]   ;;  %s3240_s5 = inlined_call_operand.vmem [shape: f32[1,128], index: 5, kind: input, shape index: {}]   ;;  %s3241_s6 = inlined_call_operand.vmem [shape: f32[1,128], index: 6, kind: input, shape index: {}]   ;;  %s3242_s7 = inlined_call_operand.vmem [shape: f32[1,128], index: 7, kind: input, shape index: {}]   ;;  %s3243_s8 = inlined_call_operand.vmem [shape: f32[1,128], index: 8, kind: input, shape index: {}]   ;;  %s3244_s9 = inlined_call_operand.vmem [shape: f32[384,128], index: 9, kind: output, shape index: {}]  }
   0x1   :  { %3245 = sst [smem:[#allocation4_spill]] %s3235_s0 }
   0x2   :  { %s2489_s30 = smov 0   ;;  %s2491_s10 = smov 0  }
   0x3   :  { %s2493_s11 = smov 0   ;;  %s2495_s12 = smov 0  }
   0x4   :  { %s2497_s13 = smov 0   ;;  %s2499_s14 = smov 0  }
   0x5   :  { %s2501_s15 = smov 0  }
   0x6 LB: > { %s28_s16 = sadd.s32 1, %s2427_s13  ;;  %s31_s17 = sadd.s32 1, %s2431_s14  ;;  %s2435_s15 = sphi %s2501_s15, %s19_s15   ;;  %s2431_s14 = sphi %s2499_s14, %s3252_s14   ;;  %s2427_s13 = sphi %s2497_s13, %s3251_s13   ;;  %s2423_s12 = sphi %s2495_s12, %s3250_s12   ;;  %s2419_s11 = sphi %s2493_s11, %s3249_s11   ;;  %s2415_s10 = sphi %s2491_s10, %s3248_s10   ;;  %s2411_s30 = sphi %s2489_s30, %s3247_s30  }
   0x7   : > { %p29_p0 = scmp.ge.s32.totalorder %s28_s16, 2  ;;  %p47_p1 = scmp.ne.s32.totalorder %s2415_s10, %s2411_s30 }
   0x8   : > { %p48_p2 = scmp.eq.s32.totalorder %s2435_s15, 0  ;;  %s40_s21 = sadd.s32 1, %s2415_s10 }
   0x9   : > { %s3254_s16 = smov (%p29_p0, %s28_s16), 0  ;;  %s3256_s17 = smov (!%p29_p0, %s31_s17), %s2431_s14 }
   0xa   : > { %p49_p3 = por %p48_p2, %p47_p1  ;;  %p33_p4 = scmp.ge.s32.totalorder %s3256_s17, 3 }
   0xb   : > { %s36_s18 = ssub.s32 %s2427_s13, %s3254_s16  ;;  %p1953_p6 = scmp.ge.s32.totalorder %s2435_s15, 6 }
   0xc   : > { %s3258_s17 = smov (%p33_p4, %s3256_s17), 0 }
   0xd   : > { %s35_s19 = ssub.s32 %s2431_s14, %s3258_s17  ;;  %293 = sbr.rel (%p1953_p6) target bundleno = 38 (0x26), region = 44 }
   0xe   : > { %s37_s20 = sor.u32 %s36_s18, %s35_s19 }
   0xf   : > { %p38_p5 = scmp.eq.s32.totalorder %s37_s20, 0 }
  0x11   : > { %s2540_s22 = scalar_select %p38_p5, %s2415_s10, %s40_s21  }
  0x12   : > { %296 = sbr.rel (!%p49_p3) target bundleno = 38 (0x26), region = 48  ;;  %s298_s23 = sand.u32 (%p49_p3), 1, %s2415_s10  }
  0x13   : > { %s1991_s24 = sshll.u32 (%p49_p3), %s2431_s14, 5  ;;  %s1954_s25 = sshll.u32 (%p49_p3), %s298_s23, 6 }
  0x14   : > { %s303_s26 = sadd.s32 (%p49_p3), %s2427_s13, %s1991_s24  ;;  %s3246_s0 = sld [smem:[#allocation4_spill]] (%p49_p3) }
  0x15   : > { %s1957_s27 = sshll.u32 (%p49_p3), %s303_s26, 2  ;;  %s300_s19 = scalar_lea.vmem (%p49_p3), [#allocation3], %s1954_s25 }
  0x1a   : > { %s2549_s18 = scalar_lea.vmem %s3246_s0, %s1957_s27 }
  0x1b   : > { %v322_v0 = vld [vmem:[%s2549_s18] sm:$0xf]  ;;  %v324_v1 = vld [vmem:[%s2549_s18 + $0x8] sm:$0xf]  ;;  %v326_v2 = vld [vmem:[%s2549_s18 + $0x10] sm:$0xf] }
  0x1c   : > { %323 = vst [vmem:[%s300_s19] sm:$0xf] %v322_v0  ;;  %325 = vst [vmem:[%s300_s19 + $0x4] sm:$0xf] %v324_v1  ;;  %v328_v3 = vld [vmem:[%s2549_s18 + $0x18] sm:$0xf] }
  0x1d   : > { %327 = vst [vmem:[%s300_s19 + $0x8] sm:$0xf] %v326_v2  ;;  %v330_v4 = vld [vmem:[%s2549_s18 + $0x20] sm:$0xf]  ;;  %v332_v5 = vld [vmem:[%s2549_s18 + $0x28] sm:$0xf] }
  0x1e   : > { %329 = vst [vmem:[%s300_s19 + $0xc] sm:$0xf] %v328_v3  ;;  %331 = vst [vmem:[%s300_s19 + $0x10] sm:$0xf] %v330_v4  ;;  %v334_v6 = vld [vmem:[%s2549_s18 + $0x30] sm:$0xf] }
  0x1f   : > { %333 = vst [vmem:[%s300_s19 + $0x14] sm:$0xf] %v332_v5  ;;  %v336_v7 = vld [vmem:[%s2549_s18 + $0x38] sm:$0xf]  ;;  %v338_v8 = vld [vmem:[%s2549_s18 + $0x40] sm:$0xf] }
  0x20   : > { %335 = vst [vmem:[%s300_s19 + $0x18] sm:$0xf] %v334_v6  ;;  %337 = vst [vmem:[%s300_s19 + $0x1c] sm:$0xf] %v336_v7  ;;  %v340_v9 = vld [vmem:[%s2549_s18 + $0x48] sm:$0xf] }
  0x21   : > { %339 = vst [vmem:[%s300_s19 + $0x20] sm:$0xf] %v338_v8  ;;  %v342_v10 = vld [vmem:[%s2549_s18 + $0x50] sm:$0xf]  ;;  %v344_v11 = vld [vmem:[%s2549_s18 + $0x58] sm:$0xf] }
  0x22   : > { %341 = vst [vmem:[%s300_s19 + $0x24] sm:$0xf] %v340_v9  ;;  %343 = vst [vmem:[%s300_s19 + $0x28] sm:$0xf] %v342_v10  ;;  %v346_v12 = vld [vmem:[%s2549_s18 + $0x60] sm:$0xf] }
  0x23   : > { %345 = vst [vmem:[%s300_s19 + $0x2c] sm:$0xf] %v344_v11  ;;  %v348_v13 = vld [vmem:[%s2549_s18 + $0x68] sm:$0xf]  ;;  %v350_v14 = vld [vmem:[%s2549_s18 + $0x70] sm:$0xf] }
  0x24   : > { %347 = vst [vmem:[%s300_s19 + $0x30] sm:$0xf] %v346_v12  ;;  %349 = vst [vmem:[%s300_s19 + $0x34] sm:$0xf] %v348_v13  ;;  %v352_v15 = vld [vmem:[%s2549_s18 + $0x78] sm:$0xf] }
  0x25   : > { %351 = vst [vmem:[%s300_s19 + $0x38] sm:$0xf] %v350_v14  ;;  %353 = vst [vmem:[%s300_s19 + $0x3c] sm:$0xf] %v352_v15 }
  0x26 PF: > { %p1958_p7 = scmp.ge.s32.totalorder %s2435_s15, 1  ;;  %p418_p8 = scmp.lt.s32.totalorder %s2435_s15, 7 }
  0x28   : > { %p419_p9 = pnand %p1958_p7, %p418_p8 }
  0x29   : > { %s425_s20 = sand.u32 (!%p419_p9), 1, %s2411_s30   ;;  %s1960_s21 = sshll.u32 (!%p419_p9), %s2419_s11, 4 }
  0x2a   : > { %422 = sbr.rel (%p419_p9) target bundleno = 1431 (0x597), region = 93  ;;  %s1959_s23 = sshll.u32 (!%p419_p9), %s425_s20, 6 }
  0x2b   : > { %p468_p10 = scmp.lt.s32.totalorder (!%p419_p9), %s1960_s21, 31  ;;  %s1963_s24 = sshll.u32 (!%p419_p9), %s2423_s12, 4 }
  0x2c   : > { %p475_p11 = scmp.lt.s32.totalorder (!%p419_p9), %s1963_s24, 47  ;;  %s2582_s30 = scalar_lea.vmem (!%p419_p9), [#allocation3], %s1959_s23 }
  0x2d   : > { %p1965_p12 = scmp.ne.s32.totalorder (!%p419_p9), %s2419_s11, 0 }
  0x2f   : > { %s3260_s21 = smov (!%p468_p10, %s1960_s21), 31  ;;  %s3262_s24 = smov (!%p475_p11, %s1963_s24), 47 }
  0x30   : > { %s1992_s25 = sshll.u32 %s3260_s21, 4  ;;  %s1964_s29 = sshll.u32 %s3262_s24, 3 }
  0x31   : > { %s2575_s28 = scalar_lea.vmem %s3236_s1, %s1992_s25  ;;  %s2580_s0 = scalar_lea.vmem %s3244_s9, %s1964_s29 }
  0x32   : > { %483 = sbr.rel (%p1965_p12) target bundleno = 72 (0x48), region = 101 }
  0x37   : > { %vm485_vm0 = vcmask 31744   ;;  %v2437_v16 = vmov 0.0  }
  0x38   : > { %484 = vst [vmem:[#allocation2] sm:$0xff] %v2437_v16  ;;  %487 = vst [vmem:[#allocation2 + $0x10] sm:$0xff] %v2437_v16 }
  0x39   : > { %489 = vst [vmem:[#allocation2 + $0x20] sm:$0xff] %v2437_v16  ;;  %491 = vst [vmem:[#allocation2 + $0x30] sm:$0xff] %v2437_v16 }
  0x3a   : > { %493 = vst [vmem:[#allocation2 + $0x40] sm:$0xff] %v2437_v16  ;;  %495 = vst [vmem:[#allocation2 + $0x50] sm:$0xff] %v2437_v16 }
  0x3b   : > { %497 = vst [vmem:[#allocation2 + $0x60] sm:$0xff] %v2437_v16  ;;  %499 = vst [vmem:[#allocation2 + $0x70] sm:$0xff] %v2437_v16 }
  0x3c   : > { %501 = vst [vmem:[#allocation2 + $0x80] sm:$0xff] %v2437_v16  ;;  %503 = vst [vmem:[#allocation2 + $0x90] sm:$0xff] %v2437_v16 }
  0x3d   : > { %505 = vst [vmem:[#allocation2 + $0xa0] sm:$0xff] %v2437_v16  ;;  %507 = vst [vmem:[#allocation2 + $0xb0] sm:$0xff] %v2437_v16 }
  0x3e   : > { %509 = vst [vmem:[#allocation2 + $0xc0] sm:$0xff] %v2437_v16  ;;  %511 = vst [vmem:[#allocation2 + $0xd0] sm:$0xff] %v2437_v16 }
  0x3f   : > { %513 = vst [vmem:[#allocation2 + $0xe0] sm:$0xff] %v2437_v16  ;;  %515 = vst [vmem:[#allocation2 + $0xf0] sm:$0xff] %v2437_v16 }
  0x40   : > { %486 = vst.msk [vmem:[#allocation2 + $0x8] sm:$0xff] %vm485_vm0, %v2437_v16  ;;  %488 = vst.msk [vmem:[#allocation2 + $0x18] sm:$0xff] %vm485_vm0, %v2437_v16 }
  0x41   : > { %490 = vst.msk [vmem:[#allocation2 + $0x28] sm:$0xff] %vm485_vm0, %v2437_v16  ;;  %492 = vst.msk [vmem:[#allocation2 + $0x38] sm:$0xff] %vm485_vm0, %v2437_v16 }
  0x42   : > { %494 = vst.msk [vmem:[#allocation2 + $0x48] sm:$0xff] %vm485_vm0, %v2437_v16  ;;  %496 = vst.msk [vmem:[#allocation2 + $0x58] sm:$0xff] %vm485_vm0, %v2437_v16 }
  0x43   : > { %498 = vst.msk [vmem:[#allocation2 + $0x68] sm:$0xff] %vm485_vm0, %v2437_v16  ;;  %500 = vst.msk [vmem:[#allocation2 + $0x78] sm:$0xff] %vm485_vm0, %v2437_v16 }
  0x44   : > { %502 = vst.msk [vmem:[#allocation2 + $0x88] sm:$0xff] %vm485_vm0, %v2437_v16  ;;  %504 = vst.msk [vmem:[#allocation2 + $0x98] sm:$0xff] %vm485_vm0, %v2437_v16 }
  0x45   : > { %506 = vst.msk [vmem:[#allocation2 + $0xa8] sm:$0xff] %vm485_vm0, %v2437_v16  ;;  %508 = vst.msk [vmem:[#allocation2 + $0xb8] sm:$0xff] %vm485_vm0, %v2437_v16 }
  0x46   : > { %510 = vst.msk [vmem:[#allocation2 + $0xc8] sm:$0xff] %vm485_vm0, %v2437_v16  ;;  %512 = vst.msk [vmem:[#allocation2 + $0xd8] sm:$0xff] %vm485_vm0, %v2437_v16 }
  0x47   : > { %514 = vst.msk [vmem:[#allocation2 + $0xe8] sm:$0xff] %vm485_vm0, %v2437_v16  ;;  %516 = vst.msk [vmem:[#allocation2 + $0xf8] sm:$0xff] %vm485_vm0, %v2437_v16 }
  0x48 PF: > { %v580_v17 = vld [vmem:[%s2575_s28 + $0xf8] sm:$0xff]  ;;  %v579_v18 = vld [vmem:[%s2575_s28 + $0xf0] sm:$0xff]  ;;  %v578_v19 = vld [vmem:[%s2575_s28 + $0xe8] sm:$0xff]  ;;  %v2438_v53 = vmov 0.0   ;;  %vm807_vm1 = vcmask 31744   ;;  %p1966_p13 = scmp.ne.s32.totalorder %s2419_s11, 1 }
  0x49   : > { %581 = vmatprep.subr.mxu0 %v580_v17  ;;  %2163 = vmatprep.subr.mxu1 %v580_v17  ;;  %v577_v20 = vld [vmem:[%s2575_s28 + $0xe0] sm:$0xff]  ;;  %v576_v21 = vld [vmem:[%s2575_s28 + $0xd8] sm:$0xff]  ;;  %v575_v22 = vld [vmem:[%s2575_s28 + $0xd0] sm:$0xff] }
  0x4a   : > { %582 = vmatpush1.msra.mxu0 %v579_v18  ;;  %2179 = vmatpush1.msra.mxu1 %v579_v18  ;;  %v574_v23 = vld [vmem:[%s2575_s28 + $0xc8] sm:$0xff]  ;;  %v573_v24 = vld [vmem:[%s2575_s28 + $0xc0] sm:$0xff]  ;;  %v572_v25 = vld [vmem:[%s2575_s28 + $0xb8] sm:$0xff] }
  0x4b   : > { %583 = vmatprep.subr.mxu0 %v578_v19  ;;  %2164 = vmatprep.subr.mxu1 %v578_v19  ;;  %v571_v26 = vld [vmem:[%s2575_s28 + $0xb0] sm:$0xff]  ;;  %v570_v27 = vld [vmem:[%s2575_s28 + $0xa8] sm:$0xff]  ;;  %v569_v28 = vld [vmem:[%s2575_s28 + $0xa0] sm:$0xff] }
  0x4c   : > { %584 = vmatpush1.msra.mxu0 %v577_v20  ;;  %2180 = vmatpush1.msra.mxu1 %v577_v20  ;;  %v568_v29 = vld [vmem:[%s2575_s28 + $0x98] sm:$0xff]  ;;  %v567_v30 = vld [vmem:[%s2575_s28 + $0x90] sm:$0xff]  ;;  %v566_v31 = vld [vmem:[%s2575_s28 + $0x88] sm:$0xff] }
  0x4d   : > { %585 = vmatprep.subr.mxu0 %v576_v21  ;;  %2165 = vmatprep.subr.mxu1 %v576_v21  ;;  %v565_v32 = vld [vmem:[%s2575_s28 + $0x80] sm:$0xff]  ;;  %v564_v33 = vld [vmem:[%s2575_s28 + $0x78] sm:$0xff]  ;;  %v563_v34 = vld [vmem:[%s2575_s28 + $0x70] sm:$0xff] }
  0x4e   : > { %586 = vmatpush1.msra.mxu0 %v575_v22  ;;  %2181 = vmatpush1.msra.mxu1 %v575_v22  ;;  %v562_v35 = vld [vmem:[%s2575_s28 + $0x68] sm:$0xff]  ;;  %v561_v36 = vld [vmem:[%s2575_s28 + $0x60] sm:$0xff]  ;;  %v560_v37 = vld [vmem:[%s2575_s28 + $0x58] sm:$0xff] }
  0x4f   : > { %587 = vmatprep.subr.mxu0 %v574_v23  ;;  %2166 = vmatprep.subr.mxu1 %v574_v23  ;;  %v559_v38 = vld [vmem:[%s2575_s28 + $0x50] sm:$0xff]  ;;  %v558_v39 = vld [vmem:[%s2575_s28 + $0x48] sm:$0xff]  ;;  %v557_v40 = vld [vmem:[%s2575_s28 + $0x40] sm:$0xff] }
  0x50   : > { %588 = vmatpush1.msra.mxu0 %v573_v24  ;;  %2182 = vmatpush1.msra.mxu1 %v573_v24  ;;  %v556_v41 = vld [vmem:[%s2575_s28 + $0x38] sm:$0xff]  ;;  %v555_v42 = vld [vmem:[%s2575_s28 + $0x30] sm:$0xff]  ;;  %v554_v43 = vld [vmem:[%s2575_s28 + $0x28] sm:$0xff] }
  0x51   : > { %589 = vmatprep.subr.mxu0 %v572_v25  ;;  %2167 = vmatprep.subr.mxu1 %v572_v25  ;;  %v553_v44 = vld [vmem:[%s2575_s28 + $0x20] sm:$0xff]  ;;  %v552_v45 = vld [vmem:[%s2575_s28 + $0x18] sm:$0xff]  ;;  %v551_v46 = vld [vmem:[%s2575_s28 + $0x10] sm:$0xff] }
  0x52   : > { %590 = vmatpush1.msra.mxu0 %v571_v26  ;;  %2183 = vmatpush1.msra.mxu1 %v571_v26  ;;  %v1994_v47 = vld [vmem:[%s2582_s30] sm:$0xff]   ;;  %v550_v49 = vld [vmem:[%s2575_s28 + $0x8] sm:$0xff]  ;;  %v2026_v62 = vld [vmem:[%s2582_s30 + $0x10] sm:$0xff]  }
  0x53   : > { %591 = vmatprep.subr.mxu0 %v570_v27  ;;  %2168 = vmatprep.subr.mxu1 %v570_v27  ;;  %v2028_v48 = vld [vmem:[%s2582_s30 + $0x20] sm:$0xff]   ;;  %v1995_v51 = vunpack.c.l.bf16 %v1994_v47  ;;  %v1996_v54 = vunpack.c.h.bf16 %v1994_v47  ;;  %v2025_v56 = vld [vmem:[%s2582_s30 + $0x8] sm:$0xff]   ;;  %v2030_v63 = vld [vmem:[%s2582_s30 + $0x30] sm:$0xff]   ;;  %v2003_v0 = vunpack.c.l.bf16 %v2026_v62  ;;  %v2004_v2 = vunpack.c.h.bf16 %v2026_v62 }
  0x54   : > { %592 = vmatpush1.msra.mxu0 %v569_v28  ;;  %2184 = vmatpush1.msra.mxu1 %v569_v28  ;;  %v549_v50 = vld [vmem:[%s2575_s28] sm:$0xff]  ;;  %v2011_v52 = vunpack.c.l.bf16 %v2028_v48  ;;  %v2012_v55 = vunpack.c.h.bf16 %v2028_v48  ;;  %v2029_v57 = vld [vmem:[%s2582_s30 + $0x28] sm:$0xff]   ;;  %v1999_v58 = vunpack.c.l.bf16 %v2025_v56  ;;  %v2000_v60 = vunpack.c.h.bf16 %v2025_v56  ;;  %v2027_v4 = vld [vmem:[%s2582_s30 + $0x18] sm:$0xff]  }
  0x55   : > { %593 = vmatprep.subr.mxu0 %v568_v29  ;;  %2169 = vmatprep.subr.mxu1 %v568_v29  ;;  %v2015_v59 = vunpack.c.l.bf16 %v2029_v57  ;;  %v2016_v61 = vunpack.c.h.bf16 %v2029_v57  ;;  %v2019_v1 = vunpack.c.l.bf16 %v2030_v63  ;;  %v2020_v3 = vunpack.c.h.bf16 %v2030_v63  ;;  %v2031_v5 = vld [vmem:[%s2582_s30 + $0x38] sm:$0xff]   ;;  %v742_v10 = vld [vmem:[#allocation2] sm:$0xff]  ;;  %v743_v14 = vld [vmem:[#allocation2 + $0x8] sm:$0xff] }
  0x56   : > { %594 = vmatpush1.msra.mxu0 %v567_v30  ;;  %2185 = vmatpush1.msra.mxu1 %v567_v30  ;;  %v2007_v6 = vunpack.c.l.bf16 %v2027_v4  ;;  %v2023_v7 = vunpack.c.l.bf16 %v2031_v5  ;;  %v2008_v8 = vunpack.c.h.bf16 %v2027_v4  ;;  %v2024_v9 = vunpack.c.h.bf16 %v2031_v5  ;;  %v758_v11 = vld [vmem:[#allocation2 + $0x80] sm:$0xff]  ;;  %v759_v15 = vld [vmem:[#allocation2 + $0x88] sm:$0xff]  ;;  %v744_v20 = vld [vmem:[#allocation2 + $0x10] sm:$0xff] }
  0x57   : > { %595 = vmatprep.subr.mxu0 %v566_v31  ;;  %2170 = vmatprep.subr.mxu1 %v566_v31  ;;  %v760_v21 = vld [vmem:[#allocation2 + $0x90] sm:$0xff]  ;;  %v745_v26 = vld [vmem:[#allocation2 + $0x18] sm:$0xff]  ;;  %v750_v56 = vld [vmem:[#allocation2 + $0x40] sm:$0xff] }
  0x58   : > { %596 = vmatpush1.msra.mxu0 %v565_v32  ;;  %2186 = vmatpush1.msra.mxu1 %v565_v32  ;;  %v761_v27 = vld [vmem:[#allocation2 + $0x98] sm:$0xff]  ;;  %v746_v32 = vld [vmem:[#allocation2 + $0x20] sm:$0xff]  ;;  %v751_v62 = vld [vmem:[#allocation2 + $0x48] sm:$0xff] }
  0x59   : > { %597 = vmatprep.subr.mxu0 %v564_v33  ;;  %2171 = vmatprep.subr.mxu1 %v564_v33  ;;  %v762_v33 = vld [vmem:[#allocation2 + $0xa0] sm:$0xff]  ;;  %v767_v63 = vld [vmem:[#allocation2 + $0xc8] sm:$0xff]  ;;  %v752_v4 = vld [vmem:[#allocation2 + $0x50] sm:$0xff] }
  0x5a   : > { %598 = vmatpush1.msra.mxu0 %v563_v34  ;;  %2187 = vmatpush1.msra.mxu1 %v563_v34  ;;  %v766_v57 = vld [vmem:[#allocation2 + $0xc0] sm:$0xff]  ;;  %v768_v5 = vld [vmem:[#allocation2 + $0xd0] sm:$0xff] }
  0x5b   : > { %599 = vmatprep.subr.mxu0 %v562_v35  ;;  %2172 = vmatprep.subr.mxu1 %v562_v35 }
  0x5c   : > { %600 = vmatpush1.msra.mxu0 %v561_v36  ;;  %2188 = vmatpush1.msra.mxu1 %v561_v36 }
  0x5d   : > { %601 = vmatprep.subr.mxu0 %v560_v37  ;;  %2173 = vmatprep.subr.mxu1 %v560_v37 }
  0x5e   : > { %602 = vmatpush1.msra.mxu0 %v559_v38  ;;  %2189 = vmatpush1.msra.mxu1 %v559_v38  ;;  %v747_v38 = vld [vmem:[#allocation2 + $0x28] sm:$0xff] }
  0x5f   : > { %603 = vmatprep.subr.mxu0 %v558_v39  ;;  %2174 = vmatprep.subr.mxu1 %v558_v39  ;;  %v763_v39 = vld [vmem:[#allocation2 + $0xa8] sm:$0xff] }
  0x60   : > { %604 = vmatpush1.msra.mxu0 %v557_v40  ;;  %2190 = vmatpush1.msra.mxu1 %v557_v40 }
  0x61   : > { %605 = vmatprep.subr.mxu0 %v556_v41  ;;  %2175 = vmatprep.subr.mxu1 %v556_v41 }
  0x62   : > { %606 = vmatpush1.msra.mxu0 %v555_v42  ;;  %2191 = vmatpush1.msra.mxu1 %v555_v42 }
  0x63   : > { %607 = vmatprep.subr.mxu0 %v554_v43  ;;  %2176 = vmatprep.subr.mxu1 %v554_v43 }
  0x64   : > { %608 = vmatpush1.msra.mxu0 %v553_v44  ;;  %2192 = vmatpush1.msra.mxu1 %v553_v44  ;;  %v748_v44 = vld [vmem:[#allocation2 + $0x30] sm:$0xff] }
  0x65   : > { %609 = vmatprep.subr.mxu0 %v552_v45  ;;  %2177 = vmatprep.subr.mxu1 %v552_v45  ;;  %v764_v45 = vld [vmem:[#allocation2 + $0xb0] sm:$0xff] }
  0x66   : > { %610 = vmatpush1.msra.mxu0 %v551_v46  ;;  %2193 = vmatpush1.msra.mxu1 %v551_v46 }
  0x67   : > { %611 = vmatprep.subr.mxu0 %v550_v49  ;;  %2178 = vmatprep.subr.mxu1 %v550_v49 }
  0x68   : > { %612 = vmatpush1.msra.mxu0 %v549_v50  ;;  %2194 = vmatpush1.msra.mxu1 %v549_v50  ;;  %v749_v50 = vld [vmem:[#allocation2 + $0x38] sm:$0xff] }
  0x69   : > { %645 = vmatprep.mubr.f32.mxu0 %v2438_v53  ;;  %693 = vmatprep.mubr.f32.mxu1 %v2438_v53 }
  0x6a   : > { %646 = vmatmul.mubr.f32.vlgmr.msra.gmra.mxu0 %v1995_v51  ;;  %694 = vmatmul.mubr.f32.vlgmr.msra.gmra.mxu1 %v2011_v52  ;;  %v765_v51 = vld [vmem:[#allocation2 + $0xb8] sm:$0xff] }
  0x6b   : > { %651 = vmatprep.mubr.f32.mxu0 %v2438_v53  ;;  %699 = vmatprep.mubr.f32.mxu1 %v2438_v53 }
  0x6e   : > { %652 = vmatmul.mubr.f32.gmra.mxu0 %v1996_v54  ;;  %700 = vmatmul.mubr.f32.gmra.mxu1 %v2012_v55 }
  0x6f   : > { %657 = vmatprep.mubr.f32.mxu0 %v2438_v53  ;;  %705 = vmatprep.mubr.f32.mxu1 %v2438_v53 }
  0x72   : > { %658 = vmatmul.mubr.f32.gmra.mxu0 %v1999_v58  ;;  %706 = vmatmul.mubr.f32.gmra.mxu1 %v2015_v59 }
  0x73   : > { %663 = vmatprep.mubr.f32.mxu0 %v2438_v53  ;;  %711 = vmatprep.mubr.f32.mxu1 %v2438_v53 }
  0x76   : > { %664 = vmatmul.mubr.f32.gmra.mxu0 %v2000_v60  ;;  %712 = vmatmul.mubr.f32.gmra.mxu1 %v2016_v61 }
  0x77   : > { %669 = vmatprep.mubr.f32.mxu0 %v2438_v53  ;;  %717 = vmatprep.mubr.f32.mxu1 %v2438_v53 }
  0x7a   : > { %670 = vmatmul.mubr.f32.gmra.mxu0 %v2003_v0  ;;  %718 = vmatmul.mubr.f32.gmra.mxu1 %v2019_v1 }
  0x7b   : > { %675 = vmatprep.mubr.f32.mxu0 %v2438_v53  ;;  %723 = vmatprep.mubr.f32.mxu1 %v2438_v53 }
  0x7e   : > { %676 = vmatmul.mubr.f32.gmra.mxu0 %v2004_v2  ;;  %724 = vmatmul.mubr.f32.gmra.mxu1 %v2020_v3 }
  0x7f   : > { %681 = vmatprep.mubr.f32.mxu0 %v2438_v53  ;;  %729 = vmatprep.mubr.f32.mxu1 %v2438_v53 }
  0x82   : > { %682 = vmatmul.mubr.f32.gmra.mxu0 %v2007_v6  ;;  %730 = vmatmul.mubr.f32.gmra.mxu1 %v2023_v7 }
  0x83   : > { %687 = vmatprep.mubr.f32.mxu0 %v2438_v53  ;;  %735 = vmatprep.mubr.f32.mxu1 %v2438_v53 }
  0x86   : > { %688 = vmatmul.mubr.f32.gmra.mxu0 %v2008_v8  ;;  %736 = vmatmul.mubr.f32.gmra.mxu1 %v2024_v9 }
 0x12a   : > { %v647_v12 = vpop.f32.mrf.mxu0  ;;  %v695_v13 = vpop.f32.mrf.mxu1 }
 0x12b   : > { %v774_v16 = vadd.f32 %v742_v10, %v647_v12  ;;  %v790_v17 = vadd.f32 %v758_v11, %v695_v13  ;;  %v753_v10 = vld [vmem:[#allocation2 + $0x58] sm:$0xff] }
 0x12c   : > { %v649_v18 = vpop.f32.mrf.mxu0  ;;  %v697_v19 = vpop.f32.mrf.mxu1  ;;  %v769_v11 = vld [vmem:[#allocation2 + $0xd8] sm:$0xff] }
 0x12d   : > { %806 = vst [vmem:[#allocation2] sm:$0xff] %v774_v16  ;;  %823 = vst [vmem:[#allocation2 + $0x80] sm:$0xff] %v790_v17  ;;  %v775_v22 = vadd.f32 %v743_v14, %v649_v18  ;;  %v791_v23 = vadd.f32 %v759_v15, %v697_v19  ;;  %v754_v16 = vld [vmem:[#allocation2 + $0x60] sm:$0xff] }
 0x12e   : > { %v653_v24 = vpop.f32.mrf.mxu0  ;;  %v701_v25 = vpop.f32.mrf.mxu1  ;;  %v770_v17 = vld [vmem:[#allocation2 + $0xe0] sm:$0xff] }
 0x12f   : > { %808 = vst.msk [vmem:[#allocation2 + $0x8] sm:$0xff] %vm807_vm1, %v775_v22  ;;  %824 = vst.msk [vmem:[#allocation2 + $0x88] sm:$0xff] %vm807_vm1, %v791_v23  ;;  %v776_v28 = vadd.f32 %v744_v20, %v653_v24  ;;  %v792_v29 = vadd.f32 %v760_v21, %v701_v25  ;;  %v755_v22 = vld [vmem:[#allocation2 + $0x68] sm:$0xff] }
 0x130   : > { %v655_v30 = vpop.f32.mrf.mxu0  ;;  %v703_v31 = vpop.f32.mrf.mxu1  ;;  %v771_v23 = vld [vmem:[#allocation2 + $0xe8] sm:$0xff] }
 0x131   : > { %809 = vst [vmem:[#allocation2 + $0x10] sm:$0xff] %v776_v28  ;;  %825 = vst [vmem:[#allocation2 + $0x90] sm:$0xff] %v792_v29  ;;  %v777_v34 = vadd.f32 %v745_v26, %v655_v30  ;;  %v793_v35 = vadd.f32 %v761_v27, %v703_v31  ;;  %v756_v28 = vld [vmem:[#allocation2 + $0x70] sm:$0xff] }
 0x132   : > { %v659_v36 = vpop.f32.mrf.mxu0  ;;  %v707_v37 = vpop.f32.mrf.mxu1  ;;  %v772_v29 = vld [vmem:[#allocation2 + $0xf0] sm:$0xff] }
 0x133   : > { %810 = vst.msk [vmem:[#allocation2 + $0x18] sm:$0xff] %vm807_vm1, %v777_v34  ;;  %826 = vst.msk [vmem:[#allocation2 + $0x98] sm:$0xff] %vm807_vm1, %v793_v35  ;;  %v778_v40 = vadd.f32 %v746_v32, %v659_v36  ;;  %v794_v41 = vadd.f32 %v762_v33, %v707_v37  ;;  %v757_v34 = vld [vmem:[#allocation2 + $0x78] sm:$0xff] }
 0x134   : > { %v661_v42 = vpop.f32.mrf.mxu0  ;;  %v709_v43 = vpop.f32.mrf.mxu1  ;;  %v773_v35 = vld [vmem:[#allocation2 + $0xf8] sm:$0xff] }
 0x135   : > { %811 = vst [vmem:[#allocation2 + $0x20] sm:$0xff] %v778_v40  ;;  %827 = vst [vmem:[#allocation2 + $0xa0] sm:$0xff] %v794_v41  ;;  %v779_v46 = vadd.f32 %v747_v38, %v661_v42  ;;  %v795_v47 = vadd.f32 %v763_v39, %v709_v43 }
 0x136   : > { %v665_v48 = vpop.f32.mrf.mxu0  ;;  %v713_v49 = vpop.f32.mrf.mxu1 }
 0x137   : > { %812 = vst.msk [vmem:[#allocation2 + $0x28] sm:$0xff] %vm807_vm1, %v779_v46  ;;  %828 = vst.msk [vmem:[#allocation2 + $0xa8] sm:$0xff] %vm807_vm1, %v795_v47  ;;  %v780_v52 = vadd.f32 %v748_v44, %v665_v48  ;;  %v796_v53 = vadd.f32 %v764_v45, %v713_v49 }
 0x138   : > { %v667_v54 = vpop.f32.mrf.mxu0  ;;  %v715_v55 = vpop.f32.mrf.mxu1 }
 0x139   : > { %813 = vst [vmem:[#allocation2 + $0x30] sm:$0xff] %v780_v52  ;;  %829 = vst [vmem:[#allocation2 + $0xb0] sm:$0xff] %v796_v53  ;;  %v781_v58 = vadd.f32 %v749_v50, %v667_v54  ;;  %v797_v59 = vadd.f32 %v765_v51, %v715_v55 }
 0x13a   : > { %v671_v60 = vpop.f32.mrf.mxu0  ;;  %v719_v61 = vpop.f32.mrf.mxu1 }
 0x13b   : > { %814 = vst.msk [vmem:[#allocation2 + $0x38] sm:$0xff] %vm807_vm1, %v781_v58  ;;  %830 = vst.msk [vmem:[#allocation2 + $0xb8] sm:$0xff] %vm807_vm1, %v797_v59  ;;  %v782_v0 = vadd.f32 %v750_v56, %v671_v60  ;;  %v798_v1 = vadd.f32 %v766_v57, %v719_v61 }
 0x13c   : > { %v673_v2 = vpop.f32.mrf.mxu0  ;;  %v721_v3 = vpop.f32.mrf.mxu1 }
 0x13d   : > { %815 = vst [vmem:[#allocation2 + $0x40] sm:$0xff] %v782_v0  ;;  %831 = vst [vmem:[#allocation2 + $0xc0] sm:$0xff] %v798_v1  ;;  %v783_v6 = vadd.f32 %v751_v62, %v673_v2  ;;  %v799_v7 = vadd.f32 %v767_v63, %v721_v3 }
 0x13e   : > { %v677_v8 = vpop.f32.mrf.mxu0  ;;  %v725_v9 = vpop.f32.mrf.mxu1 }
 0x13f   : > { %816 = vst.msk [vmem:[#allocation2 + $0x48] sm:$0xff] %vm807_vm1, %v783_v6  ;;  %832 = vst.msk [vmem:[#allocation2 + $0xc8] sm:$0xff] %vm807_vm1, %v799_v7  ;;  %v784_v12 = vadd.f32 %v752_v4, %v677_v8  ;;  %v800_v13 = vadd.f32 %v768_v5, %v725_v9 }
 0x140   : > { %v679_v14 = vpop.f32.mrf.mxu0  ;;  %v727_v15 = vpop.f32.mrf.mxu1 }
 0x141   : > { %817 = vst [vmem:[#allocation2 + $0x50] sm:$0xff] %v784_v12  ;;  %833 = vst [vmem:[#allocation2 + $0xd0] sm:$0xff] %v800_v13  ;;  %v785_v18 = vadd.f32 %v753_v10, %v679_v14  ;;  %v801_v19 = vadd.f32 %v769_v11, %v727_v15 }
 0x142   : > { %v683_v20 = vpop.f32.mrf.mxu0  ;;  %v731_v21 = vpop.f32.mrf.mxu1 }
 0x143   : > { %818 = vst.msk [vmem:[#allocation2 + $0x58] sm:$0xff] %vm807_vm1, %v785_v18  ;;  %834 = vst.msk [vmem:[#allocation2 + $0xd8] sm:$0xff] %vm807_vm1, %v801_v19  ;;  %v786_v24 = vadd.f32 %v754_v16, %v683_v20  ;;  %v802_v25 = vadd.f32 %v770_v17, %v731_v21 }
 0x144   : > { %v685_v26 = vpop.f32.mrf.mxu0  ;;  %v733_v27 = vpop.f32.mrf.mxu1 }
 0x145   : > { %819 = vst [vmem:[#allocation2 + $0x60] sm:$0xff] %v786_v24  ;;  %835 = vst [vmem:[#allocation2 + $0xe0] sm:$0xff] %v802_v25  ;;  %v787_v30 = vadd.f32 %v755_v22, %v685_v26  ;;  %v803_v31 = vadd.f32 %v771_v23, %v733_v27 }
 0x146   : > { %v689_v32 = vpop.f32.mrf.mxu0  ;;  %v737_v33 = vpop.f32.mrf.mxu1 }
 0x147   : > { %820 = vst.msk [vmem:[#allocation2 + $0x68] sm:$0xff] %vm807_vm1, %v787_v30  ;;  %836 = vst.msk [vmem:[#allocation2 + $0xe8] sm:$0xff] %vm807_vm1, %v803_v31  ;;  %v788_v36 = vadd.f32 %v756_v28, %v689_v32  ;;  %v804_v37 = vadd.f32 %v772_v29, %v737_v33  ;;  %842 = sbr.rel (%p1966_p13) target bundleno = 1431 (0x597), region = 105 }
 0x148   : > { %v691_v38 = vpop.f32.mrf.mxu0  ;;  %v739_v39 = vpop.f32.mrf.mxu1 }
 0x149   : > { %821 = vst [vmem:[#allocation2 + $0x70] sm:$0xff] %v788_v36  ;;  %837 = vst [vmem:[#allocation2 + $0xf0] sm:$0xff] %v804_v37  ;;  %v789_v40 = vadd.f32 %v757_v34, %v691_v38  ;;  %v805_v41 = vadd.f32 %v773_v35, %v739_v39 }
 0x14b   : > { %822 = vst.msk [vmem:[#allocation2 + $0x78] sm:$0xff] %vm807_vm1, %v789_v40  ;;  %838 = vst.msk [vmem:[#allocation2 + $0xf8] sm:$0xff] %vm807_vm1, %v805_v41 }
 0x14c   : > { %v939_v42 = vld [vmem:[%s3238_s3] sm:$0xf]  ;;  %vm988_vm2 = vcmask 1043456   ;;  %v844_v43 = vld [vmem:[#allocation2 + $0x8] sm:$0xff]  ;;  %v846_v44 = vld [vmem:[#allocation2 + $0x18] sm:$0xff] }
 0x14d   : > { %2081 = vmatprep.subr.msk.mxu0 %vm988_vm2, %v939_v42  ;;  %vm875_vm3 = vcmp.gt.f32.partialorder %v844_v43, 0.0  ;;  %vm876_vm4 = vcmp.gt.f32.partialorder %v846_v44, 0.0  ;;  %v848_v45 = vld [vmem:[#allocation2 + $0x28] sm:$0xff]  ;;  %v2661_v46 = vld [vmem:[#allocation2 + $0x38] sm:$0xff] }
 0x14e   : > { %v2663_v47 = vld [vmem:[#allocation2 + $0x48] sm:$0xff]  ;;  %2082 = vmatpush3.msk.msra.mxu0 %vm988_vm2, %v939_v42  ;;  %v891_v48 = vsel %vm875_vm3, %v844_v43, 1.0  ;;  %v892_v49 = vsel %vm876_vm4, %v846_v44, 1.0  ;;  %vm877_vm5 = vcmp.gt.f32.partialorder %v848_v45, 0.0  ;;  %vm878_vm6 = vcmp.gt.f32.partialorder %v2661_v46, 0.0  ;;  %v2668_v50 = vld [vmem:[#allocation2 + $0x58] sm:$0xff] }
 0x14f   : > { %v2670_v51 = vld [vmem:[#allocation2 + $0x68] sm:$0xff]  ;;  %2285 = vrcp.f32 %v891_v48  ;;  %v893_v52 = vsel %vm877_vm5, %v848_v45, 1.0  ;;  %v894_v53 = vsel %vm878_vm6, %v2661_v46, 1.0  ;;  %vm879_vm7 = vcmp.gt.f32.partialorder %v2663_v47, 0.0  ;;  %v2694_v59 = vld [vmem:[#allocation2 + $0x98] sm:$0xff]  ;;  %v843_v44 = vld [vmem:[#allocation2] sm:$0xff] }
 0x150   : > { %2287 = vrcp.f32 %v892_v49  ;;  %v895_v55 = vsel %vm879_vm7, %v2663_v47, 1.0  ;;  %vm880_vm8 = vcmp.gt.f32.partialorder %v2668_v50, 0.0  ;;  %vm881_vm9 = vcmp.gt.f32.partialorder %v2670_v51, 0.0  ;;  %v2684_v56 = vld [vmem:[#allocation2 + $0x88] sm:$0xff]  ;;  %v866_v63 = vld [vmem:[#allocation2 + $0xb8] sm:$0xff] }
 0x151   : > { %2289 = vrcp.f32 %v893_v52  ;;  %v896_v57 = vsel %vm880_vm8, %v2668_v50, 1.0  ;;  %v897_v58 = vsel %vm881_vm9, %v2670_v51, 1.0  ;;  %vm883_vm11 = vcmp.gt.f32.partialorder %v2684_v56, 0.0  ;;  %v2696_v60 = vld [vmem:[#allocation2 + $0xa8] sm:$0xff]  ;;  %v870_v3 = vld [vmem:[#allocation2 + $0xd8] sm:$0xff] }
 0x152   : > { %v2677_v54 = vld [vmem:[#allocation2 + $0x78] sm:$0xff]  ;;  %2291 = vrcp.f32 %v894_v53  ;;  %v899_v62 = vsel %vm883_vm11, %v2684_v56, 1.0  ;;  %vm884_vm12 = vcmp.gt.f32.partialorder %v2694_v59, 0.0  ;;  %vm885_vm13 = vcmp.gt.f32.partialorder %v2696_v60, 0.0  ;;  %v868_v0 = vld [vmem:[#allocation2 + $0xc8] sm:$0xff]  ;;  %v857_v53 = vld [vmem:[#allocation2 + $0x70] sm:$0xff] }
 0x153   : > { %vm882_vm10 = vcmp.gt.f32.partialorder %v2677_v54, 0.0  ;;  %2293 = vrcp.f32 %v895_v55  ;;  %v900_v1 = vsel %vm884_vm12, %v2694_v59, 1.0  ;;  %v901_v2 = vsel %vm885_vm13, %v2696_v60, 1.0  ;;  %v872_v5 = vld [vmem:[#allocation2 + $0xe8] sm:$0xff]  ;;  %v874_v14 = vld [vmem:[#allocation2 + $0xf8] sm:$0xff]  ;;  %v855_v55 = vld [vmem:[#allocation2 + $0x60] sm:$0xff] }
 0x154   : > { %2295 = vrcp.f32 %v896_v57  ;;  %v898_v61 = vsel %vm882_vm10, %v2677_v54, 1.0  ;;  %vm886_vm14 = vcmp.gt.f32.partialorder %v866_v63, 0.0  ;;  %vm887_vm15 = vcmp.gt.f32.partialorder %v868_v0, 0.0  ;;  %v2760_v48 = vld [vmem:[%s3237_s2] ss:$0 sm:$0xff] }
 0x155   : > { %2297 = vrcp.f32 %v897_v58  ;;  %v902_v8 = vsel %vm886_vm14, %v866_v63, 1.0  ;;  %v903_v11 = vsel %vm887_vm15, %v868_v0, 1.0  ;;  %vm888_vm0 = vcmp.gt.f32.partialorder %v870_v3, 0.0  ;;  %v861_v58 = vld [vmem:[#allocation2 + $0x90] sm:$0xff]  ;;  %v859_v63 = vld [vmem:[#allocation2 + $0x80] sm:$0xff] }
 0x156   : > { %2299 = vrcp.f32 %v898_v61  ;;  %vm889_vm2 = vcmp.gt.f32.partialorder %v872_v5, 0.0  ;;  %v904_v19 = vsel %vm888_vm0, %v870_v3, 1.0  ;;  %v845_v61 = vld [vmem:[#allocation2 + $0x10] sm:$0xff] }
 0x157   : > { %2301 = vrcp.f32 %v899_v62  ;;  %v905_v21 = vsel %vm889_vm2, %v872_v5, 1.0 }
 0x158   : > { %2303 = vrcp.f32 %v900_v1 }
 0x159   : > { %2305 = vrcp.f32 %v901_v2  ;;  %v865_v2 = vld [vmem:[#allocation2 + $0xb0] sm:$0xff] }
 0x15a   : > { %2307 = vrcp.f32 %v902_v8 }
 0x15b   : > { %2309 = vrcp.f32 %v903_v11  ;;  %v863_v11 = vld [vmem:[#allocation2 + $0xa0] sm:$0xff] }
 0x15c   : > { %v2286_v4 = vpop.eup %2285  ;;  %2311 = vrcp.f32 %v904_v19  ;;  %v869_v19 = vld [vmem:[#allocation2 + $0xd0] sm:$0xff] }
 0x15d   : > { %v2288_v6 = vpop.eup %2287  ;;  %v923_v7 = vsel %vm875_vm3, %v2286_v4, 0.0  ;;  %vm890_vm3 = vcmp.gt.f32.partialorder %v874_v14, 0.0  ;;  %2313 = vrcp.f32 %v905_v21 }
 0x15e   : > { %v2290_v9 = vpop.eup %2289  ;;  %2083 = vmatprep.mubr.msk.f32.mxu0 %vm807_vm1, %v923_v7  ;;  %v924_v10 = vsel %vm876_vm4, %v2288_v6, 0.0  ;;  %v906_v25 = vsel %vm890_vm3, %v874_v14, 1.0  ;;  %v847_v7 = vld [vmem:[#allocation2 + $0x20] sm:$0xff] }
 0x15f   : > { %v2292_v12 = vpop.eup %2291  ;;  %2084 = vmatmul.mubr.msk.f32.vlgmr.msra.gmra.mxu0 %vm807_vm1, %v924_v10  ;;  %v925_v13 = vsel %vm877_vm5, %v2290_v9, 0.0  ;;  %2315 = vrcp.f32 %v906_v25 }
 0x160   : > { %v2294_v15 = vpop.eup %2293  ;;  %2086 = vmatprep.mubr.msk.f32.mxu0 %vm807_vm1, %v925_v13  ;;  %v926_v16 = vsel %vm878_vm6, %v2292_v12, 0.0 }
 0x161   : > { %v2296_v17 = vpop.eup %2295  ;;  %v927_v18 = vsel %vm879_vm7, %v2294_v15, 0.0  ;;  %v849_v15 = vld [vmem:[#allocation2 + $0x30] sm:$0xff] }
 0x162   : > { %v2298_v20 = vpop.eup %2297  ;;  %v928_v22 = vsel %vm880_vm8, %v2296_v17, 0.0 }
 0x163   : > { %2087 = vmatmul.mubr.msk.f32.gmra.mxu0 %vm807_vm1, %v926_v16  ;;  %v2300_v23 = vpop.eup %2299  ;;  %v929_v24 = vsel %vm881_vm9, %v2298_v20, 0.0 }
 0x164   : > { %2089 = vmatprep.mubr.msk.f32.mxu0 %vm807_vm1, %v927_v18  ;;  %v2302_v26 = vpop.eup %2301  ;;  %v930_v27 = vsel %vm882_vm10, %v2300_v23, 0.0  ;;  %v851_v23 = vld [vmem:[#allocation2 + $0x40] sm:$0xff] }
 0x165   : > { %v2304_v28 = vpop.eup %2303  ;;  %v931_v29 = vsel %vm883_vm11, %v2302_v26, 0.0  ;;  %v867_v26 = vld [vmem:[#allocation2 + $0xc0] sm:$0xff] }
 0x166   : > { %v2306_v30 = vpop.eup %2305  ;;  %v932_v31 = vsel %vm884_vm12, %v2304_v28, 0.0 }
 0x167   : > { %2090 = vmatmul.mubr.msk.f32.gmra.mxu0 %vm807_vm1, %v928_v22  ;;  %v2308_v32 = vpop.eup %2307  ;;  %v933_v33 = vsel %vm885_vm13, %v2306_v30, 0.0  ;;  %v853_v30 = vld [vmem:[#allocation2 + $0x50] sm:$0xff] }
 0x168   : > { %2092 = vmatprep.mubr.msk.f32.mxu0 %vm807_vm1, %v929_v24  ;;  %v2310_v34 = vpop.eup %2309  ;;  %v934_v35 = vsel %vm886_vm14, %v2308_v32, 0.0 }
 0x169   : > { %v2312_v36 = vpop.eup %2311  ;;  %v935_v37 = vsel %vm887_vm15, %v2310_v34, 0.0 }
 0x16a   : > { %v2314_v38 = vpop.eup %2313  ;;  %v936_v39 = vsel %vm888_vm0, %v2312_v36, 0.0 }
 0x16b   : > { %2093 = vmatmul.mubr.msk.f32.gmra.mxu0 %vm807_vm1, %v930_v27  ;;  %v937_v41 = vsel %vm889_vm2, %v2314_v38, 0.0 }
 0x16c   : > { %2095 = vmatprep.mubr.msk.f32.mxu0 %vm807_vm1, %v931_v29  ;;  %v2316_v40 = vpop.eup %2315 }
 0x16d   : > { %v938_v42 = vsel %vm890_vm3, %v2316_v40, 0.0 }
 0x16f   : > { %2096 = vmatmul.mubr.msk.f32.gmra.mxu0 %vm807_vm1, %v932_v31 }
 0x170   : > { %2098 = vmatprep.mubr.msk.f32.mxu0 %vm807_vm1, %v933_v33  ;;  %v871_v33 = vld [vmem:[#allocation2 + $0xe0] sm:$0xff] }
 0x173   : > { %2099 = vmatmul.mubr.msk.f32.gmra.mxu0 %vm807_vm1, %v934_v35 }
 0x174   : > { %2101 = vmatprep.mubr.msk.f32.mxu0 %vm807_vm1, %v935_v37 }
 0x177   : > { %2102 = vmatmul.mubr.msk.f32.gmra.mxu0 %vm807_vm1, %v936_v39  ;;  %v873_v39 = vld [vmem:[#allocation2 + $0xf0] sm:$0xff] }
 0x178   : > { %2104 = vmatprep.mubr.msk.f32.mxu0 %vm807_vm1, %v937_v41 }
 0x17b   : > { %2105 = vmatmul.mubr.msk.f32.gmra.mxu0 %vm807_vm1, %v938_v42 }
 0x21f   : > { %v2085_v43 = vpop.f32.mrf.mxu0 }
 0x220   : > { %v1138_v3 = vmul.f32 %v2085_v43, %v845_v61 }
 0x221   : > { %v1058_v45 = vpop.f32.mrf.mxu0 }
 0x222   : > { %v1137_v46 = vmul.f32 %v1058_v45, %v843_v44  ;;  %v1161_v14 = vadd.f32 %v2760_v48, %v1138_v3 }
 0x223   : > { %v2088_v47 = vpop.f32.mrf.mxu0 }
 0x224   : > { %v2763_v49 = vadd.f32 %v2760_v48, %v1137_v46  ;;  %v1140_v21 = vmul.f32 %v2088_v47, %v849_v15 }
 0x225   : > { %v1068_v50 = vpop.f32.mrf.mxu0 }
 0x226   : > { %1196 = vadd.xlane.f32.xlu0 %v2763_v49  ;;  %v1139_v13 = vmul.f32 %v1068_v50, %v847_v7  ;;  %v2787_v29 = vadd.f32 %v2760_v48, %v1140_v21 }
 0x227   : > { %v2091_v51 = vpop.f32.mrf.mxu0 }
 0x228   : > { %v2782_v22 = vadd.f32 %v2760_v48, %v1139_v13  ;;  %v1142_v35 = vmul.f32 %v2091_v51, %v853_v30 }
 0x229   : > { %v1078_v52 = vpop.f32.mrf.mxu0 }
 0x22a   : > { %v1141_v28 = vmul.f32 %v1078_v52, %v851_v23  ;;  %v2799_v40 = vadd.f32 %v2760_v48, %v1142_v35 }
 0x22b   : > { %v2094_v54 = vpop.f32.mrf.mxu0 }
 0x22c   : > { %v1144_v56 = vmul.f32 %v2094_v54, %v857_v53  ;;  %v2792_v36 = vadd.f32 %v2760_v48, %v1141_v28 }
 0x22d   : > { %v1088_v57 = vpop.f32.mrf.mxu0 }
 0x22e   : > { %v1143_v59 = vmul.f32 %v1088_v57, %v855_v55  ;;  %v2767_v60 = vadd.f32 %v2760_v48, %v1144_v56 }
 0x22f   : > { %v2097_v62 = vpop.f32.mrf.mxu0 }
 0x230   : > { %v1146_v0 = vmul.f32 %v2097_v62, %v861_v58  ;;  %1210 = vadd.xlane.f32.xlu0 %v2767_v60  ;;  %v2772_v6 = vadd.f32 %v2760_v48, %v1143_v59 }
 0x231   : > { %v1098_v1 = vpop.f32.mrf.mxu0 }
 0x232   : > { %v1145_v4 = vmul.f32 %v1098_v1, %v859_v63  ;;  %v1169_v5 = vadd.f32 %v2760_v48, %v1146_v0 }
 0x233   : > { %v2100_v8 = vpop.f32.mrf.mxu0 }
 0x234   : > { %1214 = vadd.xlane.f32.xlu1 %v1169_v5  ;;  %1208 = vadd.xlane.f32.xlu0 %v2772_v6  ;;  %v1148_v9 = vmul.f32 %v2100_v8, %v865_v2  ;;  %v2776_v10 = vadd.f32 %v2760_v48, %v1145_v4 }
 0x235   : > { %v1108_v12 = vpop.f32.mrf.mxu0 }
 0x236   : > { %v1147_v17 = vmul.f32 %v1108_v12, %v863_v11  ;;  %v1171_v18 = vadd.f32 %v2760_v48, %v1148_v9 }
 0x237   : > { %v2103_v16 = vpop.f32.mrf.mxu0 }
 0x238   : > { %1212 = vadd.xlane.f32.xlu1 %v2776_v10  ;;  %1198 = vadd.xlane.f32.xlu0 %v1161_v14  ;;  %v1150_v24 = vmul.f32 %v2103_v16, %v869_v19  ;;  %v1170_v25 = vadd.f32 %v2760_v48, %v1147_v17  ;;  %v1195_v17 = vld [vmem:[%s3239_s4 + $0x78] sm:$0xff] }
 0x239   : > { %v1118_v20 = vpop.f32.mrf.mxu0  ;;  %2107 = vmatprep.subr.mxu0 %v1195_v17  ;;  %2195 = vmatprep.subr.mxu1 %v1195_v17 }
 0x23a   : > { %v1149_v31 = vmul.f32 %v1118_v20, %v867_v26  ;;  %v1173_v32 = vadd.f32 %v2760_v48, %v1150_v24  ;;  %2108 = vmatpush3.msra.mxu0 %v1195_v17  ;;  %2211 = vmatpush3.msra.mxu1 %v1195_v17 }
 0x23b   : > { %v2106_v27 = vpop.f32.mrf.mxu0 }
 0x23c   : > { %1218 = vadd.xlane.f32.xlu1 %v1171_v18  ;;  %1200 = vadd.xlane.f32.xlu0 %v2782_v22  ;;  %v2796_v38 = vadd.f32 %v2760_v48, %v1149_v31  ;;  %v1152_v41 = vmul.f32 %v2106_v27, %v873_v39  ;;  %v1193_v27 = vld [vmem:[%s3239_s4 + $0x68] sm:$0xff] }
 0x23d   : > { %v1128_v34 = vpop.f32.mrf.mxu0 }
 0x23e   : > { %v1151_v37 = vmul.f32 %v1128_v34, %v871_v33  ;;  %v2808_v43 = vadd.f32 %v2760_v48, %v1152_v41 }
 0x240   : > { %1216 = vadd.xlane.f32.xlu1 %v1170_v25  ;;  %1202 = vadd.xlane.f32.xlu0 %v2787_v29  ;;  %v2804_v42 = vadd.f32 %v2760_v48, %v1151_v37 }
 0x244   : > { %1222 = vadd.xlane.f32.xlu1 %v1173_v32  ;;  %1204 = vadd.xlane.f32.xlu0 %v2792_v36 }
 0x248   : > { %1220 = vadd.xlane.f32.xlu1 %v2796_v38  ;;  %1206 = vadd.xlane.f32.xlu0 %v2799_v40 }
 0x24c   : > { %1224 = vadd.xlane.f32.xlu1 %v2804_v42 }
 0x250   : > { %1226 = vadd.xlane.f32.xlu1 %v2808_v43 }
 0x2af   : > { %v1197_v44 = vpop.xlane.xlu0 %1196 }
 0x2b0   : > { %v1229_v56 = vmul.f32 0.0078125, %v1197_v44 }
 0x2b2   : > { %v2823_v63 = vsub.f32 %v2763_v49, %v1229_v56  ;;  %v1186_v56 = vld [vmem:[%s3239_s4 + $0x30] sm:$0xff] }
 0x2b4   : > { %v1261_v49 = vmul.f32 %v2823_v63, %v2823_v63 }
 0x2b9   : > { %v1211_v45 = vpop.xlane.xlu0 %1210 }
 0x2ba   : > { %v1236_v46 = vmul.f32 0.0078125, %v1211_v45 }
 0x2bc   : > { %v2812_v47 = vsub.f32 %v2767_v60, %v1236_v46 }
 0x2bd   : > { %v1215_v50 = vpop.xlane.xlu1 %1214  ;;  %v1209_v51 = vpop.xlane.xlu0 %1208 }
 0x2be   : > { %v1238_v52 = vmul.f32 0.0078125, %v1215_v50  ;;  %v1268_v53 = vmul.f32 %v2812_v47, %v2812_v47  ;;  %v1235_v60 = vmul.f32 0.0078125, %v1209_v51 }
 0x2c0   : > { %v2816_v54 = vsub.f32 %v1169_v5, %v1238_v52  ;;  %1291 = vadd.xlane.f32.xlu1 %v1268_v53  ;;  %v2830_v3 = vsub.f32 %v2772_v6, %v1235_v60  ;;  %v1183_v60 = vld [vmem:[%s3239_s4 + $0x18] sm:$0xff] }
 0x2c1   : > { %v1213_v55 = vpop.xlane.xlu1 %1212  ;;  %v1199_v48 = vpop.xlane.xlu0 %1198 }
 0x2c2   : > { %v1230_v57 = vmul.f32 0.0078125, %v1199_v48  ;;  %v1270_v58 = vmul.f32 %v2816_v54, %v2816_v54  ;;  %v1237_v5 = vmul.f32 0.0078125, %v1213_v55  ;;  %v1267_v13 = vmul.f32 %v2830_v3, %v2830_v3 }
 0x2c4   : > { %v2820_v59 = vsub.f32 %v1161_v14, %v1230_v57  ;;  %1295 = vadd.xlane.f32.xlu1 %v1270_v58  ;;  %v2841_v6 = vsub.f32 %v2776_v10, %v1237_v5  ;;  %v1194_v10 = vld [vmem:[%s3239_s4 + $0x70] sm:$0xff]  ;;  %v1185_v57 = vld [vmem:[%s3239_s4 + $0x28] sm:$0xff]  ;;  %v1184_v58 = vld [vmem:[%s3239_s4 + $0x20] sm:$0xff] }
 0x2c5   : > { %v1219_v61 = vpop.xlane.xlu1 %1218  ;;  %v1201_v62 = vpop.xlane.xlu0 %1200  ;;  %2109 = vmatprep.subr.mxu0 %v1194_v10  ;;  %2196 = vmatprep.subr.mxu1 %v1194_v10 }
 0x2c6   : > { %v1240_v0 = vmul.f32 0.0078125, %v1219_v61  ;;  %v1262_v1 = vmul.f32 %v2820_v59, %v2820_v59  ;;  %v1231_v14 = vmul.f32 0.0078125, %v1201_v62  ;;  %v1269_v26 = vmul.f32 %v2841_v6, %v2841_v6  ;;  %2110 = vmatpush3.msra.mxu0 %v1194_v10  ;;  %2212 = vmatpush3.msra.mxu1 %v1194_v10  ;;  %v1182_v61 = vld [vmem:[%s3239_s4 + $0x10] sm:$0xff]  ;;  %v1181_v62 = vld [vmem:[%s3239_s4 + $0x8] sm:$0xff] }
 0x2c7   : > { %2111 = vmatprep.subr.mxu0 %v1193_v27  ;;  %2197 = vmatprep.subr.mxu1 %v1193_v27 }
 0x2c8   : > { %v2827_v2 = vsub.f32 %v1171_v18, %v1240_v0  ;;  %1279 = vadd.xlane.f32.xlu0 %v1262_v1  ;;  %v2854_v23 = vsub.f32 %v2782_v22, %v1231_v14  ;;  %v1192_v22 = vld [vmem:[%s3239_s4 + $0x60] sm:$0xff]  ;;  %2112 = vmatpush3.msra.mxu0 %v1193_v27 }
 0x2c9   : > { %v1217_v4 = vpop.xlane.xlu1 %1216  ;;  %v1203_v9 = vpop.xlane.xlu0 %1202  ;;  %2213 = vmatpush3.msra.mxu1 %v1193_v27  ;;  %2113 = vmatprep.subr.mxu0 %v1192_v22  ;;  %v1180_v0 = vld [vmem:[%s3239_s4] sm:$0xff] }
 0x2ca   : > { %v1239_v7 = vmul.f32 0.0078125, %v1217_v4  ;;  %v1272_v8 = vmul.f32 %v2827_v2, %v2827_v2  ;;  %v1232_v19 = vmul.f32 0.0078125, %v1203_v9  ;;  %v1263_v35 = vmul.f32 %v2854_v23, %v2854_v23  ;;  %2198 = vmatprep.subr.mxu1 %v1192_v22  ;;  %2114 = vmatpush3.msra.mxu0 %v1192_v22 }
 0x2cb   : > { %2214 = vmatpush3.msra.mxu1 %v1192_v22 }
 0x2cc   : > { %v2836_v11 = vsub.f32 %v1170_v25, %v1239_v7  ;;  %1299 = vadd.xlane.f32.xlu1 %v1272_v8  ;;  %1277 = vadd.xlane.f32.xlu0 %v1261_v49  ;;  %v2870_v30 = vsub.f32 %v2787_v29, %v1232_v19  ;;  %v1191_v29 = vld [vmem:[%s3239_s4 + $0x58] sm:$0xff] }
 0x2cd   : > { %v1223_v12 = vpop.xlane.xlu1 %1222  ;;  %v1205_v20 = vpop.xlane.xlu0 %1204  ;;  %2115 = vmatprep.subr.mxu0 %v1191_v29  ;;  %2199 = vmatprep.subr.mxu1 %v1191_v29 }
 0x2ce   : > { %v1242_v15 = vmul.f32 0.0078125, %v1223_v12  ;;  %v1271_v16 = vmul.f32 %v2836_v11, %v2836_v11  ;;  %v1264_v41 = vmul.f32 %v2870_v30, %v2870_v30  ;;  %2116 = vmatpush3.msra.mxu0 %v1191_v29  ;;  %2215 = vmatpush3.msra.mxu1 %v1191_v29 }
 0x2d0   : > { %v2848_v18 = vsub.f32 %v1173_v32, %v1242_v15  ;;  %1297 = vadd.xlane.f32.xlu1 %v1271_v16  ;;  %1289 = vadd.xlane.f32.xlu0 %v1267_v13  ;;  %v1233_v32 = vmul.f32 0.0078125, %v1205_v20 }
 0x2d1   : > { %v1221_v21 = vpop.xlane.xlu1 %1220  ;;  %v1207_v37 = vpop.xlane.xlu0 %1206 }
 0x2d2   : > { %v1241_v24 = vmul.f32 0.0078125, %v1221_v21  ;;  %v1274_v25 = vmul.f32 %v2848_v18, %v2848_v18  ;;  %v2885_v44 = vsub.f32 %v2792_v36, %v1233_v32  ;;  %v1234_v45 = vmul.f32 0.0078125, %v1207_v37  ;;  %v1189_v36 = vld [vmem:[%s3239_s4 + $0x48] sm:$0xff] }
 0x2d4   : > { %v2864_v28 = vsub.f32 %v2796_v38, %v1241_v24  ;;  %1303 = vadd.xlane.f32.xlu1 %v1274_v25  ;;  %1293 = vadd.xlane.f32.xlu0 %v1269_v26  ;;  %v2899_v52 = vsub.f32 %v2799_v40, %v1234_v45  ;;  %v1265_v55 = vmul.f32 %v2885_v44, %v2885_v44  ;;  %v1187_v40 = vld [vmem:[%s3239_s4 + $0x38] sm:$0xff] }
 0x2d5   : > { %v1225_v31 = vpop.xlane.xlu1 %1224 }
 0x2d6   : > { %v1243_v33 = vmul.f32 0.0078125, %v1225_v31  ;;  %v1273_v34 = vmul.f32 %v2864_v28, %v2864_v28  ;;  %v1266_v48 = vmul.f32 %v2899_v52, %v2899_v52 }
 0x2d8   : > { %v2880_v38 = vsub.f32 %v2804_v42, %v1243_v33  ;;  %1301 = vadd.xlane.f32.xlu1 %v1273_v34  ;;  %1281 = vadd.xlane.f32.xlu0 %v1263_v35  ;;  %v1190_v42 = vld [vmem:[%s3239_s4 + $0x50] sm:$0xff] }
 0x2d9   : > { %v1227_v39 = vpop.xlane.xlu1 %1226  ;;  %2117 = vmatprep.subr.mxu0 %v1190_v42  ;;  %2200 = vmatprep.subr.mxu1 %v1190_v42 }
 0x2da   : > { %v1244_v46 = vmul.f32 0.0078125, %v1227_v39  ;;  %v1275_v50 = vmul.f32 %v2880_v38, %v2880_v38  ;;  %2118 = vmatpush3.msra.mxu0 %v1190_v42  ;;  %2216 = vmatpush3.msra.mxu1 %v1190_v42 }
 0x2db   : > { %2119 = vmatprep.subr.mxu0 %v1189_v36  ;;  %2201 = vmatprep.subr.mxu1 %v1189_v36 }
 0x2dc   : > { %v2893_v51 = vsub.f32 %v2808_v43, %v1244_v46  ;;  %1305 = vadd.xlane.f32.xlu1 %v1275_v50  ;;  %1283 = vadd.xlane.f32.xlu0 %v1264_v41  ;;  %v1188_v43 = vld [vmem:[%s3239_s4 + $0x40] sm:$0xff] }
 0x2dd   : > { %2120 = vmatpush3.msra.mxu0 %v1189_v36  ;;  %2217 = vmatpush3.msra.mxu1 %v1189_v36 }
 0x2de   : > { %v1276_v53 = vmul.f32 %v2893_v51, %v2893_v51  ;;  %2121 = vmatprep.subr.mxu0 %v1188_v43  ;;  %2202 = vmatprep.subr.mxu1 %v1188_v43 }
 0x2df   : > { %2122 = vmatpush3.msra.mxu0 %v1188_v43  ;;  %2218 = vmatpush3.msra.mxu1 %v1188_v43 }
 0x2e0   : > { %1307 = vadd.xlane.f32.xlu1 %v1276_v53  ;;  %1285 = vadd.xlane.f32.xlu0 %v1265_v55 }
 0x2e1   : > { %2123 = vmatprep.subr.mxu0 %v1187_v40  ;;  %2203 = vmatprep.subr.mxu1 %v1187_v40 }
 0x2e2   : > { %2124 = vmatpush3.msra.mxu0 %v1187_v40  ;;  %2219 = vmatpush3.msra.mxu1 %v1187_v40 }
 0x2e3   : > { %2125 = vmatprep.subr.mxu0 %v1186_v56  ;;  %2204 = vmatprep.subr.mxu1 %v1186_v56 }
 0x2e4   : > { %1287 = vadd.xlane.f32.xlu0 %v1266_v48  ;;  %2126 = vmatpush3.msra.mxu0 %v1186_v56 }
 0x2e5   : > { %2127 = vmatprep.subr.mxu0 %v1185_v57  ;;  %2220 = vmatpush3.msra.mxu1 %v1186_v56 }
 0x2e6   : > { %2128 = vmatpush3.msra.mxu0 %v1185_v57  ;;  %2205 = vmatprep.subr.mxu1 %v1185_v57 }
 0x2e7   : > { %2129 = vmatprep.subr.mxu0 %v1184_v58  ;;  %2221 = vmatpush3.msra.mxu1 %v1185_v57 }
 0x2e8   : > { %2130 = vmatpush3.msra.mxu0 %v1184_v58  ;;  %2206 = vmatprep.subr.mxu1 %v1184_v58 }
 0x2e9   : > { %2131 = vmatprep.subr.mxu0 %v1183_v60  ;;  %2222 = vmatpush3.msra.mxu1 %v1184_v58 }
 0x2ea   : > { %2132 = vmatpush3.msra.mxu0 %v1183_v60  ;;  %2207 = vmatprep.subr.mxu1 %v1183_v60 }
 0x2eb   : > { %2133 = vmatprep.subr.mxu0 %v1182_v61  ;;  %2223 = vmatpush3.msra.mxu1 %v1183_v60 }
 0x2ec   : > { %2134 = vmatpush3.msra.mxu0 %v1182_v61  ;;  %2208 = vmatprep.subr.mxu1 %v1182_v61 }
 0x2ed   : > { %2135 = vmatprep.subr.mxu0 %v1181_v62  ;;  %2224 = vmatpush3.msra.mxu1 %v1182_v61  ;;  %v2938_v61 = vld [vmem:[%s3240_s5] ss:$0 sm:$0xff] }
 0x2ee   : > { %2136 = vmatpush3.msra.mxu0 %v1181_v62  ;;  %2209 = vmatprep.subr.mxu1 %v1181_v62 }
 0x2ef   : > { %2137 = vmatprep.subr.mxu0 %v1180_v0  ;;  %2225 = vmatpush3.msra.mxu1 %v1181_v62 }
 0x2f0   : > { %2138 = vmatpush3.msra.mxu0 %v1180_v0  ;;  %2210 = vmatprep.subr.mxu1 %v1180_v0 }
 0x2f1   : > { %2226 = vmatpush3.msra.mxu1 %v1180_v0 }
 0x349   : > { %v1292_v1 = vpop.xlane.xlu1 %1291 }
 0x34a   : > { %v1316_v4 = vmul.f32 0.0078125, %v1292_v1 }
 0x34c   : > { %v1332_v9 = vadd.f32 1e-05, %v1316_v4 }
 0x34d   : > { %v1296_v5 = vpop.xlane.xlu1 %1295 }
 0x34e   : > { %v1318_v12 = vmul.f32 0.0078125, %v1296_v5 }
 0x350   : > { %v1334_v17 = vadd.f32 1e-05, %v1318_v12 }
 0x351   : > { %v1280_v7 = vpop.xlane.xlu0 %1279 }
 0x352   : > { %v1310_v8 = vmul.f32 0.0078125, %v1280_v7 }
 0x354   : > { %v1326_v49 = vadd.f32 1e-05, %v1310_v8 }
 0x355   : > { %v1300_v13 = vpop.xlane.xlu1 %1299  ;;  %v1278_v14 = vpop.xlane.xlu0 %1277 }
 0x356   : > { %2317 = vrsqrt.f32 %v1326_v49  ;;  %v1309_v15 = vmul.f32 0.0078125, %v1278_v14  ;;  %v1320_v20 = vmul.f32 0.0078125, %v1300_v13  ;;  %v2947_v13 = vld [vmem:[%s3241_s6] ss:$0 sm:$0xff] }
 0x357   : > { %2319 = vrsqrt.f32 %v1332_v9 }
 0x358   : > { %v1325_v16 = vadd.f32 1e-05, %v1309_v15  ;;  %v1336_v31 = vadd.f32 1e-05, %v1320_v20 }
 0x359   : > { %v1298_v10 = vpop.xlane.xlu1 %1297  ;;  %v1290_v19 = vpop.xlane.xlu0 %1289 }
 0x35a   : > { %v1319_v21 = vmul.f32 0.0078125, %v1298_v10  ;;  %v1315_v24 = vmul.f32 0.0078125, %v1290_v19  ;;  %2321 = vrsqrt.f32 %v1325_v16 }
 0x35b   : > { %2323 = vrsqrt.f32 %v1334_v17 }
 0x35c   : > { %v1335_v25 = vadd.f32 1e-05, %v1319_v21  ;;  %v1331_v26 = vadd.f32 1e-05, %v1315_v24 }
 0x35d   : > { %v1304_v27 = vpop.xlane.xlu1 %1303  ;;  %v1294_v22 = vpop.xlane.xlu0 %1293 }
 0x35e   : > { %2325 = vrsqrt.f32 %v1335_v25  ;;  %v1322_v32 = vmul.f32 0.0078125, %v1304_v27  ;;  %v1317_v33 = vmul.f32 0.0078125, %v1294_v22 }
 0x35f   : > { %2327 = vrsqrt.f32 %v1331_v26 }
 0x360   : > { %v1333_v34 = vadd.f32 1e-05, %v1317_v33  ;;  %v1338_v35 = vadd.f32 1e-05, %v1322_v32  ;;  %2329 = vrsqrt.f32 %v1336_v31 }
 0x361   : > { %v1302_v37 = vpop.xlane.xlu1 %1301  ;;  %v1282_v29 = vpop.xlane.xlu0 %1281 }
 0x362   : > { %v1321_v39 = vmul.f32 0.0078125, %v1302_v37  ;;  %v1311_v41 = vmul.f32 0.0078125, %v1282_v29  ;;  %2331 = vrsqrt.f32 %v1333_v34 }
 0x363   : > { %v2318_v45 = vpop.eup %2317  ;;  %2333 = vrsqrt.f32 %v1338_v35 }
 0x364   : > { %v1337_v46 = vadd.f32 1e-05, %v1321_v39  ;;  %v1327_v50 = vadd.f32 1e-05, %v1311_v41  ;;  %v2320_v53 = vpop.eup %2319  ;;  %v1358_v55 = vmul.f32 %v2318_v45, %v2820_v59 }
 0x365   : > { %v1306_v42 = vpop.xlane.xlu1 %1305  ;;  %v1284_v36 = vpop.xlane.xlu0 %1283  ;;  %v1364_v0 = vmul.f32 %v2320_v53, %v2812_v47 }
 0x366   : > { %2335 = vrsqrt.f32 %v1337_v46  ;;  %v1323_v43 = vmul.f32 0.0078125, %v1306_v42  ;;  %v1312_v40 = vmul.f32 0.0078125, %v1284_v36  ;;  %v1380_v5 = vmul.f32 %v2938_v61, %v1358_v55 }
 0x367   : > { %2337 = vrsqrt.f32 %v1327_v50  ;;  %v2322_v48 = vpop.eup %2321  ;;  %v1386_v15 = vmul.f32 %v2938_v61, %v1364_v0 }
 0x368   : > { %v1339_v56 = vadd.f32 1e-05, %v1323_v43  ;;  %v1328_v57 = vadd.f32 1e-05, %v1312_v40  ;;  %v1357_v62 = vmul.f32 %v2322_v48, %v2823_v63  ;;  %v2324_v1 = vpop.eup %2323  ;;  %v2955_v17 = vadd.f32 %v2947_v13, %v1380_v5 }
 0x369   : > { %v1308_v58 = vpop.xlane.xlu1 %1307  ;;  %v1286_v60 = vpop.xlane.xlu0 %1285  ;;  %v1366_v10 = vmul.f32 %v2324_v1, %v2816_v54  ;;  %v2967_v54 = vadd.f32 %v2947_v13, %v1386_v15 }
 0x36a   : > { %2339 = vrsqrt.f32 %v1339_v56  ;;  %v1324_v59 = vmul.f32 0.0078125, %v1308_v58  ;;  %v1313_v4 = vmul.f32 0.0078125, %v1286_v60  ;;  %v1379_v8 = vmul.f32 %v2938_v61, %v1357_v62 }
 0x36b   : > { %v2326_v7 = vpop.eup %2325  ;;  %2341 = vrsqrt.f32 %v1328_v57  ;;  %v1388_v22 = vmul.f32 %v2938_v61, %v1366_v10 }
 0x36c   : > { %v2328_v49 = vpop.eup %2327  ;;  %v1340_v9 = vadd.f32 1e-05, %v1324_v59  ;;  %v1329_v12 = vadd.f32 1e-05, %v1313_v4  ;;  %v2950_v47 = vadd.f32 %v2947_v13, %v1379_v8  ;;  %v1367_v21 = vmul.f32 %v2326_v7, %v2836_v11 }
 0x36d   : > { %v1288_v63 = vpop.xlane.xlu0 %1287  ;;  %v1363_v14 = vmul.f32 %v2328_v49, %v2830_v3  ;;  %v2330_v19 = vpop.eup %2329  ;;  %v2981_v29 = vadd.f32 %v2947_v13, %v1388_v22 }
 0x36e   : > { %2343 = vrsqrt.f32 %v1340_v9  ;;  %v1314_v16 = vmul.f32 0.0078125, %v1288_v63  ;;  %2139 = vmatprep.mubr.f32.mxu0 %v2950_v47  ;;  %v1368_v31 = vmul.f32 %v2330_v19, %v2827_v2  ;;  %v1389_v33 = vmul.f32 %v2938_v61, %v1367_v21 }
 0x36f   : > { %2345 = vrsqrt.f32 %v1329_v12  ;;  %v1385_v20 = vmul.f32 %v2938_v61, %v1363_v14  ;;  %v2332_v24 = vpop.eup %2331  ;;  %2140 = vmatmul.mubr.f32.vlgmr.msra.gmra.mxu0 %v2955_v17 }
 0x370   : > { %v1330_v25 = vadd.f32 1e-05, %v1314_v16  ;;  %v1365_v26 = vmul.f32 %v2332_v24, %v2841_v6  ;;  %v2334_v27 = vpop.eup %2333  ;;  %v1390_v2 = vmul.f32 %v2938_v61, %v1368_v31  ;;  %v2987_v45 = vadd.f32 %v2947_v13, %v1389_v33 }
 0x371   : > { %v2963_v3 = vadd.f32 %v2947_v13, %v1385_v20  ;;  %v1370_v39 = vmul.f32 %v2334_v27, %v2848_v18 }
 0x372   : > { %2347 = vrsqrt.f32 %v1330_v25  ;;  %v1387_v11 = vmul.f32 %v2938_v61, %v1365_v26  ;;  %v2997_v36 = vadd.f32 %v2947_v13, %v1390_v2 }
 0x373   : > { %v2336_v32 = vpop.eup %2335  ;;  %2148 = vmatprep.mubr.f32.mxu1 %v2963_v3  ;;  %v1392_v53 = vmul.f32 %v2938_v61, %v1370_v39 }
 0x374   : > { %v2338_v34 = vpop.eup %2337  ;;  %2149 = vmatmul.mubr.f32.vlgmr.msra.gmra.mxu1 %v2967_v54  ;;  %v1369_v6 = vmul.f32 %v2336_v32, %v2864_v28  ;;  %v2977_v35 = vadd.f32 %v2947_v13, %v1387_v11 }
 0x375   : > { %v1359_v37 = vmul.f32 %v2338_v34, %v2854_v23  ;;  %v3011_v58 = vadd.f32 %v2947_v13, %v1392_v53 }
 0x376   : > { %2151 = vmatprep.mubr.f32.mxu1 %v2977_v35  ;;  %v1391_v46 = vmul.f32 %v2938_v61, %v1369_v6 }
 0x377   : > { %v2340_v41 = vpop.eup %2339  ;;  %v1381_v28 = vmul.f32 %v2938_v61, %v1359_v37 }
 0x378   : > { %v2342_v50 = vpop.eup %2341  ;;  %2152 = vmatmul.mubr.f32.gmra.mxu1 %v2981_v29  ;;  %v1371_v23 = vmul.f32 %v2340_v41, %v2880_v38  ;;  %v3001_v43 = vadd.f32 %v2947_v13, %v1391_v46 }
 0x379   : > { %2154 = vmatprep.mubr.f32.mxu1 %v2987_v45  ;;  %v1403_v42 = vadd.f32 %v2947_v13, %v1381_v28  ;;  %v1360_v18 = vmul.f32 %v2342_v50, %v2870_v30 }
 0x37a   : > { %v1393_v38 = vmul.f32 %v2938_v61, %v1371_v23 }
 0x37b   : > { %v2344_v55 = vpop.eup %2343  ;;  %2142 = vmatprep.mubr.f32.mxu0 %v1403_v42  ;;  %v1382_v40 = vmul.f32 %v2938_v61, %v1360_v18 }
 0x37c   : > { %v2346_v48 = vpop.eup %2345  ;;  %2155 = vmatmul.mubr.f32.gmra.mxu1 %v2997_v36  ;;  %v1372_v56 = vmul.f32 %v2344_v55, %v2893_v51  ;;  %v3015_v0 = vadd.f32 %v2947_v13, %v1393_v38 }
 0x37d   : > { %2157 = vmatprep.mubr.f32.mxu1 %v3001_v43  ;;  %v1404_v30 = vadd.f32 %v2947_v13, %v1382_v40  ;;  %v1361_v57 = vmul.f32 %v2346_v48, %v2885_v44 }
 0x37e   : > { %v1394_v60 = vmul.f32 %v2938_v61, %v1372_v56 }
 0x37f   : > { %v2348_v62 = vpop.eup %2347  ;;  %2143 = vmatmul.mubr.f32.gmra.mxu0 %v1404_v30  ;;  %v1383_v1 = vmul.f32 %v2938_v61, %v1361_v57 }
 0x380   : > { %2158 = vmatmul.mubr.f32.gmra.mxu1 %v3011_v58  ;;  %v3020_v51 = vadd.f32 %v2947_v13, %v1394_v60  ;;  %v1362_v59 = vmul.f32 %v2348_v62, %v2899_v52 }
 0x381   : > { %2160 = vmatprep.mubr.f32.mxu1 %v3015_v0  ;;  %v1405_v44 = vadd.f32 %v2947_v13, %v1383_v1 }
 0x382   : > { %v1384_v4 = vmul.f32 %v2938_v61, %v1362_v59 }
 0x383   : > { %2145 = vmatprep.mubr.f32.mxu0 %v1405_v44 }
 0x384   : > { %2161 = vmatmul.mubr.f32.gmra.mxu1 %v3020_v51  ;;  %v1406_v5 = vadd.f32 %v2947_v13, %v1384_v4 }
 0x386   : > { %2146 = vmatmul.mubr.f32.gmra.mxu0 %v1406_v5 }
 0x42f   : > { %v2141_v7 = vpop.f32.mrf.mxu0 }
 0x430   : > { %v1563_v8 = vmax.f32 %v2141_v7, 0.0 }
 0x431   : > { %v1483_v49 = vpop.f32.mrf.mxu0 }
 0x432   : > { %v1562_v9 = vmax.f32 %v1483_v49, 0.0  ;;  %v3029_v12 = vadd.f32 %v1563_v8, %v2955_v17 }
 0x434   : > { %v2150_v52 = vpop.f32.mrf.mxu1  ;;  %1596 = vadd.xlane.f32.xlu1 %v3029_v12  ;;  %v1578_v63 = vadd.f32 %v1562_v9, %v2950_v47 }
 0x435   : > { %v1569_v22 = vmax.f32 %v2150_v52, 0.0 }
 0x436   : > { %1594 = vadd.xlane.f32.xlu0 %v1578_v63  ;;  %v1513_v61 = vpop.f32.mrf.mxu1 }
 0x437   : > { %v1568_v32 = vmax.f32 %v1513_v61, 0.0  ;;  %v1585_v6 = vadd.f32 %v1569_v22, %v2967_v54 }
 0x438   : > { %v2153_v14 = vpop.f32.mrf.mxu1 }
 0x439   : > { %v1571_v34 = vmax.f32 %v2153_v14, 0.0  ;;  %v1584_v2 = vadd.f32 %v1568_v32, %v2963_v3 }
 0x43a   : > { %v1523_v16 = vpop.f32.mrf.mxu1 }
 0x43b   : > { %v1570_v37 = vmax.f32 %v1523_v16, 0.0  ;;  %v3036_v28 = vadd.f32 %v1571_v34, %v2981_v29 }
 0x43c   : > { %v2156_v21 = vpop.f32.mrf.mxu1 }
 0x43d   : > { %v1573_v41 = vmax.f32 %v2156_v21, 0.0  ;;  %v3040_v50 = vadd.f32 %v1570_v37, %v2977_v35 }
 0x43e   : > { %v1533_v26 = vpop.f32.mrf.mxu1 }
 0x43f   : > { %v2144_v15 = vpop.f32.mrf.mxu0  ;;  %v1572_v46 = vmax.f32 %v1533_v26, 0.0  ;;  %v3044_v54 = vadd.f32 %v1573_v41, %v2997_v36 }
 0x440   : > { %v1565_v10 = vmax.f32 %v2144_v15, 0.0  ;;  %v2159_v33 = vpop.f32.mrf.mxu1 }
 0x441   : > { %v1493_v13 = vpop.f32.mrf.mxu0  ;;  %v3048_v18 = vadd.f32 %v1572_v46, %v2987_v45 }
 0x442   : > { %v1564_v19 = vmax.f32 %v1493_v13, 0.0  ;;  %v1581_v20 = vadd.f32 %v1565_v10, %v1404_v30  ;;  %v1543_v39 = vpop.f32.mrf.mxu1 }
 0x443   : > { %v1574_v3 = vmax.f32 %v1543_v39, 0.0 }
 0x444   : > { %1600 = vadd.xlane.f32.xlu1 %v1581_v20  ;;  %v1580_v24 = vadd.f32 %v1564_v19, %v1403_v42  ;;  %v2162_v23 = vpop.f32.mrf.mxu1  ;;  %v1575_v42 = vmax.f32 %v2159_v33, 0.0 }
 0x445   : > { %v1577_v53 = vmax.f32 %v2162_v23, 0.0  ;;  %v3056_v40 = vadd.f32 %v1574_v3, %v3001_v43 }
 0x446   : > { %1598 = vadd.xlane.f32.xlu0 %v1580_v24  ;;  %v2147_v17 = vpop.f32.mrf.mxu0  ;;  %v1553_v29 = vpop.f32.mrf.mxu1  ;;  %v3052_v35 = vadd.f32 %v1575_v42, %v3011_v58 }
 0x447   : > { %v1567_v25 = vmax.f32 %v2147_v17, 0.0  ;;  %v1576_v55 = vmax.f32 %v1553_v29, 0.0  ;;  %v3060_v36 = vadd.f32 %v1577_v53, %v3020_v51 }
 0x448   : > { %v1503_v27 = vpop.f32.mrf.mxu0 }
 0x449   : > { %v1566_v31 = vmax.f32 %v1503_v27, 0.0  ;;  %v1583_v47 = vadd.f32 %v1567_v25, %v1406_v5  ;;  %v3064_v45 = vadd.f32 %v1576_v55, %v3015_v0 }
 0x44b   : > { %1604 = vadd.xlane.f32.xlu1 %v1583_v47  ;;  %v1582_v11 = vadd.f32 %v1566_v31, %v1405_v44 }
 0x44d   : > { %1602 = vadd.xlane.f32.xlu0 %v1582_v11 }
 0x44f   : > { %1608 = vadd.xlane.f32.xlu1 %v1585_v6 }
 0x451   : > { %1606 = vadd.xlane.f32.xlu0 %v1584_v2 }
 0x453   : > { %1612 = vadd.xlane.f32.xlu1 %v3036_v28 }
 0x455   : > { %1610 = vadd.xlane.f32.xlu0 %v3040_v50 }
 0x457   : > { %1616 = vadd.xlane.f32.xlu1 %v3044_v54 }
 0x459   : > { %1614 = vadd.xlane.f32.xlu0 %v3048_v18 }
 0x45b   : > { %1620 = vadd.xlane.f32.xlu1 %v3052_v35 }
 0x45d   : > { %1618 = vadd.xlane.f32.xlu0 %v3056_v40 }
 0x45f   : > { %1624 = vadd.xlane.f32.xlu1 %v3060_v36 }
 0x461   : > { %1622 = vadd.xlane.f32.xlu0 %v3064_v45 }
 0x4bd   : > { %v1597_v38 = vpop.xlane.xlu1 %1596 }
 0x4be   : > { %v1627_v48 = vmul.f32 0.0078125, %v1597_v38 }
 0x4bf   : > { %v1595_v56 = vpop.xlane.xlu0 %1594 }
 0x4c0   : > { %v3068_v30 = vsub.f32 %v3029_v12, %v1627_v48  ;;  %v1626_v43 = vmul.f32 0.0078125, %v1595_v56 }
 0x4c2   : > { %v3070_v57 = vsub.f32 %v1578_v63, %v1626_v43  ;;  %v1659_v58 = vmul.f32 %v3068_v30, %v3068_v30 }
 0x4c4   : > { %1676 = vadd.xlane.f32.xlu1 %v1659_v58  ;;  %v1658_v60 = vmul.f32 %v3070_v57, %v3070_v57 }
 0x4c6   : > { %1674 = vadd.xlane.f32.xlu0 %v1658_v60 }
 0x4cd   : > { %v1601_v62 = vpop.xlane.xlu1 %1600 }
 0x4ce   : > { %v1629_v0 = vmul.f32 0.0078125, %v1601_v62 }
 0x4cf   : > { %v1599_v1 = vpop.xlane.xlu0 %1598 }
 0x4d0   : > { %v3076_v51 = vsub.f32 %v1581_v20, %v1629_v0  ;;  %v1628_v59 = vmul.f32 0.0078125, %v1599_v1 }
 0x4d2   : > { %v3078_v44 = vsub.f32 %v1580_v24, %v1628_v59  ;;  %v1661_v4 = vmul.f32 %v3076_v51, %v3076_v51 }
 0x4d4   : > { %1680 = vadd.xlane.f32.xlu1 %v1661_v4  ;;  %v1605_v5 = vpop.xlane.xlu1 %1604  ;;  %v1660_v7 = vmul.f32 %v3078_v44, %v3078_v44  ;;  %v3143_v4 = vld [vmem:[%s3242_s7] ss:$0 sm:$0xff] }
 0x4d5   : > { %v1631_v8 = vmul.f32 0.0078125, %v1605_v5 }
 0x4d6   : > { %1678 = vadd.xlane.f32.xlu0 %v1660_v7  ;;  %v1603_v49 = vpop.xlane.xlu0 %1602 }
 0x4d7   : > { %v3084_v9 = vsub.f32 %v1583_v47, %v1631_v8  ;;  %v1630_v12 = vmul.f32 0.0078125, %v1603_v49 }
 0x4d8   : > { %v1609_v52 = vpop.xlane.xlu1 %1608 }
 0x4d9   : > { %v3086_v63 = vsub.f32 %v1582_v11, %v1630_v12  ;;  %v1633_v61 = vmul.f32 0.0078125, %v1609_v52  ;;  %v1663_v14 = vmul.f32 %v3084_v9, %v3084_v9  ;;  %v3149_v12 = vld [vmem:[%s3243_s8] ss:$0 sm:$0xff] }
 0x4da   : > { %v1607_v15 = vpop.xlane.xlu0 %1606 }
 0x4db   : > { %v3090_v16 = vsub.f32 %v1585_v6, %v1633_v61  ;;  %v1632_v10 = vmul.f32 0.0078125, %v1607_v15  ;;  %1684 = vadd.xlane.f32.xlu1 %v1663_v14  ;;  %v1662_v13 = vmul.f32 %v3086_v63, %v3086_v63 }
 0x4dc   : > { %v1613_v19 = vpop.xlane.xlu1 %1612 }
 0x4dd   : > { %v3094_v20 = vsub.f32 %v1584_v2, %v1632_v10  ;;  %v1635_v21 = vmul.f32 0.0078125, %v1613_v19  ;;  %1682 = vadd.xlane.f32.xlu0 %v1662_v13  ;;  %v1665_v24 = vmul.f32 %v3090_v16, %v3090_v16 }
 0x4de   : > { %v1611_v17 = vpop.xlane.xlu0 %1610 }
 0x4df   : > { %v3099_v25 = vsub.f32 %v3036_v28, %v1635_v21  ;;  %v1634_v26 = vmul.f32 0.0078125, %v1611_v17  ;;  %1688 = vadd.xlane.f32.xlu1 %v1665_v24  ;;  %v1664_v27 = vmul.f32 %v3094_v20, %v3094_v20 }
 0x4e0   : > { %v1617_v22 = vpop.xlane.xlu1 %1616 }
 0x4e1   : > { %v3104_v31 = vsub.f32 %v3040_v50, %v1634_v26  ;;  %v1637_v47 = vmul.f32 0.0078125, %v1617_v22  ;;  %1686 = vadd.xlane.f32.xlu0 %v1664_v27  ;;  %v1667_v32 = vmul.f32 %v3099_v25, %v3099_v25 }
 0x4e2   : > { %v1615_v11 = vpop.xlane.xlu0 %1614 }
 0x4e3   : > { %v3109_v33 = vsub.f32 %v3044_v54, %v1637_v47  ;;  %v1636_v34 = vmul.f32 0.0078125, %v1615_v11  ;;  %1692 = vadd.xlane.f32.xlu1 %v1667_v32  ;;  %v1666_v6 = vmul.f32 %v3104_v31, %v3104_v31 }
 0x4e4   : > { %v1621_v37 = vpop.xlane.xlu1 %1620 }
 0x4e5   : > { %v3114_v2 = vsub.f32 %v3048_v18, %v1636_v34  ;;  %v1639_v39 = vmul.f32 0.0078125, %v1621_v37  ;;  %1690 = vadd.xlane.f32.xlu0 %v1666_v6  ;;  %v1669_v41 = vmul.f32 %v3109_v33, %v3109_v33 }
 0x4e6   : > { %v1619_v28 = vpop.xlane.xlu0 %1618 }
 0x4e7   : > { %v3119_v46 = vsub.f32 %v3052_v35, %v1639_v39  ;;  %v1638_v50 = vmul.f32 0.0078125, %v1619_v28  ;;  %1696 = vadd.xlane.f32.xlu1 %v1669_v41  ;;  %v1668_v23 = vmul.f32 %v3114_v2, %v3114_v2 }
 0x4e8   : > { %v1625_v42 = vpop.xlane.xlu1 %1624 }
 0x4e9   : > { %v3124_v54 = vsub.f32 %v3056_v40, %v1638_v50  ;;  %v1641_v3 = vmul.f32 0.0078125, %v1625_v42  ;;  %1694 = vadd.xlane.f32.xlu0 %v1668_v23  ;;  %v1671_v18 = vmul.f32 %v3119_v46, %v3119_v46 }
 0x4ea   : > { %v1623_v29 = vpop.xlane.xlu0 %1622 }
 0x4eb   : > { %v3129_v53 = vsub.f32 %v3060_v36, %v1641_v3  ;;  %v1640_v35 = vmul.f32 0.0078125, %v1623_v29  ;;  %1700 = vadd.xlane.f32.xlu1 %v1671_v18  ;;  %v1670_v55 = vmul.f32 %v3124_v54, %v3124_v54 }
 0x4ed   : > { %v3134_v38 = vsub.f32 %v3064_v45, %v1640_v35  ;;  %1698 = vadd.xlane.f32.xlu0 %v1670_v55  ;;  %v1673_v40 = vmul.f32 %v3129_v53, %v3129_v53 }
 0x4ef   : > { %1704 = vadd.xlane.f32.xlu1 %v1673_v40  ;;  %v1672_v48 = vmul.f32 %v3134_v38, %v3134_v38 }
 0x4f1   : > { %1702 = vadd.xlane.f32.xlu0 %v1672_v48 }
 0x54d   : > { %v1677_v56 = vpop.xlane.xlu1 %1676 }
 0x54e   : > { %v1707_v36 = vmul.f32 0.0078125, %v1677_v56 }
 0x54f   : > { %v1675_v43 = vpop.xlane.xlu0 %1674 }
 0x550   : > { %v1723_v58 = vadd.f32 1e-05, %v1707_v36  ;;  %v1706_v60 = vmul.f32 0.0078125, %v1675_v43 }
 0x552   : > { %2349 = vrsqrt.f32 %v1723_v58  ;;  %v1722_v62 = vadd.f32 1e-05, %v1706_v60 }
 0x554   : > { %2351 = vrsqrt.f32 %v1722_v62 }
 0x55d   : > { %v1681_v0 = vpop.xlane.xlu1 %1680 }
 0x55e   : > { %v1709_v45 = vmul.f32 0.0078125, %v1681_v0 }
 0x55f   : > { %v1679_v1 = vpop.xlane.xlu0 %1678  ;;  %v2350_v59 = vpop.eup %2349 }
 0x560   : > { %v1725_v5 = vadd.f32 1e-05, %v1709_v45  ;;  %v1708_v7 = vmul.f32 0.0078125, %v1679_v1  ;;  %v1755_v8 = vmul.f32 %v2350_v59, %v3068_v30 }
 0x561   : > { %v2352_v49 = vpop.eup %2351 }
 0x562   : > { %2353 = vrsqrt.f32 %v1725_v5  ;;  %v1724_v52 = vadd.f32 1e-05, %v1708_v7  ;;  %v1777_v61 = vmul.f32 %v3143_v4, %v1755_v8  ;;  %v1754_v14 = vmul.f32 %v2352_v49, %v3070_v57 }
 0x564   : > { %2355 = vrsqrt.f32 %v1724_v52  ;;  %v1685_v15 = vpop.xlane.xlu1 %1684  ;;  %v1799_v10 = vadd.f32 %v3149_v12, %v1777_v61  ;;  %v1776_v30 = vmul.f32 %v3143_v4, %v1754_v14 }
 0x565   : > { %v1711_v13 = vmul.f32 0.0078125, %v1685_v15 }
 0x566   : > { %v1683_v19 = vpop.xlane.xlu0 %1682  ;;  %v1831_v21 = vmax.f32 %v1799_v10, 0.0  ;;  %v1798_v24 = vadd.f32 %v3149_v12, %v1776_v30 }
 0x567   : > { %v1727_v17 = vadd.f32 1e-05, %v1711_v13  ;;  %v1710_v26 = vmul.f32 0.0078125, %v1683_v19 }
 0x568   : > { %v1689_v27 = vpop.xlane.xlu1 %1688  ;;  %1847 = vst [vmem:[%s2580_s0 + $0x8] sm:$0xff] %v1831_v21  ;;  %v1830_v22 = vmax.f32 %v1798_v24, 0.0 }
 0x569   : > { %2357 = vrsqrt.f32 %v1727_v17  ;;  %v1726_v47 = vadd.f32 1e-05, %v1710_v26  ;;  %v1713_v57 = vmul.f32 0.0078125, %v1689_v27 }
 0x56a   : > { %v1687_v32 = vpop.xlane.xlu0 %1686  ;;  %1846 = vst [vmem:[%s2580_s0] sm:$0xff] %v1830_v22 }
 0x56b   : > { %2359 = vrsqrt.f32 %v1726_v47  ;;  %v1729_v11 = vadd.f32 1e-05, %v1713_v57  ;;  %v1712_v34 = vmul.f32 0.0078125, %v1687_v32 }
 0x56c   : > { %v1693_v6 = vpop.xlane.xlu1 %1692 }
 0x56d   : > { %2361 = vrsqrt.f32 %v1729_v11  ;;  %v1728_v37 = vadd.f32 1e-05, %v1712_v34  ;;  %v1715_v39 = vmul.f32 0.0078125, %v1693_v6 }
 0x56e   : > { %v1691_v41 = vpop.xlane.xlu0 %1690 }
 0x56f   : > { %v2354_v28 = vpop.eup %2353  ;;  %2363 = vrsqrt.f32 %v1728_v37  ;;  %v1731_v50 = vadd.f32 1e-05, %v1715_v39  ;;  %v1714_v23 = vmul.f32 0.0078125, %v1691_v41 }
 0x570   : > { %v1757_v42 = vmul.f32 %v2354_v28, %v3076_v51  ;;  %v1697_v3 = vpop.xlane.xlu1 %1696 }
 0x571   : > { %v2356_v18 = vpop.eup %2355  ;;  %2365 = vrsqrt.f32 %v1731_v50  ;;  %v1730_v29 = vadd.f32 1e-05, %v1714_v23  ;;  %v1717_v35 = vmul.f32 0.0078125, %v1697_v3 }
 0x572   : > { %v1779_v55 = vmul.f32 %v3143_v4, %v1757_v42  ;;  %v1756_v40 = vmul.f32 %v2356_v18, %v3078_v44  ;;  %v1695_v48 = vpop.xlane.xlu0 %1694 }
 0x573   : > { %2367 = vrsqrt.f32 %v1730_v29  ;;  %v1733_v56 = vadd.f32 1e-05, %v1717_v35  ;;  %v1716_v36 = vmul.f32 0.0078125, %v1695_v48 }
 0x574   : > { %v1801_v43 = vadd.f32 %v3149_v12, %v1779_v55  ;;  %v1778_v58 = vmul.f32 %v3143_v4, %v1756_v40  ;;  %v1701_v60 = vpop.xlane.xlu1 %1700 }
 0x575   : > { %2369 = vrsqrt.f32 %v1733_v56  ;;  %v1732_v51 = vadd.f32 1e-05, %v1716_v36  ;;  %v1719_v62 = vmul.f32 0.0078125, %v1701_v60 }
 0x576   : > { %v2358_v0 = vpop.eup %2357  ;;  %v1833_v45 = vmax.f32 %v1801_v43, 0.0  ;;  %v1800_v1 = vadd.f32 %v3149_v12, %v1778_v58  ;;  %v1699_v59 = vpop.xlane.xlu0 %1698 }
 0x577   : > { %v1759_v44 = vmul.f32 %v2358_v0, %v3084_v9  ;;  %2371 = vrsqrt.f32 %v1732_v51  ;;  %v1735_v5 = vadd.f32 1e-05, %v1719_v62  ;;  %v1718_v7 = vmul.f32 0.0078125, %v1699_v59 }
 0x578   : > { %v2360_v8 = vpop.eup %2359  ;;  %1849 = vst [vmem:[%s2580_s0 + $0x18] sm:$0xff] %v1833_v45  ;;  %v1832_v49 = vmax.f32 %v1800_v1, 0.0  ;;  %v1705_v52 = vpop.xlane.xlu1 %1704 }
 0x579   : > { %v1781_v61 = vmul.f32 %v3143_v4, %v1759_v44  ;;  %v1758_v14 = vmul.f32 %v2360_v8, %v3086_v63  ;;  %2373 = vrsqrt.f32 %v1735_v5  ;;  %v1734_v15 = vadd.f32 1e-05, %v1718_v7 }
 0x57a   : > { %v2362_v10 = vpop.eup %2361  ;;  %1848 = vst [vmem:[%s2580_s0 + $0x10] sm:$0xff] %v1832_v49  ;;  %v1721_v30 = vmul.f32 0.0078125, %v1705_v52  ;;  %v1703_v13 = vpop.xlane.xlu0 %1702 }
 0x57b   : > { %v1803_v9 = vadd.f32 %v3149_v12, %v1781_v61  ;;  %v1780_v19 = vmul.f32 %v3143_v4, %v1758_v14  ;;  %v1761_v21 = vmul.f32 %v2362_v10, %v3090_v16  ;;  %2375 = vrsqrt.f32 %v1734_v15 }
 0x57c   : > { %v2364_v24 = vpop.eup %2363  ;;  %v1737_v17 = vadd.f32 1e-05, %v1721_v30  ;;  %v1720_v26 = vmul.f32 0.0078125, %v1703_v13 }
 0x57d   : > { %v1835_v27 = vmax.f32 %v1803_v9, 0.0  ;;  %v1802_v63 = vadd.f32 %v3149_v12, %v1780_v19  ;;  %v1783_v22 = vmul.f32 %v3143_v4, %v1761_v21  ;;  %v1760_v47 = vmul.f32 %v2364_v24, %v3094_v20 }
 0x57e   : > { %v2366_v57 = vpop.eup %2365  ;;  %2377 = vrsqrt.f32 %v1737_v17  ;;  %v1736_v32 = vadd.f32 1e-05, %v1720_v26 }
 0x57f   : > { %1851 = vst [vmem:[%s2580_s0 + $0x28] sm:$0xff] %v1835_v27  ;;  %v1834_v11 = vmax.f32 %v1802_v63, 0.0  ;;  %v1805_v16 = vadd.f32 %v3149_v12, %v1783_v22  ;;  %v1782_v34 = vmul.f32 %v3143_v4, %v1760_v47  ;;  %v1763_v6 = vmul.f32 %v2366_v57, %v3099_v25 }
 0x580   : > { %v2368_v37 = vpop.eup %2367  ;;  %2379 = vrsqrt.f32 %v1736_v32 }
 0x581   : > { %1850 = vst [vmem:[%s2580_s0 + $0x20] sm:$0xff] %v1834_v11  ;;  %v1837_v39 = vmax.f32 %v1805_v16, 0.0  ;;  %v1804_v41 = vadd.f32 %v3149_v12, %v1782_v34  ;;  %v1785_v20 = vmul.f32 %v3143_v4, %v1763_v6  ;;  %v1762_v28 = vmul.f32 %v2368_v37, %v3104_v31 }
 0x582   : > { %v2370_v50 = vpop.eup %2369 }
 0x583   : > { %1853 = vst [vmem:[%s2580_s0 + $0x38] sm:$0xff] %v1837_v39  ;;  %v1836_v23 = vmax.f32 %v1804_v41, 0.0  ;;  %v1807_v42 = vadd.f32 %v3149_v12, %v1785_v20  ;;  %v1784_v3 = vmul.f32 %v3143_v4, %v1762_v28  ;;  %v1765_v25 = vmul.f32 %v2370_v50, %v3109_v33 }
 0x584   : > { %v2372_v18 = vpop.eup %2371 }
 0x585   : > { %1852 = vst [vmem:[%s2580_s0 + $0x30] sm:$0xff] %v1836_v23  ;;  %v1839_v29 = vmax.f32 %v1807_v42, 0.0  ;;  %v1806_v35 = vadd.f32 %v3149_v12, %v1784_v3  ;;  %v1787_v55 = vmul.f32 %v3143_v4, %v1765_v25  ;;  %v1764_v31 = vmul.f32 %v2372_v18, %v3114_v2 }
 0x586   : > { %v2374_v40 = vpop.eup %2373 }
 0x587   : > { %1855 = vst [vmem:[%s2580_s0 + $0x48] sm:$0xff] %v1839_v29  ;;  %v1838_v48 = vmax.f32 %v1806_v35, 0.0  ;;  %v1809_v56 = vadd.f32 %v3149_v12, %v1787_v55  ;;  %v1786_v36 = vmul.f32 %v3143_v4, %v1764_v31  ;;  %v1767_v33 = vmul.f32 %v2374_v40, %v3119_v46 }
 0x588   : > { %v2376_v43 = vpop.eup %2375 }
 0x589   : > { %1854 = vst [vmem:[%s2580_s0 + $0x40] sm:$0xff] %v1838_v48  ;;  %v1841_v58 = vmax.f32 %v1809_v56, 0.0  ;;  %v1808_v60 = vadd.f32 %v3149_v12, %v1786_v36  ;;  %v1789_v51 = vmul.f32 %v3143_v4, %v1767_v33  ;;  %v1766_v2 = vmul.f32 %v2376_v43, %v3124_v54 }
 0x58b   : > { %v2378_v62 = vpop.eup %2377  ;;  %1857 = vst [vmem:[%s2580_s0 + $0x58] sm:$0xff] %v1841_v58  ;;  %v1840_v0 = vmax.f32 %v1808_v60, 0.0  ;;  %v1811_v45 = vadd.f32 %v3149_v12, %v1789_v51  ;;  %v1788_v1 = vmul.f32 %v3143_v4, %v1766_v2 }
 0x58c   : > { %v1769_v46 = vmul.f32 %v2378_v62, %v3129_v53 }
 0x58d   : > { %v2380_v59 = vpop.eup %2379  ;;  %1856 = vst [vmem:[%s2580_s0 + $0x50] sm:$0xff] %v1840_v0  ;;  %v1843_v44 = vmax.f32 %v1811_v45, 0.0  ;;  %v1810_v5 = vadd.f32 %v3149_v12, %v1788_v1 }
 0x58e   : > { %v1791_v7 = vmul.f32 %v3143_v4, %v1769_v46  ;;  %v1768_v54 = vmul.f32 %v2380_v59, %v3134_v38 }
 0x58f   : > { %1859 = vst [vmem:[%s2580_s0 + $0x68] sm:$0xff] %v1843_v44  ;;  %v1842_v8 = vmax.f32 %v1810_v5, 0.0 }
 0x590   : > { %v1813_v49 = vadd.f32 %v3149_v12, %v1791_v7  ;;  %v1790_v52 = vmul.f32 %v3143_v4, %v1768_v54 }
 0x591   : > { %1858 = vst [vmem:[%s2580_s0 + $0x60] sm:$0xff] %v1842_v8 }
 0x592   : > { %v1845_v61 = vmax.f32 %v1813_v49, 0.0  ;;  %v1812_v53 = vadd.f32 %v3149_v12, %v1790_v52 }
 0x594   : > { %1861 = vst [vmem:[%s2580_s0 + $0x78] sm:$0xff] %v1845_v61  ;;  %v1844_v14 = vmax.f32 %v1812_v53, 0.0 }
 0x596   : > { %1860 = vst [vmem:[%s2580_s0 + $0x70] sm:$0xff] %v1844_v14 }
 0x597 PF: > { %s19_s15 = sadd.s32 1, %s2435_s15   ;;  %s3247_s30 = smov %s2415_s10 }
 0x598   : > { %p16_p0 = scmp.ge.s32.totalorder %s19_s15, 8   ;;  %s3248_s10 = smov %s2540_s22 }
 0x599   : > { %s3249_s11 = smov %s2427_s13  ;;  %s3250_s12 = smov %s2431_s14 }
 0x59a   : > { %s3251_s13 = smov %s3254_s16  ;;  %s3252_s14 = smov %s3258_s17 }
 0x59b   :  { %18 = sbr.rel (!%p16_p0) target bundleno = 6 (0x6), region = 143 }

// kernel: allset_transformer_layer.2
= control target key start
LH: loop header
LB: loop body
LE: loop exit
PB: predicated region body
PF: predicated region fallthrough
CT: control target
= control target key end

     0   :  { %s3283_s0 = inlined_call_operand.vmem [shape: bf16[384,256], index: 0, kind: input, shape index: {}]   ;;  %s3284_s1 = inlined_call_operand.vmem [shape: f32[384,132], index: 1, kind: input, shape index: {}]   ;;  %s3285_s2 = inlined_call_operand.vmem [shape: f32[1,128], index: 2, kind: input, shape index: {}]   ;;  %s3286_s3 = inlined_call_operand.vmem [shape: f32[4,128], index: 3, kind: input, shape index: {}]   ;;  %s3287_s4 = inlined_call_operand.vmem [shape: f32[128,128], index: 4, kind: input, shape index: {}]   ;;  %s3288_s5 = inlined_call_operand.vmem [shape: f32[1,128], index: 5, kind: input, shape index: {}]   ;;  %s3289_s6 = inlined_call_operand.vmem [shape: f32[1,128], index: 6, kind: input, shape index: {}]   ;;  %s3290_s7 = inlined_call_operand.vmem [shape: f32[1,128], index: 7, kind: input, shape index: {}]   ;;  %s3291_s8 = inlined_call_operand.vmem [shape: f32[1,128], index: 8, kind: input, shape index: {}]   ;;  %s3292_s9 = inlined_call_operand.vmem [shape: f32[256,128], index: 9, kind: output, shape index: {}]  }
   0x1   :  { %3293 = sst [smem:[#allocation4_spill]] %s3283_s0 }
   0x2   :  { %s2521_s30 = smov 0   ;;  %s2523_s10 = smov 0  }
   0x3   :  { %s2525_s11 = smov 0   ;;  %s2527_s12 = smov 0  }
   0x4   :  { %s2529_s13 = smov 0   ;;  %s2531_s14 = smov 0  }
   0x5   :  { %s2533_s15 = smov 0  }
   0x6 LB: > { %s28_s16 = sadd.s32 1, %s2459_s13  ;;  %s31_s17 = sadd.s32 1, %s2463_s14  ;;  %s2467_s15 = sphi %s2533_s15, %s19_s15   ;;  %s2463_s14 = sphi %s2531_s14, %s3300_s14   ;;  %s2459_s13 = sphi %s2529_s13, %s3299_s13   ;;  %s2455_s12 = sphi %s2527_s12, %s3298_s12   ;;  %s2451_s11 = sphi %s2525_s11, %s3297_s11   ;;  %s2447_s10 = sphi %s2523_s10, %s3296_s10   ;;  %s2443_s30 = sphi %s2521_s30, %s3295_s30  }
   0x7   : > { %p29_p0 = scmp.ge.s32.totalorder %s28_s16, 3  ;;  %p47_p1 = scmp.ne.s32.totalorder %s2447_s10, %s2443_s30 }
   0x8   : > { %p48_p2 = scmp.eq.s32.totalorder %s2467_s15, 0  ;;  %s40_s21 = sadd.s32 1, %s2447_s10 }
   0x9   : > { %s3302_s16 = smov (%p29_p0, %s28_s16), 0  ;;  %s3304_s17 = smov (!%p29_p0, %s31_s17), %s2463_s14 }
   0xa   : > { %p49_p3 = por %p48_p2, %p47_p1  ;;  %p33_p4 = scmp.ge.s32.totalorder %s3304_s17, 2 }
   0xb   : > { %s35_s18 = ssub.s32 %s2459_s13, %s3302_s16  ;;  %p1985_p6 = scmp.ge.s32.totalorder %s2467_s15, 6 }
   0xc   : > { %s3306_s17 = smov (%p33_p4, %s3304_s17), 0 }
   0xd   : > { %s36_s19 = ssub.s32 %s2463_s14, %s3306_s17  ;;  %293 = sbr.rel (%p1985_p6) target bundleno = 38 (0x26), region = 44 }
   0xe   : > { %s37_s20 = sor.u32 %s36_s19, %s35_s18 }
   0xf   : > { %p38_p5 = scmp.eq.s32.totalorder %s37_s20, 0 }
  0x11   : > { %s2572_s22 = scalar_select %p38_p5, %s2447_s10, %s40_s21  }
  0x12   : > { %296 = sbr.rel (!%p49_p3) target bundleno = 38 (0x26), region = 48  ;;  %s298_s23 = sand.u32 (%p49_p3), 1, %s2447_s10  }
  0x13   : > { %s2023_s24 = sshll.u32 (%p49_p3), %s2459_s13, 5  ;;  %s1986_s25 = sshll.u32 (%p49_p3), %s298_s23, 6 }
  0x14   : > { %s303_s26 = sadd.s32 (%p49_p3), %s2463_s14, %s2023_s24  ;;  %s3294_s0 = sld [smem:[#allocation4_spill]] (%p49_p3) }
  0x15   : > { %s1989_s27 = sshll.u32 (%p49_p3), %s303_s26, 2  ;;  %s300_s19 = scalar_lea.vmem (%p49_p3), [#allocation3], %s1986_s25 }
  0x1a   : > { %s2581_s18 = scalar_lea.vmem %s3294_s0, %s1989_s27 }
  0x1b   : > { %v322_v0 = vld [vmem:[%s2581_s18] sm:$0xf]  ;;  %v324_v1 = vld [vmem:[%s2581_s18 + $0x8] sm:$0xf]  ;;  %v326_v2 = vld [vmem:[%s2581_s18 + $0x10] sm:$0xf] }
  0x1c   : > { %323 = vst [vmem:[%s300_s19] sm:$0xf] %v322_v0  ;;  %325 = vst [vmem:[%s300_s19 + $0x4] sm:$0xf] %v324_v1  ;;  %v328_v3 = vld [vmem:[%s2581_s18 + $0x18] sm:$0xf] }
  0x1d   : > { %327 = vst [vmem:[%s300_s19 + $0x8] sm:$0xf] %v326_v2  ;;  %v330_v4 = vld [vmem:[%s2581_s18 + $0x20] sm:$0xf]  ;;  %v332_v5 = vld [vmem:[%s2581_s18 + $0x28] sm:$0xf] }
  0x1e   : > { %329 = vst [vmem:[%s300_s19 + $0xc] sm:$0xf] %v328_v3  ;;  %331 = vst [vmem:[%s300_s19 + $0x10] sm:$0xf] %v330_v4  ;;  %v334_v6 = vld [vmem:[%s2581_s18 + $0x30] sm:$0xf] }
  0x1f   : > { %333 = vst [vmem:[%s300_s19 + $0x14] sm:$0xf] %v332_v5  ;;  %v336_v7 = vld [vmem:[%s2581_s18 + $0x38] sm:$0xf]  ;;  %v338_v8 = vld [vmem:[%s2581_s18 + $0x40] sm:$0xf] }
  0x20   : > { %335 = vst [vmem:[%s300_s19 + $0x18] sm:$0xf] %v334_v6  ;;  %337 = vst [vmem:[%s300_s19 + $0x1c] sm:$0xf] %v336_v7  ;;  %v340_v9 = vld [vmem:[%s2581_s18 + $0x48] sm:$0xf] }
  0x21   : > { %339 = vst [vmem:[%s300_s19 + $0x20] sm:$0xf] %v338_v8  ;;  %v342_v10 = vld [vmem:[%s2581_s18 + $0x50] sm:$0xf]  ;;  %v344_v11 = vld [vmem:[%s2581_s18 + $0x58] sm:$0xf] }
  0x22   : > { %341 = vst [vmem:[%s300_s19 + $0x24] sm:$0xf] %v340_v9  ;;  %343 = vst [vmem:[%s300_s19 + $0x28] sm:$0xf] %v342_v10  ;;  %v346_v12 = vld [vmem:[%s2581_s18 + $0x60] sm:$0xf] }
  0x23   : > { %345 = vst [vmem:[%s300_s19 + $0x2c] sm:$0xf] %v344_v11  ;;  %v348_v13 = vld [vmem:[%s2581_s18 + $0x68] sm:$0xf]  ;;  %v350_v14 = vld [vmem:[%s2581_s18 + $0x70] sm:$0xf] }
  0x24   : > { %347 = vst [vmem:[%s300_s19 + $0x30] sm:$0xf] %v346_v12  ;;  %349 = vst [vmem:[%s300_s19 + $0x34] sm:$0xf] %v348_v13  ;;  %v352_v15 = vld [vmem:[%s2581_s18 + $0x78] sm:$0xf] }
  0x25   : > { %351 = vst [vmem:[%s300_s19 + $0x38] sm:$0xf] %v350_v14  ;;  %353 = vst [vmem:[%s300_s19 + $0x3c] sm:$0xf] %v352_v15 }
  0x26 PF: > { %p1990_p7 = scmp.ge.s32.totalorder %s2467_s15, 1  ;;  %p418_p8 = scmp.lt.s32.totalorder %s2467_s15, 7 }
  0x28   : > { %p419_p9 = pnand %p1990_p7, %p418_p8 }
  0x29   : > { %s425_s20 = sand.u32 (!%p419_p9), 1, %s2443_s30   ;;  %s1992_s21 = sshll.u32 (!%p419_p9), %s2451_s11, 4 }
  0x2a   : > { %422 = sbr.rel (%p419_p9) target bundleno = 1557 (0x615), region = 93  ;;  %s1991_s23 = sshll.u32 (!%p419_p9), %s425_s20, 6 }
  0x2b   : > { %p468_p10 = scmp.lt.s32.totalorder (!%p419_p9), %s1992_s21, 47  ;;  %s1995_s24 = sshll.u32 (!%p419_p9), %s2455_s12, 4 }
  0x2c   : > { %p475_p11 = scmp.lt.s32.totalorder (!%p419_p9), %s1995_s24, 31  ;;  %s2614_s30 = scalar_lea.vmem (!%p419_p9), [#allocation3], %s1991_s23 }
  0x2d   : > { %p1997_p12 = scmp.ne.s32.totalorder (!%p419_p9), %s2451_s11, 0 }
  0x2f   : > { %s3308_s21 = smov (!%p468_p10, %s1992_s21), 47  ;;  %s3310_s24 = smov (!%p475_p11, %s1995_s24), 31 }
  0x30   : > { %s2024_s25 = sshll.u32 %s3308_s21, 4  ;;  %s1996_s29 = sshll.u32 %s3310_s24, 3 }
  0x31   : > { %s2607_s28 = scalar_lea.vmem %s3284_s1, %s2024_s25  ;;  %s2612_s0 = scalar_lea.vmem %s3292_s9, %s1996_s29 }
  0x32   : > { %483 = sbr.rel (%p1997_p12) target bundleno = 72 (0x48), region = 101 }
  0x37   : > { %vm485_vm0 = vcmask 31744   ;;  %v2469_v16 = vmov 0.0  }
  0x38   : > { %484 = vst [vmem:[#allocation2] sm:$0xff] %v2469_v16  ;;  %487 = vst [vmem:[#allocation2 + $0x10] sm:$0xff] %v2469_v16 }
  0x39   : > { %489 = vst [vmem:[#allocation2 + $0x20] sm:$0xff] %v2469_v16  ;;  %491 = vst [vmem:[#allocation2 + $0x30] sm:$0xff] %v2469_v16 }
  0x3a   : > { %493 = vst [vmem:[#allocation2 + $0x40] sm:$0xff] %v2469_v16  ;;  %495 = vst [vmem:[#allocation2 + $0x50] sm:$0xff] %v2469_v16 }
  0x3b   : > { %497 = vst [vmem:[#allocation2 + $0x60] sm:$0xff] %v2469_v16  ;;  %499 = vst [vmem:[#allocation2 + $0x70] sm:$0xff] %v2469_v16 }
  0x3c   : > { %501 = vst [vmem:[#allocation2 + $0x80] sm:$0xff] %v2469_v16  ;;  %503 = vst [vmem:[#allocation2 + $0x90] sm:$0xff] %v2469_v16 }
  0x3d   : > { %505 = vst [vmem:[#allocation2 + $0xa0] sm:$0xff] %v2469_v16  ;;  %507 = vst [vmem:[#allocation2 + $0xb0] sm:$0xff] %v2469_v16 }
  0x3e   : > { %509 = vst [vmem:[#allocation2 + $0xc0] sm:$0xff] %v2469_v16  ;;  %511 = vst [vmem:[#allocation2 + $0xd0] sm:$0xff] %v2469_v16 }
  0x3f   : > { %513 = vst [vmem:[#allocation2 + $0xe0] sm:$0xff] %v2469_v16  ;;  %515 = vst [vmem:[#allocation2 + $0xf0] sm:$0xff] %v2469_v16 }
  0x40   : > { %486 = vst.msk [vmem:[#allocation2 + $0x8] sm:$0xff] %vm485_vm0, %v2469_v16  ;;  %488 = vst.msk [vmem:[#allocation2 + $0x18] sm:$0xff] %vm485_vm0, %v2469_v16 }
  0x41   : > { %490 = vst.msk [vmem:[#allocation2 + $0x28] sm:$0xff] %vm485_vm0, %v2469_v16  ;;  %492 = vst.msk [vmem:[#allocation2 + $0x38] sm:$0xff] %vm485_vm0, %v2469_v16 }
  0x42   : > { %494 = vst.msk [vmem:[#allocation2 + $0x48] sm:$0xff] %vm485_vm0, %v2469_v16  ;;  %496 = vst.msk [vmem:[#allocation2 + $0x58] sm:$0xff] %vm485_vm0, %v2469_v16 }
  0x43   : > { %498 = vst.msk [vmem:[#allocation2 + $0x68] sm:$0xff] %vm485_vm0, %v2469_v16  ;;  %500 = vst.msk [vmem:[#allocation2 + $0x78] sm:$0xff] %vm485_vm0, %v2469_v16 }
  0x44   : > { %502 = vst.msk [vmem:[#allocation2 + $0x88] sm:$0xff] %vm485_vm0, %v2469_v16  ;;  %504 = vst.msk [vmem:[#allocation2 + $0x98] sm:$0xff] %vm485_vm0, %v2469_v16 }
  0x45   : > { %506 = vst.msk [vmem:[#allocation2 + $0xa8] sm:$0xff] %vm485_vm0, %v2469_v16  ;;  %508 = vst.msk [vmem:[#allocation2 + $0xb8] sm:$0xff] %vm485_vm0, %v2469_v16 }
  0x46   : > { %510 = vst.msk [vmem:[#allocation2 + $0xc8] sm:$0xff] %vm485_vm0, %v2469_v16  ;;  %512 = vst.msk [vmem:[#allocation2 + $0xd8] sm:$0xff] %vm485_vm0, %v2469_v16 }
  0x47   : > { %514 = vst.msk [vmem:[#allocation2 + $0xe8] sm:$0xff] %vm485_vm0, %v2469_v16  ;;  %516 = vst.msk [vmem:[#allocation2 + $0xf8] sm:$0xff] %vm485_vm0, %v2469_v16 }
  0x48 PF: > { %v2026_v17 = vld [vmem:[%s2614_s30] sm:$0xff]   ;;  %v2470_v19 = vmov 0.0   ;;  %v580_v20 = vld [vmem:[%s2607_s28 + $0xf8] sm:$0xff]  ;;  %v579_v22 = vld [vmem:[%s2607_s28 + $0xf0] sm:$0xff]  ;;  %vm839_vm1 = vcmask 31744   ;;  %p1998_p13 = scmp.ne.s32.totalorder %s2451_s11, 2 }
  0x49   : > { %v2027_v18 = vunpack.c.l.bf16 %v2026_v17  ;;  %677 = vmatprep.mubr.f32.mxu0 %v2470_v19  ;;  %725 = vmatprep.mubr.f32.mxu1 %v2470_v19  ;;  %v2028_v21 = vunpack.c.h.bf16 %v2026_v17  ;;  %v578_v23 = vld [vmem:[%s2607_s28 + $0xe8] sm:$0xff]  ;;  %v577_v24 = vld [vmem:[%s2607_s28 + $0xe0] sm:$0xff]  ;;  %v576_v26 = vld [vmem:[%s2607_s28 + $0xd8] sm:$0xff] }
  0x4a   : > { %613 = vmatprep.subr.mxu0 %v580_v20  ;;  %v2057_v25 = vld [vmem:[%s2614_s30 + $0x8] sm:$0xff]   ;;  %2195 = vmatprep.subr.mxu1 %v580_v20  ;;  %v575_v27 = vld [vmem:[%s2607_s28 + $0xd0] sm:$0xff]  ;;  %v573_v30 = vld [vmem:[%s2607_s28 + $0xc0] sm:$0xff] }
  0x4b   : > { %581 = vxpose.xlu0.b32.start [1/16] %v2027_v18, 128  ;;  %614 = vmatpush1.msra.mxu0 %v579_v22  ;;  %v574_v28 = vld [vmem:[%s2607_s28 + $0xc8] sm:$0xff]  ;;  %v2031_v29 = vunpack.c.l.bf16 %v2057_v25  ;;  %v572_v31 = vld [vmem:[%s2607_s28 + $0xb8] sm:$0xff]  ;;  %v571_v32 = vld [vmem:[%s2607_s28 + $0xb0] sm:$0xff]  ;;  %v2032_v34 = vunpack.c.h.bf16 %v2057_v25 }
  0x4c   : > { %615 = vmatprep.subr.mxu0 %v578_v23  ;;  %2211 = vmatpush1.msra.mxu1 %v579_v22  ;;  %v570_v33 = vld [vmem:[%s2607_s28 + $0xa8] sm:$0xff]  ;;  %v569_v35 = vld [vmem:[%s2607_s28 + $0xa0] sm:$0xff]  ;;  %v2058_v36 = vld [vmem:[%s2614_s30 + $0x10] sm:$0xff]  }
  0x4d   : > { %616 = vmatpush1.msra.mxu0 %v577_v24  ;;  %2196 = vmatprep.subr.mxu1 %v578_v23  ;;  %v568_v37 = vld [vmem:[%s2607_s28 + $0x98] sm:$0xff]  ;;  %v567_v38 = vld [vmem:[%s2607_s28 + $0x90] sm:$0xff]  ;;  %v566_v39 = vld [vmem:[%s2607_s28 + $0x88] sm:$0xff]  ;;  %v2035_v40 = vunpack.c.l.bf16 %v2058_v36  ;;  %v2036_v45 = vunpack.c.h.bf16 %v2058_v36 }
  0x4e   : > { %617 = vmatprep.subr.mxu0 %v576_v26  ;;  %2212 = vmatpush1.msra.mxu1 %v577_v24  ;;  %v565_v41 = vld [vmem:[%s2607_s28 + $0x80] sm:$0xff]  ;;  %v564_v42 = vld [vmem:[%s2607_s28 + $0x78] sm:$0xff]  ;;  %v563_v43 = vld [vmem:[%s2607_s28 + $0x70] sm:$0xff] }
  0x4f   : > { %582 = vxpose.xlu0.b32.cont [2/16] %v2028_v21, 128  ;;  %618 = vmatpush1.msra.mxu0 %v575_v27  ;;  %v562_v44 = vld [vmem:[%s2607_s28 + $0x68] sm:$0xff]  ;;  %v561_v46 = vld [vmem:[%s2607_s28 + $0x60] sm:$0xff]  ;;  %v2059_v47 = vld [vmem:[%s2614_s30 + $0x18] sm:$0xff]  }
  0x50   : > { %619 = vmatprep.subr.mxu0 %v574_v28  ;;  %2197 = vmatprep.subr.mxu1 %v576_v26  ;;  %v560_v48 = vld [vmem:[%s2607_s28 + $0x58] sm:$0xff]  ;;  %v559_v49 = vld [vmem:[%s2607_s28 + $0x50] sm:$0xff]  ;;  %v558_v50 = vld [vmem:[%s2607_s28 + $0x48] sm:$0xff]  ;;  %v2039_v51 = vunpack.c.l.bf16 %v2059_v47  ;;  %v2040_v56 = vunpack.c.h.bf16 %v2059_v47 }
  0x51   : > { %620 = vmatpush1.msra.mxu0 %v573_v30  ;;  %2213 = vmatpush1.msra.mxu1 %v575_v27  ;;  %v557_v52 = vld [vmem:[%s2607_s28 + $0x40] sm:$0xff]  ;;  %v556_v53 = vld [vmem:[%s2607_s28 + $0x38] sm:$0xff]  ;;  %v555_v54 = vld [vmem:[%s2607_s28 + $0x30] sm:$0xff] }
  0x52   : > { %621 = vmatprep.subr.mxu0 %v572_v31  ;;  %2198 = vmatprep.subr.mxu1 %v574_v28  ;;  %v554_v55 = vld [vmem:[%s2607_s28 + $0x28] sm:$0xff]  ;;  %v553_v57 = vld [vmem:[%s2607_s28 + $0x20] sm:$0xff]  ;;  %v552_v59 = vld [vmem:[%s2607_s28 + $0x18] sm:$0xff] }
  0x53   : > { %583 = vxpose.xlu0.b32.cont [3/16] %v2031_v29, 128  ;;  %622 = vmatpush1.msra.mxu0 %v571_v32  ;;  %v2060_v58 = vld [vmem:[%s2614_s30 + $0x20] sm:$0xff]   ;;  %v551_v60 = vld [vmem:[%s2607_s28 + $0x10] sm:$0xff]  ;;  %v550_v61 = vld [vmem:[%s2607_s28 + $0x8] sm:$0xff] }
  0x54   : > { %623 = vmatprep.subr.mxu0 %v570_v33  ;;  %2214 = vmatpush1.msra.mxu1 %v573_v30  ;;  %v2043_v62 = vunpack.c.l.bf16 %v2060_v58  ;;  %v549_v63 = vld [vmem:[%s2607_s28] sm:$0xff]  ;;  %v2044_v0 = vunpack.c.h.bf16 %v2060_v58  ;;  %v2061_v1 = vld [vmem:[%s2614_s30 + $0x28] sm:$0xff]   ;;  %v2062_v4 = vld [vmem:[%s2614_s30 + $0x30] sm:$0xff]  }
  0x55   : > { %624 = vmatpush1.msra.mxu0 %v569_v35  ;;  %2199 = vmatprep.subr.mxu1 %v572_v31  ;;  %v2047_v2 = vunpack.c.l.bf16 %v2061_v1  ;;  %v2048_v3 = vunpack.c.h.bf16 %v2061_v1  ;;  %v2051_v5 = vunpack.c.l.bf16 %v2062_v4  ;;  %v2052_v6 = vunpack.c.h.bf16 %v2062_v4  ;;  %v2063_v7 = vld [vmem:[%s2614_s30 + $0x38] sm:$0xff]   ;;  %v774_v27 = vld [vmem:[#allocation2] sm:$0xff]  ;;  %v775_v29 = vld [vmem:[#allocation2 + $0x8] sm:$0xff] }
  0x56   : > { %625 = vmatprep.subr.mxu0 %v568_v37  ;;  %2215 = vmatpush1.msra.mxu1 %v571_v32  ;;  %v2055_v8 = vunpack.c.l.bf16 %v2063_v7  ;;  %v2056_v9 = vunpack.c.h.bf16 %v2063_v7  ;;  %v776_v32 = vld [vmem:[#allocation2 + $0x10] sm:$0xff]  ;;  %v785_v58 = vld [vmem:[#allocation2 + $0x58] sm:$0xff] }
  0x57   : > { %584 = vxpose.xlu0.b32.cont [4/16] %v2032_v34, 128  ;;  %626 = vmatpush1.msra.mxu0 %v567_v38 }
  0x58   : > { %627 = vmatprep.subr.mxu0 %v566_v39  ;;  %2200 = vmatprep.subr.mxu1 %v570_v33 }
  0x59   : > { %628 = vmatpush1.msra.mxu0 %v565_v41  ;;  %2216 = vmatpush1.msra.mxu1 %v569_v35  ;;  %v777_v35 = vld [vmem:[#allocation2 + $0x18] sm:$0xff] }
  0x5a   : > { %629 = vmatprep.subr.mxu0 %v564_v42  ;;  %2201 = vmatprep.subr.mxu1 %v568_v37 }
  0x5b   : > { %585 = vxpose.xlu0.b32.cont [5/16] %v2035_v40, 128  ;;  %630 = vmatpush1.msra.mxu0 %v563_v43  ;;  %v779_v40 = vld [vmem:[#allocation2 + $0x28] sm:$0xff] }
  0x5c   : > { %631 = vmatprep.subr.mxu0 %v562_v44  ;;  %2217 = vmatpush1.msra.mxu1 %v567_v38  ;;  %v778_v38 = vld [vmem:[#allocation2 + $0x20] sm:$0xff] }
  0x5d   : > { %632 = vmatpush1.msra.mxu0 %v561_v46  ;;  %2202 = vmatprep.subr.mxu1 %v566_v39 }
  0x5e   : > { %633 = vmatprep.subr.mxu0 %v560_v48  ;;  %2218 = vmatpush1.msra.mxu1 %v565_v41 }
  0x5f   : > { %586 = vxpose.xlu0.b32.cont [6/16] %v2036_v45, 128  ;;  %634 = vmatpush1.msra.mxu0 %v559_v49 }
  0x60   : > { %635 = vmatprep.subr.mxu0 %v558_v50  ;;  %2203 = vmatprep.subr.mxu1 %v564_v42 }
  0x61   : > { %636 = vmatpush1.msra.mxu0 %v557_v52  ;;  %2219 = vmatpush1.msra.mxu1 %v563_v43  ;;  %v780_v43 = vld [vmem:[#allocation2 + $0x30] sm:$0xff] }
  0x62   : > { %637 = vmatprep.subr.mxu0 %v556_v53  ;;  %2204 = vmatprep.subr.mxu1 %v562_v44 }
  0x63   : > { %587 = vxpose.xlu0.b32.cont [7/16] %v2039_v51, 128  ;;  %638 = vmatpush1.msra.mxu0 %v555_v54 }
  0x64   : > { %639 = vmatprep.subr.mxu0 %v554_v55  ;;  %2220 = vmatpush1.msra.mxu1 %v561_v46  ;;  %v781_v46 = vld [vmem:[#allocation2 + $0x38] sm:$0xff] }
  0x65   : > { %640 = vmatpush1.msra.mxu0 %v553_v57  ;;  %2205 = vmatprep.subr.mxu1 %v560_v48 }
  0x66   : > { %641 = vmatprep.subr.mxu0 %v552_v59  ;;  %2221 = vmatpush1.msra.mxu1 %v559_v49  ;;  %v782_v49 = vld [vmem:[#allocation2 + $0x40] sm:$0xff] }
  0x67   : > { %588 = vxpose.xlu0.b32.cont [8/16] %v2040_v56, 128  ;;  %642 = vmatpush1.msra.mxu0 %v551_v60 }
  0x68   : > { %643 = vmatprep.subr.mxu0 %v550_v61  ;;  %2206 = vmatprep.subr.mxu1 %v558_v50 }
  0x69   : > { %644 = vmatpush1.msra.mxu0 %v549_v63  ;;  %2222 = vmatpush1.msra.mxu1 %v557_v52  ;;  %v783_v52 = vld [vmem:[#allocation2 + $0x48] sm:$0xff] }
  0x6a   : > { %2207 = vmatprep.subr.mxu1 %v556_v53 }
  0x6b   : > { %589 = vxpose.xlu0.b32.cont [9/16] %v2043_v62, 128  ;;  %2223 = vmatpush1.msra.mxu1 %v555_v54 }
  0x6c   : > { %2208 = vmatprep.subr.mxu1 %v554_v55  ;;  %v784_v55 = vld [vmem:[#allocation2 + $0x50] sm:$0xff] }
  0x6d   : > { %2224 = vmatpush1.msra.mxu1 %v553_v57 }
  0x6e   : > { %2209 = vmatprep.subr.mxu1 %v552_v59 }
  0x6f   : > { %590 = vxpose.xlu0.b32.cont [10/16] %v2044_v0, 128  ;;  %2225 = vmatpush1.msra.mxu1 %v551_v60  ;;  %v787_v0 = vld [vmem:[#allocation2 + $0x68] sm:$0xff] }
  0x70   : > { %2210 = vmatprep.subr.mxu1 %v550_v61  ;;  %v786_v61 = vld [vmem:[#allocation2 + $0x60] sm:$0xff] }
  0x71   : > { %2226 = vmatpush1.msra.mxu1 %v549_v63 }
  0x73   : > { %591 = vxpose.xlu0.b32.cont [11/16] %v2047_v2, 128 }
  0x77   : > { %592 = vxpose.xlu0.b32.cont [12/16] %v2048_v3, 128  ;;  %v788_v3 = vld [vmem:[#allocation2 + $0x70] sm:$0xff] }
  0x7b   : > { %593 = vxpose.xlu0.b32.cont [13/16] %v2051_v5, 128 }
  0x7f   : > { %594 = vxpose.xlu0.b32.cont [14/16] %v2052_v6, 128  ;;  %v789_v6 = vld [vmem:[#allocation2 + $0x78] sm:$0xff] }
  0x83   : > { %595 = vxpose.xlu0.b32.cont [15/16] %v2055_v8, 128 }
  0x87   : > { %596 = vxpose.xlu0.b32.end [16/16] %v2056_v9, 128  ;;  %v790_v9 = vld [vmem:[#allocation2 + $0x80] sm:$0xff] }
  0xc7   : > { %v597_v10 = vpop.trf.xlu0 }
  0xc8   : > { %678 = vmatmul.mubr.f32.vlgmr.msra.gmra.mxu0 %v597_v10 }
  0xc9   : > { %683 = vmatprep.mubr.f32.mxu0 %v2470_v19 }
  0xcb   : > { %v598_v11 = vpop.trf.xlu0 }
  0xcc   : > { %684 = vmatmul.mubr.f32.gmra.mxu0 %v598_v11 }
  0xcd   : > { %689 = vmatprep.mubr.f32.mxu0 %v2470_v19 }
  0xcf   : > { %v599_v12 = vpop.trf.xlu0 }
  0xd0   : > { %690 = vmatmul.mubr.f32.gmra.mxu0 %v599_v12  ;;  %v791_v12 = vld [vmem:[#allocation2 + $0x88] sm:$0xff] }
  0xd1   : > { %695 = vmatprep.mubr.f32.mxu0 %v2470_v19 }
  0xd3   : > { %v600_v13 = vpop.trf.xlu0 }
  0xd4   : > { %696 = vmatmul.mubr.f32.gmra.mxu0 %v600_v13 }
  0xd5   : > { %701 = vmatprep.mubr.f32.mxu0 %v2470_v19 }
  0xd7   : > { %v601_v14 = vpop.trf.xlu0 }
  0xd8   : > { %702 = vmatmul.mubr.f32.gmra.mxu0 %v601_v14 }
  0xd9   : > { %707 = vmatprep.mubr.f32.mxu0 %v2470_v19 }
  0xdb   : > { %v602_v15 = vpop.trf.xlu0 }
  0xdc   : > { %708 = vmatmul.mubr.f32.gmra.mxu0 %v602_v15  ;;  %v792_v15 = vld [vmem:[#allocation2 + $0x90] sm:$0xff] }
  0xdd   : > { %713 = vmatprep.mubr.f32.mxu0 %v2470_v19 }
  0xdf   : > { %v603_v16 = vpop.trf.xlu0 }
  0xe0   : > { %714 = vmatmul.mubr.f32.gmra.mxu0 %v603_v16 }
  0xe1   : > { %719 = vmatprep.mubr.f32.mxu0 %v2470_v19 }
  0xe3   : > { %v604_v17 = vpop.trf.xlu0 }
  0xe4   : > { %720 = vmatmul.mubr.f32.gmra.mxu0 %v604_v17 }
  0xe7   : > { %v605_v18 = vpop.trf.xlu0 }
  0xe8   : > { %726 = vmatmul.mubr.f32.vlgmr.msra.gmra.mxu1 %v605_v18  ;;  %v793_v18 = vld [vmem:[#allocation2 + $0x98] sm:$0xff] }
  0xe9   : > { %731 = vmatprep.mubr.f32.mxu1 %v2470_v19 }
  0xeb   : > { %v606_v20 = vpop.trf.xlu0 }
  0xec   : > { %732 = vmatmul.mubr.f32.gmra.mxu1 %v606_v20 }
  0xed   : > { %737 = vmatprep.mubr.f32.mxu1 %v2470_v19 }
  0xef   : > { %v607_v21 = vpop.trf.xlu0 }
  0xf0   : > { %738 = vmatmul.mubr.f32.gmra.mxu1 %v607_v21 }
  0xf1   : > { %743 = vmatprep.mubr.f32.mxu1 %v2470_v19 }
  0xf3   : > { %v608_v22 = vpop.trf.xlu0 }
  0xf4   : > { %744 = vmatmul.mubr.f32.gmra.mxu1 %v608_v22  ;;  %v794_v22 = vld [vmem:[#allocation2 + $0xa0] sm:$0xff] }
  0xf5   : > { %749 = vmatprep.mubr.f32.mxu1 %v2470_v19 }
  0xf7   : > { %v609_v23 = vpop.trf.xlu0 }
  0xf8   : > { %750 = vmatmul.mubr.f32.gmra.mxu1 %v609_v23 }
  0xf9   : > { %755 = vmatprep.mubr.f32.mxu1 %v2470_v19 }
  0xfb   : > { %v610_v24 = vpop.trf.xlu0 }
  0xfc   : > { %756 = vmatmul.mubr.f32.gmra.mxu1 %v610_v24 }
  0xfd   : > { %761 = vmatprep.mubr.f32.mxu1 %v2470_v19 }
  0xff   : > { %v611_v25 = vpop.trf.xlu0 }
 0x100   : > { %762 = vmatmul.mubr.f32.gmra.mxu1 %v611_v25  ;;  %v795_v25 = vld [vmem:[#allocation2 + $0xa8] sm:$0xff] }
 0x101   : > { %767 = vmatprep.mubr.f32.mxu1 %v2470_v19 }
 0x103   : > { %v612_v26 = vpop.trf.xlu0 }
 0x104   : > { %768 = vmatmul.mubr.f32.gmra.mxu1 %v612_v26 }
 0x188   : > { %v679_v28 = vpop.f32.mrf.mxu0 }
 0x189   : > { %v806_v30 = vadd.f32 %v774_v27, %v679_v28  ;;  %v796_v28 = vld [vmem:[#allocation2 + $0xb0] sm:$0xff] }
 0x18a   : > { %v681_v31 = vpop.f32.mrf.mxu0 }
 0x18b   : > { %838 = vst [vmem:[#allocation2] sm:$0xff] %v806_v30  ;;  %v807_v33 = vadd.f32 %v775_v29, %v681_v31  ;;  %v797_v31 = vld [vmem:[#allocation2 + $0xb8] sm:$0xff] }
 0x18c   : > { %v685_v34 = vpop.f32.mrf.mxu0 }
 0x18d   : > { %840 = vst.msk [vmem:[#allocation2 + $0x8] sm:$0xff] %vm839_vm1, %v807_v33  ;;  %v808_v36 = vadd.f32 %v776_v32, %v685_v34  ;;  %v798_v34 = vld [vmem:[#allocation2 + $0xc0] sm:$0xff] }
 0x18e   : > { %v687_v37 = vpop.f32.mrf.mxu0 }
 0x18f   : > { %841 = vst [vmem:[#allocation2 + $0x10] sm:$0xff] %v808_v36  ;;  %v809_v19 = vadd.f32 %v777_v35, %v687_v37  ;;  %v799_v37 = vld [vmem:[#allocation2 + $0xc8] sm:$0xff] }
 0x190   : > { %v691_v39 = vpop.f32.mrf.mxu0 }
 0x191   : > { %842 = vst.msk [vmem:[#allocation2 + $0x18] sm:$0xff] %vm839_vm1, %v809_v19  ;;  %v810_v41 = vadd.f32 %v778_v38, %v691_v39  ;;  %v800_v39 = vld [vmem:[#allocation2 + $0xd0] sm:$0xff] }
 0x192   : > { %v693_v42 = vpop.f32.mrf.mxu0 }
 0x193   : > { %843 = vst [vmem:[#allocation2 + $0x20] sm:$0xff] %v810_v41  ;;  %v811_v44 = vadd.f32 %v779_v40, %v693_v42  ;;  %v801_v42 = vld [vmem:[#allocation2 + $0xd8] sm:$0xff] }
 0x194   : > { %v697_v45 = vpop.f32.mrf.mxu0 }
 0x195   : > { %844 = vst.msk [vmem:[#allocation2 + $0x28] sm:$0xff] %vm839_vm1, %v811_v44  ;;  %v812_v47 = vadd.f32 %v780_v43, %v697_v45  ;;  %v802_v45 = vld [vmem:[#allocation2 + $0xe0] sm:$0xff] }
 0x196   : > { %v699_v48 = vpop.f32.mrf.mxu0 }
 0x197   : > { %845 = vst [vmem:[#allocation2 + $0x30] sm:$0xff] %v812_v47  ;;  %v813_v50 = vadd.f32 %v781_v46, %v699_v48  ;;  %v803_v48 = vld [vmem:[#allocation2 + $0xe8] sm:$0xff] }
 0x198   : > { %v703_v51 = vpop.f32.mrf.mxu0 }
 0x199   : > { %846 = vst.msk [vmem:[#allocation2 + $0x38] sm:$0xff] %vm839_vm1, %v813_v50  ;;  %v814_v53 = vadd.f32 %v782_v49, %v703_v51  ;;  %v804_v51 = vld [vmem:[#allocation2 + $0xf0] sm:$0xff] }
 0x19a   : > { %v705_v54 = vpop.f32.mrf.mxu0 }
 0x19b   : > { %847 = vst [vmem:[#allocation2 + $0x40] sm:$0xff] %v814_v53  ;;  %v815_v56 = vadd.f32 %v783_v52, %v705_v54  ;;  %v805_v54 = vld [vmem:[#allocation2 + $0xf8] sm:$0xff] }
 0x19c   : > { %v709_v57 = vpop.f32.mrf.mxu0 }
 0x19d   : > { %848 = vst.msk [vmem:[#allocation2 + $0x48] sm:$0xff] %vm839_vm1, %v815_v56  ;;  %v816_v59 = vadd.f32 %v784_v55, %v709_v57 }
 0x19e   : > { %v711_v60 = vpop.f32.mrf.mxu0 }
 0x19f   : > { %849 = vst [vmem:[#allocation2 + $0x50] sm:$0xff] %v816_v59  ;;  %v817_v62 = vadd.f32 %v785_v58, %v711_v60 }
 0x1a0   : > { %v715_v63 = vpop.f32.mrf.mxu0 }
 0x1a1   : > { %850 = vst.msk [vmem:[#allocation2 + $0x58] sm:$0xff] %vm839_vm1, %v817_v62  ;;  %v818_v1 = vadd.f32 %v786_v61, %v715_v63 }
 0x1a2   : > { %v717_v2 = vpop.f32.mrf.mxu0 }
 0x1a3   : > { %851 = vst [vmem:[#allocation2 + $0x60] sm:$0xff] %v818_v1  ;;  %v819_v4 = vadd.f32 %v787_v0, %v717_v2 }
 0x1a4   : > { %v721_v5 = vpop.f32.mrf.mxu0 }
 0x1a5   : > { %852 = vst.msk [vmem:[#allocation2 + $0x68] sm:$0xff] %vm839_vm1, %v819_v4  ;;  %v820_v7 = vadd.f32 %v788_v3, %v721_v5 }
 0x1a6   : > { %v723_v8 = vpop.f32.mrf.mxu0 }
 0x1a7   : > { %853 = vst [vmem:[#allocation2 + $0x70] sm:$0xff] %v820_v7  ;;  %v821_v10 = vadd.f32 %v789_v6, %v723_v8 }
 0x1a8   : > { %v727_v11 = vpop.f32.mrf.mxu1 }
 0x1a9   : > { %854 = vst.msk [vmem:[#allocation2 + $0x78] sm:$0xff] %vm839_vm1, %v821_v10  ;;  %v822_v13 = vadd.f32 %v790_v9, %v727_v11 }
 0x1aa   : > { %v729_v14 = vpop.f32.mrf.mxu1 }
 0x1ab   : > { %855 = vst [vmem:[#allocation2 + $0x80] sm:$0xff] %v822_v13  ;;  %v823_v16 = vadd.f32 %v791_v12, %v729_v14 }
 0x1ac   : > { %v733_v17 = vpop.f32.mrf.mxu1 }
 0x1ad   : > { %856 = vst.msk [vmem:[#allocation2 + $0x88] sm:$0xff] %vm839_vm1, %v823_v16  ;;  %v824_v20 = vadd.f32 %v792_v15, %v733_v17 }
 0x1ae   : > { %v735_v21 = vpop.f32.mrf.mxu1 }
 0x1af   : > { %857 = vst [vmem:[#allocation2 + $0x90] sm:$0xff] %v824_v20  ;;  %v825_v23 = vadd.f32 %v793_v18, %v735_v21 }
 0x1b0   : > { %v739_v24 = vpop.f32.mrf.mxu1 }
 0x1b1   : > { %858 = vst.msk [vmem:[#allocation2 + $0x98] sm:$0xff] %vm839_vm1, %v825_v23  ;;  %v826_v26 = vadd.f32 %v794_v22, %v739_v24 }
 0x1b2   : > { %v741_v27 = vpop.f32.mrf.mxu1 }
 0x1b3   : > { %859 = vst [vmem:[#allocation2 + $0xa0] sm:$0xff] %v826_v26  ;;  %v827_v29 = vadd.f32 %v795_v25, %v741_v27 }
 0x1b4   : > { %v745_v30 = vpop.f32.mrf.mxu1 }
 0x1b5   : > { %860 = vst.msk [vmem:[#allocation2 + $0xa8] sm:$0xff] %vm839_vm1, %v827_v29  ;;  %v828_v32 = vadd.f32 %v796_v28, %v745_v30 }
 0x1b6   : > { %v747_v33 = vpop.f32.mrf.mxu1 }
 0x1b7   : > { %861 = vst [vmem:[#allocation2 + $0xb0] sm:$0xff] %v828_v32  ;;  %v829_v35 = vadd.f32 %v797_v31, %v747_v33 }
 0x1b8   : > { %v751_v36 = vpop.f32.mrf.mxu1 }
 0x1b9   : > { %862 = vst.msk [vmem:[#allocation2 + $0xb8] sm:$0xff] %vm839_vm1, %v829_v35  ;;  %v830_v38 = vadd.f32 %v798_v34, %v751_v36 }
 0x1ba   : > { %v753_v19 = vpop.f32.mrf.mxu1 }
 0x1bb   : > { %863 = vst [vmem:[#allocation2 + $0xc0] sm:$0xff] %v830_v38  ;;  %v831_v40 = vadd.f32 %v799_v37, %v753_v19 }
 0x1bc   : > { %v757_v41 = vpop.f32.mrf.mxu1 }
 0x1bd   : > { %864 = vst.msk [vmem:[#allocation2 + $0xc8] sm:$0xff] %vm839_vm1, %v831_v40  ;;  %v832_v43 = vadd.f32 %v800_v39, %v757_v41 }
 0x1be   : > { %v759_v44 = vpop.f32.mrf.mxu1 }
 0x1bf   : > { %865 = vst [vmem:[#allocation2 + $0xd0] sm:$0xff] %v832_v43  ;;  %v833_v46 = vadd.f32 %v801_v42, %v759_v44 }
 0x1c0   : > { %v763_v47 = vpop.f32.mrf.mxu1 }
 0x1c1   : > { %866 = vst.msk [vmem:[#allocation2 + $0xd8] sm:$0xff] %vm839_vm1, %v833_v46  ;;  %v834_v49 = vadd.f32 %v802_v45, %v763_v47 }
 0x1c2   : > { %v765_v50 = vpop.f32.mrf.mxu1 }
 0x1c3   : > { %867 = vst [vmem:[#allocation2 + $0xe0] sm:$0xff] %v834_v49  ;;  %v835_v52 = vadd.f32 %v803_v48, %v765_v50 }
 0x1c4   : > { %v769_v53 = vpop.f32.mrf.mxu1 }
 0x1c5   : > { %868 = vst.msk [vmem:[#allocation2 + $0xe8] sm:$0xff] %vm839_vm1, %v835_v52  ;;  %v836_v55 = vadd.f32 %v804_v51, %v769_v53  ;;  %874 = sbr.rel (%p1998_p13) target bundleno = 1557 (0x615), region = 105 }
 0x1c6   : > { %v771_v56 = vpop.f32.mrf.mxu1 }
 0x1c7   : > { %869 = vst [vmem:[#allocation2 + $0xf0] sm:$0xff] %v836_v55  ;;  %v837_v57 = vadd.f32 %v805_v54, %v771_v56 }
 0x1c9   : > { %870 = vst.msk [vmem:[#allocation2 + $0xf8] sm:$0xff] %vm839_vm1, %v837_v57 }
 0x1ca   : > { %v971_v58 = vld [vmem:[%s3286_s3] sm:$0xf]  ;;  %vm1020_vm2 = vcmask 1043456   ;;  %v876_v59 = vld [vmem:[#allocation2 + $0x8] sm:$0xff]  ;;  %v878_v60 = vld [vmem:[#allocation2 + $0x18] sm:$0xff] }
 0x1cb   : > { %2113 = vmatprep.subr.msk.mxu0 %vm1020_vm2, %v971_v58  ;;  %vm907_vm3 = vcmp.gt.f32.partialorder %v876_v59, 0.0  ;;  %vm908_vm4 = vcmp.gt.f32.partialorder %v878_v60, 0.0  ;;  %v880_v61 = vld [vmem:[#allocation2 + $0x28] sm:$0xff]  ;;  %v2709_v62 = vld [vmem:[#allocation2 + $0x38] sm:$0xff] }
 0x1cc   : > { %v2711_v63 = vld [vmem:[#allocation2 + $0x48] sm:$0xff]  ;;  %2114 = vmatpush3.msk.msra.mxu0 %vm1020_vm2, %v971_v58  ;;  %v923_v0 = vsel %vm907_vm3, %v876_v59, 1.0  ;;  %v924_v1 = vsel %vm908_vm4, %v878_v60, 1.0  ;;  %vm909_vm5 = vcmp.gt.f32.partialorder %v880_v61, 0.0  ;;  %vm910_vm6 = vcmp.gt.f32.partialorder %v2709_v62, 0.0  ;;  %v2716_v2 = vld [vmem:[#allocation2 + $0x58] sm:$0xff] }
 0x1cd   : > { %v2718_v3 = vld [vmem:[#allocation2 + $0x68] sm:$0xff]  ;;  %2317 = vrcp.f32 %v923_v0  ;;  %v925_v4 = vsel %vm909_vm5, %v880_v61, 1.0  ;;  %v926_v5 = vsel %vm910_vm6, %v2709_v62, 1.0  ;;  %vm911_vm7 = vcmp.gt.f32.partialorder %v2711_v63, 0.0  ;;  %v2725_v6 = vld [vmem:[#allocation2 + $0x78] sm:$0xff]  ;;  %v875_v60 = vld [vmem:[#allocation2] sm:$0xff] }
 0x1ce   : > { %2319 = vrcp.f32 %v924_v1  ;;  %v927_v7 = vsel %vm911_vm7, %v2711_v63, 1.0  ;;  %vm912_vm8 = vcmp.gt.f32.partialorder %v2716_v2, 0.0  ;;  %vm913_vm9 = vcmp.gt.f32.partialorder %v2718_v3, 0.0  ;;  %v2732_v8 = vld [vmem:[#allocation2 + $0x88] sm:$0xff]  ;;  %v2742_v11 = vld [vmem:[#allocation2 + $0x98] sm:$0xff] }
 0x1cf   : > { %2321 = vrcp.f32 %v925_v4  ;;  %v928_v9 = vsel %vm912_vm8, %v2716_v2, 1.0  ;;  %v929_v10 = vsel %vm913_vm9, %v2718_v3, 1.0  ;;  %vm914_vm10 = vcmp.gt.f32.partialorder %v2725_v6, 0.0  ;;  %v2744_v12 = vld [vmem:[#allocation2 + $0xa8] sm:$0xff]  ;;  %v898_v15 = vld [vmem:[#allocation2 + $0xb8] sm:$0xff] }
 0x1d0   : > { %2323 = vrcp.f32 %v926_v5  ;;  %vm915_vm11 = vcmp.gt.f32.partialorder %v2732_v8, 0.0  ;;  %v930_v13 = vsel %vm914_vm10, %v2725_v6, 1.0  ;;  %vm916_vm12 = vcmp.gt.f32.partialorder %v2742_v11, 0.0  ;;  %v900_v16 = vld [vmem:[#allocation2 + $0xc8] sm:$0xff]  ;;  %v902_v20 = vld [vmem:[#allocation2 + $0xd8] sm:$0xff]  ;;  %v889_v5 = vld [vmem:[#allocation2 + $0x70] sm:$0xff] }
 0x1d1   : > { %2325 = vrcp.f32 %v927_v7  ;;  %v931_v14 = vsel %vm915_vm11, %v2732_v8, 1.0  ;;  %vm917_vm13 = vcmp.gt.f32.partialorder %v2744_v12, 0.0  ;;  %v932_v17 = vsel %vm916_vm12, %v2742_v11, 1.0  ;;  %v904_v22 = vld [vmem:[#allocation2 + $0xe8] sm:$0xff]  ;;  %v906_v31 = vld [vmem:[#allocation2 + $0xf8] sm:$0xff]  ;;  %v887_v7 = vld [vmem:[#allocation2 + $0x60] sm:$0xff] }
 0x1d2   : > { %2327 = vrcp.f32 %v928_v9  ;;  %v933_v18 = vsel %vm917_vm13, %v2744_v12, 1.0  ;;  %vm918_vm14 = vcmp.gt.f32.partialorder %v898_v15, 0.0  ;;  %vm919_vm15 = vcmp.gt.f32.partialorder %v900_v16, 0.0  ;;  %v2808_v0 = vld [vmem:[%s3285_s2] ss:$0 sm:$0xff] }
 0x1d3   : > { %2329 = vrcp.f32 %v929_v10  ;;  %v934_v25 = vsel %vm918_vm14, %v898_v15, 1.0  ;;  %v935_v28 = vsel %vm919_vm15, %v900_v16, 1.0  ;;  %vm920_vm0 = vcmp.gt.f32.partialorder %v902_v20, 0.0  ;;  %v893_v10 = vld [vmem:[#allocation2 + $0x90] sm:$0xff]  ;;  %v891_v15 = vld [vmem:[#allocation2 + $0x80] sm:$0xff] }
 0x1d4   : > { %2331 = vrcp.f32 %v930_v13  ;;  %vm921_vm2 = vcmp.gt.f32.partialorder %v904_v22, 0.0  ;;  %v936_v36 = vsel %vm920_vm0, %v902_v20, 1.0  ;;  %v877_v13 = vld [vmem:[#allocation2 + $0x10] sm:$0xff] }
 0x1d5   : > { %2333 = vrcp.f32 %v931_v14  ;;  %v937_v38 = vsel %vm921_vm2, %v904_v22, 1.0 }
 0x1d6   : > { %2335 = vrcp.f32 %v932_v17 }
 0x1d7   : > { %2337 = vrcp.f32 %v933_v18  ;;  %v897_v18 = vld [vmem:[#allocation2 + $0xb0] sm:$0xff] }
 0x1d8   : > { %2339 = vrcp.f32 %v934_v25 }
 0x1d9   : > { %2341 = vrcp.f32 %v935_v28  ;;  %v895_v28 = vld [vmem:[#allocation2 + $0xa0] sm:$0xff] }
 0x1da   : > { %v2318_v21 = vpop.eup %2317  ;;  %2343 = vrcp.f32 %v936_v36  ;;  %v901_v36 = vld [vmem:[#allocation2 + $0xd0] sm:$0xff] }
 0x1db   : > { %v2320_v23 = vpop.eup %2319  ;;  %v955_v24 = vsel %vm907_vm3, %v2318_v21, 0.0  ;;  %vm922_vm3 = vcmp.gt.f32.partialorder %v906_v31, 0.0  ;;  %2345 = vrcp.f32 %v937_v38 }
 0x1dc   : > { %v2322_v26 = vpop.eup %2321  ;;  %2115 = vmatprep.mubr.msk.f32.mxu0 %vm839_vm1, %v955_v24  ;;  %v956_v27 = vsel %vm908_vm4, %v2320_v23, 0.0  ;;  %v938_v41 = vsel %vm922_vm3, %v906_v31, 1.0  ;;  %v879_v24 = vld [vmem:[#allocation2 + $0x20] sm:$0xff] }
 0x1dd   : > { %v2324_v29 = vpop.eup %2323  ;;  %2116 = vmatmul.mubr.msk.f32.vlgmr.msra.gmra.mxu0 %vm839_vm1, %v956_v27  ;;  %v957_v30 = vsel %vm909_vm5, %v2322_v26, 0.0  ;;  %2347 = vrcp.f32 %v938_v41 }
 0x1de   : > { %v2326_v32 = vpop.eup %2325  ;;  %2118 = vmatprep.mubr.msk.f32.mxu0 %vm839_vm1, %v957_v30  ;;  %v958_v33 = vsel %vm910_vm6, %v2324_v29, 0.0 }
 0x1df   : > { %v2328_v34 = vpop.eup %2327  ;;  %v959_v35 = vsel %vm911_vm7, %v2326_v32, 0.0  ;;  %v881_v32 = vld [vmem:[#allocation2 + $0x30] sm:$0xff] }
 0x1e0   : > { %v2330_v37 = vpop.eup %2329  ;;  %v960_v19 = vsel %vm912_vm8, %v2328_v34, 0.0 }
 0x1e1   : > { %2119 = vmatmul.mubr.msk.f32.gmra.mxu0 %vm839_vm1, %v958_v33  ;;  %v2332_v39 = vpop.eup %2331  ;;  %v961_v40 = vsel %vm913_vm9, %v2330_v37, 0.0 }
 0x1e2   : > { %2121 = vmatprep.mubr.msk.f32.mxu0 %vm839_vm1, %v959_v35  ;;  %v2334_v42 = vpop.eup %2333  ;;  %v962_v43 = vsel %vm914_vm10, %v2332_v39, 0.0  ;;  %v883_v39 = vld [vmem:[#allocation2 + $0x40] sm:$0xff] }
 0x1e3   : > { %v2336_v44 = vpop.eup %2335  ;;  %v963_v45 = vsel %vm915_vm11, %v2334_v42, 0.0  ;;  %v899_v42 = vld [vmem:[#allocation2 + $0xc0] sm:$0xff] }
 0x1e4   : > { %v2338_v46 = vpop.eup %2337  ;;  %v964_v47 = vsel %vm916_vm12, %v2336_v44, 0.0 }
 0x1e5   : > { %2122 = vmatmul.mubr.msk.f32.gmra.mxu0 %vm839_vm1, %v960_v19  ;;  %v2340_v48 = vpop.eup %2339  ;;  %v965_v49 = vsel %vm917_vm13, %v2338_v46, 0.0  ;;  %v885_v46 = vld [vmem:[#allocation2 + $0x50] sm:$0xff] }
 0x1e6   : > { %2124 = vmatprep.mubr.msk.f32.mxu0 %vm839_vm1, %v961_v40  ;;  %v2342_v50 = vpop.eup %2341  ;;  %v966_v51 = vsel %vm918_vm14, %v2340_v48, 0.0 }
 0x1e7   : > { %v2344_v52 = vpop.eup %2343  ;;  %v967_v53 = vsel %vm919_vm15, %v2342_v50, 0.0 }
 0x1e8   : > { %v2346_v54 = vpop.eup %2345  ;;  %v968_v55 = vsel %vm920_vm0, %v2344_v52, 0.0 }
 0x1e9   : > { %2125 = vmatmul.mubr.msk.f32.gmra.mxu0 %vm839_vm1, %v962_v43  ;;  %v969_v57 = vsel %vm921_vm2, %v2346_v54, 0.0 }
 0x1ea   : > { %2127 = vmatprep.mubr.msk.f32.mxu0 %vm839_vm1, %v963_v45  ;;  %v2348_v56 = vpop.eup %2347 }
 0x1eb   : > { %v970_v58 = vsel %vm922_vm3, %v2348_v56, 0.0 }
 0x1ed   : > { %2128 = vmatmul.mubr.msk.f32.gmra.mxu0 %vm839_vm1, %v964_v47 }
 0x1ee   : > { %2130 = vmatprep.mubr.msk.f32.mxu0 %vm839_vm1, %v965_v49  ;;  %v903_v49 = vld [vmem:[#allocation2 + $0xe0] sm:$0xff] }
 0x1f1   : > { %2131 = vmatmul.mubr.msk.f32.gmra.mxu0 %vm839_vm1, %v966_v51 }
 0x1f2   : > { %2133 = vmatprep.mubr.msk.f32.mxu0 %vm839_vm1, %v967_v53 }
 0x1f5   : > { %2134 = vmatmul.mubr.msk.f32.gmra.mxu0 %vm839_vm1, %v968_v55  ;;  %v905_v55 = vld [vmem:[#allocation2 + $0xf0] sm:$0xff] }
 0x1f6   : > { %2136 = vmatprep.mubr.msk.f32.mxu0 %vm839_vm1, %v969_v57 }
 0x1f9   : > { %2137 = vmatmul.mubr.msk.f32.gmra.mxu0 %vm839_vm1, %v970_v58 }
 0x29d   : > { %v2117_v59 = vpop.f32.mrf.mxu0 }
 0x29e   : > { %v1170_v20 = vmul.f32 %v2117_v59, %v877_v13 }
 0x29f   : > { %v1090_v61 = vpop.f32.mrf.mxu0 }
 0x2a0   : > { %v1169_v62 = vmul.f32 %v1090_v61, %v875_v60  ;;  %v1193_v31 = vadd.f32 %v2808_v0, %v1170_v20 }
 0x2a1   : > { %v2120_v63 = vpop.f32.mrf.mxu0 }
 0x2a2   : > { %v2811_v1 = vadd.f32 %v2808_v0, %v1169_v62  ;;  %v1172_v38 = vmul.f32 %v2120_v63, %v881_v32 }
 0x2a3   : > { %v1100_v2 = vpop.f32.mrf.mxu0 }
 0x2a4   : > { %1228 = vadd.xlane.f32.xlu0 %v2811_v1  ;;  %v1171_v30 = vmul.f32 %v1100_v2, %v879_v24  ;;  %v2835_v45 = vadd.f32 %v2808_v0, %v1172_v38 }
 0x2a5   : > { %v2123_v3 = vpop.f32.mrf.mxu0 }
 0x2a6   : > { %v2830_v19 = vadd.f32 %v2808_v0, %v1171_v30  ;;  %v1174_v51 = vmul.f32 %v2123_v3, %v885_v46 }
 0x2a7   : > { %v1110_v4 = vpop.f32.mrf.mxu0 }
 0x2a8   : > { %v1173_v44 = vmul.f32 %v1110_v4, %v883_v39  ;;  %v2847_v56 = vadd.f32 %v2808_v0, %v1174_v51 }
 0x2a9   : > { %v2126_v6 = vpop.f32.mrf.mxu0 }
 0x2aa   : > { %v1176_v8 = vmul.f32 %v2126_v6, %v889_v5  ;;  %v2840_v52 = vadd.f32 %v2808_v0, %v1173_v44 }
 0x2ab   : > { %v1120_v9 = vpop.f32.mrf.mxu0 }
 0x2ac   : > { %v1175_v11 = vmul.f32 %v1120_v9, %v887_v7  ;;  %v2815_v12 = vadd.f32 %v2808_v0, %v1176_v8 }
 0x2ad   : > { %v2129_v14 = vpop.f32.mrf.mxu0 }
 0x2ae   : > { %v1178_v16 = vmul.f32 %v2129_v14, %v893_v10  ;;  %1242 = vadd.xlane.f32.xlu0 %v2815_v12  ;;  %v2820_v23 = vadd.f32 %v2808_v0, %v1175_v11 }
 0x2af   : > { %v1130_v17 = vpop.f32.mrf.mxu0 }
 0x2b0   : > { %v1177_v21 = vmul.f32 %v1130_v17, %v891_v15  ;;  %v1201_v22 = vadd.f32 %v2808_v0, %v1178_v16 }
 0x2b1   : > { %v2132_v25 = vpop.f32.mrf.mxu0 }
 0x2b2   : > { %1246 = vadd.xlane.f32.xlu1 %v1201_v22  ;;  %1240 = vadd.xlane.f32.xlu0 %v2820_v23  ;;  %v1180_v26 = vmul.f32 %v2132_v25, %v897_v18  ;;  %v2824_v27 = vadd.f32 %v2808_v0, %v1177_v21 }
 0x2b3   : > { %v1140_v29 = vpop.f32.mrf.mxu0 }
 0x2b4   : > { %v1179_v34 = vmul.f32 %v1140_v29, %v895_v28  ;;  %v1203_v35 = vadd.f32 %v2808_v0, %v1180_v26 }
 0x2b5   : > { %v2135_v33 = vpop.f32.mrf.mxu0 }
 0x2b6   : > { %1244 = vadd.xlane.f32.xlu1 %v2824_v27  ;;  %1230 = vadd.xlane.f32.xlu0 %v1193_v31  ;;  %v1182_v40 = vmul.f32 %v2135_v33, %v901_v36  ;;  %v1202_v41 = vadd.f32 %v2808_v0, %v1179_v34  ;;  %v1227_v34 = vld [vmem:[%s3287_s4 + $0x78] sm:$0xff] }
 0x2b7   : > { %v1150_v37 = vpop.f32.mrf.mxu0  ;;  %2139 = vmatprep.subr.mxu0 %v1227_v34  ;;  %2227 = vmatprep.subr.mxu1 %v1227_v34 }
 0x2b8   : > { %v1181_v47 = vmul.f32 %v1150_v37, %v899_v42  ;;  %v1205_v48 = vadd.f32 %v2808_v0, %v1182_v40  ;;  %2140 = vmatpush3.msra.mxu0 %v1227_v34  ;;  %2243 = vmatpush3.msra.mxu1 %v1227_v34 }
 0x2b9   : > { %v2138_v43 = vpop.f32.mrf.mxu0 }
 0x2ba   : > { %1250 = vadd.xlane.f32.xlu1 %v1203_v35  ;;  %1232 = vadd.xlane.f32.xlu0 %v2830_v19  ;;  %v2844_v54 = vadd.f32 %v2808_v0, %v1181_v47  ;;  %v1184_v57 = vmul.f32 %v2138_v43, %v905_v55  ;;  %v1225_v43 = vld [vmem:[%s3287_s4 + $0x68] sm:$0xff] }
 0x2bb   : > { %v1160_v50 = vpop.f32.mrf.mxu0 }
 0x2bc   : > { %v1183_v53 = vmul.f32 %v1160_v50, %v903_v49  ;;  %v2856_v59 = vadd.f32 %v2808_v0, %v1184_v57 }
 0x2be   : > { %1248 = vadd.xlane.f32.xlu1 %v1202_v41  ;;  %1234 = vadd.xlane.f32.xlu0 %v2835_v45  ;;  %v2852_v58 = vadd.f32 %v2808_v0, %v1183_v53 }
 0x2c2   : > { %1254 = vadd.xlane.f32.xlu1 %v1205_v48  ;;  %1236 = vadd.xlane.f32.xlu0 %v2840_v52 }
 0x2c6   : > { %1252 = vadd.xlane.f32.xlu1 %v2844_v54  ;;  %1238 = vadd.xlane.f32.xlu0 %v2847_v56 }
 0x2ca   : > { %1256 = vadd.xlane.f32.xlu1 %v2852_v58 }
 0x2ce   : > { %1258 = vadd.xlane.f32.xlu1 %v2856_v59 }
 0x32d   : > { %v1229_v60 = vpop.xlane.xlu0 %1228 }
 0x32e   : > { %v1261_v8 = vmul.f32 0.0078125, %v1229_v60 }
 0x330   : > { %v2871_v15 = vsub.f32 %v2811_v1, %v1261_v8  ;;  %v1218_v8 = vld [vmem:[%s3287_s4 + $0x30] sm:$0xff] }
 0x332   : > { %v1293_v1 = vmul.f32 %v2871_v15, %v2871_v15 }
 0x337   : > { %v1243_v61 = vpop.xlane.xlu0 %1242 }
 0x338   : > { %v1268_v62 = vmul.f32 0.0078125, %v1243_v61 }
 0x33a   : > { %v2860_v63 = vsub.f32 %v2815_v12, %v1268_v62 }
 0x33b   : > { %v1247_v2 = vpop.xlane.xlu1 %1246  ;;  %v1241_v3 = vpop.xlane.xlu0 %1240 }
 0x33c   : > { %v1270_v4 = vmul.f32 0.0078125, %v1247_v2  ;;  %v1300_v5 = vmul.f32 %v2860_v63, %v2860_v63  ;;  %v1267_v12 = vmul.f32 0.0078125, %v1241_v3 }
 0x33e   : > { %v2864_v6 = vsub.f32 %v1201_v22, %v1270_v4  ;;  %1323 = vadd.xlane.f32.xlu1 %v1300_v5  ;;  %v2878_v20 = vsub.f32 %v2820_v23, %v1267_v12  ;;  %v1215_v12 = vld [vmem:[%s3287_s4 + $0x18] sm:$0xff] }
 0x33f   : > { %v1245_v7 = vpop.xlane.xlu1 %1244  ;;  %v1231_v0 = vpop.xlane.xlu0 %1230 }
 0x340   : > { %v1262_v9 = vmul.f32 0.0078125, %v1231_v0  ;;  %v1302_v10 = vmul.f32 %v2864_v6, %v2864_v6  ;;  %v1269_v22 = vmul.f32 0.0078125, %v1245_v7  ;;  %v1299_v30 = vmul.f32 %v2878_v20, %v2878_v20 }
 0x342   : > { %v2868_v11 = vsub.f32 %v1193_v31, %v1262_v9  ;;  %1327 = vadd.xlane.f32.xlu1 %v1302_v10  ;;  %v2889_v23 = vsub.f32 %v2824_v27, %v1269_v22  ;;  %v1226_v27 = vld [vmem:[%s3287_s4 + $0x70] sm:$0xff]  ;;  %v1217_v9 = vld [vmem:[%s3287_s4 + $0x28] sm:$0xff]  ;;  %v1216_v10 = vld [vmem:[%s3287_s4 + $0x20] sm:$0xff] }
 0x343   : > { %v1251_v13 = vpop.xlane.xlu1 %1250  ;;  %v1233_v14 = vpop.xlane.xlu0 %1232  ;;  %2141 = vmatprep.subr.mxu0 %v1226_v27  ;;  %2228 = vmatprep.subr.mxu1 %v1226_v27 }
 0x344   : > { %v1272_v16 = vmul.f32 0.0078125, %v1251_v13  ;;  %v1294_v17 = vmul.f32 %v2868_v11, %v2868_v11  ;;  %v1263_v31 = vmul.f32 0.0078125, %v1233_v14  ;;  %v1301_v42 = vmul.f32 %v2889_v23, %v2889_v23  ;;  %2142 = vmatpush3.msra.mxu0 %v1226_v27  ;;  %2244 = vmatpush3.msra.mxu1 %v1226_v27  ;;  %v1214_v13 = vld [vmem:[%s3287_s4 + $0x10] sm:$0xff]  ;;  %v1213_v14 = vld [vmem:[%s3287_s4 + $0x8] sm:$0xff] }
 0x345   : > { %2143 = vmatprep.subr.mxu0 %v1225_v43  ;;  %2229 = vmatprep.subr.mxu1 %v1225_v43 }
 0x346   : > { %v2875_v18 = vsub.f32 %v1203_v35, %v1272_v16  ;;  %1311 = vadd.xlane.f32.xlu0 %v1294_v17  ;;  %v2902_v39 = vsub.f32 %v2830_v19, %v1263_v31  ;;  %v1224_v19 = vld [vmem:[%s3287_s4 + $0x60] sm:$0xff]  ;;  %2144 = vmatpush3.msra.mxu0 %v1225_v43 }
 0x347   : > { %v1249_v21 = vpop.xlane.xlu1 %1248  ;;  %v1235_v26 = vpop.xlane.xlu0 %1234  ;;  %2245 = vmatpush3.msra.mxu1 %v1225_v43  ;;  %2145 = vmatprep.subr.mxu0 %v1224_v19  ;;  %v1212_v16 = vld [vmem:[%s3287_s4] sm:$0xff] }
 0x348   : > { %v1271_v24 = vmul.f32 0.0078125, %v1249_v21  ;;  %v1304_v25 = vmul.f32 %v2875_v18, %v2875_v18  ;;  %v1264_v36 = vmul.f32 0.0078125, %v1235_v26  ;;  %v1295_v51 = vmul.f32 %v2902_v39, %v2902_v39  ;;  %2230 = vmatprep.subr.mxu1 %v1224_v19  ;;  %2146 = vmatpush3.msra.mxu0 %v1224_v19 }
 0x349   : > { %2246 = vmatpush3.msra.mxu1 %v1224_v19 }
 0x34a   : > { %v2884_v28 = vsub.f32 %v1202_v41, %v1271_v24  ;;  %1331 = vadd.xlane.f32.xlu1 %v1304_v25  ;;  %1309 = vadd.xlane.f32.xlu0 %v1293_v1  ;;  %v2918_v46 = vsub.f32 %v2835_v45, %v1264_v36  ;;  %v1223_v45 = vld [vmem:[%s3287_s4 + $0x58] sm:$0xff] }
 0x34b   : > { %v1255_v29 = vpop.xlane.xlu1 %1254  ;;  %v1237_v37 = vpop.xlane.xlu0 %1236  ;;  %2147 = vmatprep.subr.mxu0 %v1223_v45  ;;  %2231 = vmatprep.subr.mxu1 %v1223_v45 }
 0x34c   : > { %v1274_v32 = vmul.f32 0.0078125, %v1255_v29  ;;  %v1303_v33 = vmul.f32 %v2884_v28, %v2884_v28  ;;  %v1296_v57 = vmul.f32 %v2918_v46, %v2918_v46  ;;  %2148 = vmatpush3.msra.mxu0 %v1223_v45  ;;  %2247 = vmatpush3.msra.mxu1 %v1223_v45 }
 0x34e   : > { %v2896_v35 = vsub.f32 %v1205_v48, %v1274_v32  ;;  %1329 = vadd.xlane.f32.xlu1 %v1303_v33  ;;  %1321 = vadd.xlane.f32.xlu0 %v1299_v30  ;;  %v1265_v48 = vmul.f32 0.0078125, %v1237_v37 }
 0x34f   : > { %v1253_v38 = vpop.xlane.xlu1 %1252  ;;  %v1239_v53 = vpop.xlane.xlu0 %1238 }
 0x350   : > { %v1273_v40 = vmul.f32 0.0078125, %v1253_v38  ;;  %v1306_v41 = vmul.f32 %v2896_v35, %v2896_v35  ;;  %v2933_v60 = vsub.f32 %v2840_v52, %v1265_v48  ;;  %v1266_v61 = vmul.f32 0.0078125, %v1239_v53  ;;  %v1221_v52 = vld [vmem:[%s3287_s4 + $0x48] sm:$0xff] }
 0x352   : > { %v2912_v44 = vsub.f32 %v2844_v54, %v1273_v40  ;;  %1335 = vadd.xlane.f32.xlu1 %v1306_v41  ;;  %1325 = vadd.xlane.f32.xlu0 %v1301_v42  ;;  %v2947_v4 = vsub.f32 %v2847_v56, %v1266_v61  ;;  %v1297_v7 = vmul.f32 %v2933_v60, %v2933_v60  ;;  %v1219_v56 = vld [vmem:[%s3287_s4 + $0x38] sm:$0xff] }
 0x353   : > { %v1257_v47 = vpop.xlane.xlu1 %1256 }
 0x354   : > { %v1275_v49 = vmul.f32 0.0078125, %v1257_v47  ;;  %v1305_v50 = vmul.f32 %v2912_v44, %v2912_v44  ;;  %v1298_v0 = vmul.f32 %v2947_v4, %v2947_v4 }
 0x356   : > { %v2928_v54 = vsub.f32 %v2852_v58, %v1275_v49  ;;  %1333 = vadd.xlane.f32.xlu1 %v1305_v50  ;;  %1313 = vadd.xlane.f32.xlu0 %v1295_v51  ;;  %v1222_v58 = vld [vmem:[%s3287_s4 + $0x50] sm:$0xff] }
 0x357   : > { %v1259_v55 = vpop.xlane.xlu1 %1258  ;;  %2149 = vmatprep.subr.mxu0 %v1222_v58  ;;  %2232 = vmatprep.subr.mxu1 %v1222_v58 }
 0x358   : > { %v1276_v62 = vmul.f32 0.0078125, %v1259_v55  ;;  %v1307_v2 = vmul.f32 %v2928_v54, %v2928_v54  ;;  %2150 = vmatpush3.msra.mxu0 %v1222_v58  ;;  %2248 = vmatpush3.msra.mxu1 %v1222_v58 }
 0x359   : > { %2151 = vmatprep.subr.mxu0 %v1221_v52  ;;  %2233 = vmatprep.subr.mxu1 %v1221_v52 }
 0x35a   : > { %v2941_v3 = vsub.f32 %v2856_v59, %v1276_v62  ;;  %1337 = vadd.xlane.f32.xlu1 %v1307_v2  ;;  %1315 = vadd.xlane.f32.xlu0 %v1296_v57  ;;  %v1220_v59 = vld [vmem:[%s3287_s4 + $0x40] sm:$0xff] }
 0x35b   : > { %2152 = vmatpush3.msra.mxu0 %v1221_v52  ;;  %2249 = vmatpush3.msra.mxu1 %v1221_v52 }
 0x35c   : > { %v1308_v5 = vmul.f32 %v2941_v3, %v2941_v3  ;;  %2153 = vmatprep.subr.mxu0 %v1220_v59  ;;  %2234 = vmatprep.subr.mxu1 %v1220_v59 }
 0x35d   : > { %2154 = vmatpush3.msra.mxu0 %v1220_v59  ;;  %2250 = vmatpush3.msra.mxu1 %v1220_v59 }
 0x35e   : > { %1339 = vadd.xlane.f32.xlu1 %v1308_v5  ;;  %1317 = vadd.xlane.f32.xlu0 %v1297_v7 }
 0x35f   : > { %2155 = vmatprep.subr.mxu0 %v1219_v56  ;;  %2235 = vmatprep.subr.mxu1 %v1219_v56 }
 0x360   : > { %2156 = vmatpush3.msra.mxu0 %v1219_v56  ;;  %2251 = vmatpush3.msra.mxu1 %v1219_v56 }
 0x361   : > { %2157 = vmatprep.subr.mxu0 %v1218_v8  ;;  %2236 = vmatprep.subr.mxu1 %v1218_v8 }
 0x362   : > { %1319 = vadd.xlane.f32.xlu0 %v1298_v0  ;;  %2158 = vmatpush3.msra.mxu0 %v1218_v8 }
 0x363   : > { %2159 = vmatprep.subr.mxu0 %v1217_v9  ;;  %2252 = vmatpush3.msra.mxu1 %v1218_v8 }
 0x364   : > { %2160 = vmatpush3.msra.mxu0 %v1217_v9  ;;  %2237 = vmatprep.subr.mxu1 %v1217_v9 }
 0x365   : > { %2161 = vmatprep.subr.mxu0 %v1216_v10  ;;  %2253 = vmatpush3.msra.mxu1 %v1217_v9 }
 0x366   : > { %2162 = vmatpush3.msra.mxu0 %v1216_v10  ;;  %2238 = vmatprep.subr.mxu1 %v1216_v10 }
 0x367   : > { %2163 = vmatprep.subr.mxu0 %v1215_v12  ;;  %2254 = vmatpush3.msra.mxu1 %v1216_v10 }
 0x368   : > { %2164 = vmatpush3.msra.mxu0 %v1215_v12  ;;  %2239 = vmatprep.subr.mxu1 %v1215_v12 }
 0x369   : > { %2165 = vmatprep.subr.mxu0 %v1214_v13  ;;  %2255 = vmatpush3.msra.mxu1 %v1215_v12 }
 0x36a   : > { %2166 = vmatpush3.msra.mxu0 %v1214_v13  ;;  %2240 = vmatprep.subr.mxu1 %v1214_v13 }
 0x36b   : > { %2167 = vmatprep.subr.mxu0 %v1213_v14  ;;  %2256 = vmatpush3.msra.mxu1 %v1214_v13  ;;  %v2986_v13 = vld [vmem:[%s3288_s5] ss:$0 sm:$0xff] }
 0x36c   : > { %2168 = vmatpush3.msra.mxu0 %v1213_v14  ;;  %2241 = vmatprep.subr.mxu1 %v1213_v14 }
 0x36d   : > { %2169 = vmatprep.subr.mxu0 %v1212_v16  ;;  %2257 = vmatpush3.msra.mxu1 %v1213_v14 }
 0x36e   : > { %2170 = vmatpush3.msra.mxu0 %v1212_v16  ;;  %2242 = vmatprep.subr.mxu1 %v1212_v16 }
 0x36f   : > { %2258 = vmatpush3.msra.mxu1 %v1212_v16 }
 0x3c7   : > { %v1324_v17 = vpop.xlane.xlu1 %1323 }
 0x3c8   : > { %v1348_v21 = vmul.f32 0.0078125, %v1324_v17 }
 0x3ca   : > { %v1364_v26 = vadd.f32 1e-05, %v1348_v21 }
 0x3cb   : > { %v1328_v22 = vpop.xlane.xlu1 %1327 }
 0x3cc   : > { %v1350_v29 = vmul.f32 0.0078125, %v1328_v22 }
 0x3ce   : > { %v1366_v34 = vadd.f32 1e-05, %v1350_v29 }
 0x3cf   : > { %v1312_v24 = vpop.xlane.xlu0 %1311 }
 0x3d0   : > { %v1342_v25 = vmul.f32 0.0078125, %v1312_v24 }
 0x3d2   : > { %v1358_v1 = vadd.f32 1e-05, %v1342_v25 }
 0x3d3   : > { %v1332_v30 = vpop.xlane.xlu1 %1331  ;;  %v1310_v31 = vpop.xlane.xlu0 %1309 }
 0x3d4   : > { %2349 = vrsqrt.f32 %v1358_v1  ;;  %v1341_v32 = vmul.f32 0.0078125, %v1310_v31  ;;  %v1352_v37 = vmul.f32 0.0078125, %v1332_v30  ;;  %v2995_v30 = vld [vmem:[%s3289_s6] ss:$0 sm:$0xff] }
 0x3d5   : > { %2351 = vrsqrt.f32 %v1364_v26 }
 0x3d6   : > { %v1357_v33 = vadd.f32 1e-05, %v1341_v32  ;;  %v1368_v47 = vadd.f32 1e-05, %v1352_v37 }
 0x3d7   : > { %v1330_v27 = vpop.xlane.xlu1 %1329  ;;  %v1322_v36 = vpop.xlane.xlu0 %1321 }
 0x3d8   : > { %v1351_v38 = vmul.f32 0.0078125, %v1330_v27  ;;  %v1347_v40 = vmul.f32 0.0078125, %v1322_v36  ;;  %2353 = vrsqrt.f32 %v1357_v33 }
 0x3d9   : > { %2355 = vrsqrt.f32 %v1366_v34 }
 0x3da   : > { %v1367_v41 = vadd.f32 1e-05, %v1351_v38  ;;  %v1363_v42 = vadd.f32 1e-05, %v1347_v40 }
 0x3db   : > { %v1336_v43 = vpop.xlane.xlu1 %1335  ;;  %v1326_v19 = vpop.xlane.xlu0 %1325 }
 0x3dc   : > { %2357 = vrsqrt.f32 %v1367_v41  ;;  %v1354_v48 = vmul.f32 0.0078125, %v1336_v43  ;;  %v1349_v49 = vmul.f32 0.0078125, %v1326_v19 }
 0x3dd   : > { %2359 = vrsqrt.f32 %v1363_v42 }
 0x3de   : > { %v1365_v50 = vadd.f32 1e-05, %v1349_v49  ;;  %v1370_v51 = vadd.f32 1e-05, %v1354_v48  ;;  %2361 = vrsqrt.f32 %v1368_v47 }
 0x3df   : > { %v1334_v53 = vpop.xlane.xlu1 %1333  ;;  %v1314_v45 = vpop.xlane.xlu0 %1313 }
 0x3e0   : > { %v1353_v55 = vmul.f32 0.0078125, %v1334_v53  ;;  %v1343_v57 = vmul.f32 0.0078125, %v1314_v45  ;;  %2363 = vrsqrt.f32 %v1365_v50 }
 0x3e1   : > { %v2350_v61 = vpop.eup %2349  ;;  %2365 = vrsqrt.f32 %v1370_v51 }
 0x3e2   : > { %v1369_v62 = vadd.f32 1e-05, %v1353_v55  ;;  %v1359_v2 = vadd.f32 1e-05, %v1343_v57  ;;  %v2352_v5 = vpop.eup %2351  ;;  %v1390_v7 = vmul.f32 %v2350_v61, %v2868_v11 }
 0x3e3   : > { %v1338_v58 = vpop.xlane.xlu1 %1337  ;;  %v1316_v52 = vpop.xlane.xlu0 %1315  ;;  %v1396_v16 = vmul.f32 %v2352_v5, %v2860_v63 }
 0x3e4   : > { %2367 = vrsqrt.f32 %v1369_v62  ;;  %v1355_v59 = vmul.f32 0.0078125, %v1338_v58  ;;  %v1344_v56 = vmul.f32 0.0078125, %v1316_v52  ;;  %v1412_v22 = vmul.f32 %v2986_v13, %v1390_v7 }
 0x3e5   : > { %2369 = vrsqrt.f32 %v1359_v2  ;;  %v2354_v0 = vpop.eup %2353  ;;  %v1418_v32 = vmul.f32 %v2986_v13, %v1396_v16 }
 0x3e6   : > { %v1371_v8 = vadd.f32 1e-05, %v1355_v59  ;;  %v1360_v9 = vadd.f32 1e-05, %v1344_v56  ;;  %v1389_v14 = vmul.f32 %v2354_v0, %v2871_v15  ;;  %v2356_v17 = vpop.eup %2355  ;;  %v3003_v34 = vadd.f32 %v2995_v30, %v1412_v22 }
 0x3e7   : > { %v1340_v10 = vpop.xlane.xlu1 %1339  ;;  %v1318_v12 = vpop.xlane.xlu0 %1317  ;;  %v1398_v27 = vmul.f32 %v2356_v17, %v2864_v6  ;;  %v3015_v6 = vadd.f32 %v2995_v30, %v1418_v32 }
 0x3e8   : > { %2371 = vrsqrt.f32 %v1371_v8  ;;  %v1356_v11 = vmul.f32 0.0078125, %v1340_v10  ;;  %v1345_v21 = vmul.f32 0.0078125, %v1318_v12  ;;  %v1411_v25 = vmul.f32 %v2986_v13, %v1389_v14 }
 0x3e9   : > { %v2358_v24 = vpop.eup %2357  ;;  %2373 = vrsqrt.f32 %v1360_v9  ;;  %v1420_v19 = vmul.f32 %v2986_v13, %v1398_v27 }
 0x3ea   : > { %v2360_v1 = vpop.eup %2359  ;;  %v1372_v26 = vadd.f32 1e-05, %v1356_v11  ;;  %v1361_v29 = vadd.f32 1e-05, %v1345_v21  ;;  %v2998_v63 = vadd.f32 %v2995_v30, %v1411_v25  ;;  %v1399_v38 = vmul.f32 %v2358_v24, %v2884_v28 }
 0x3eb   : > { %v1320_v15 = vpop.xlane.xlu0 %1319  ;;  %v1395_v31 = vmul.f32 %v2360_v1, %v2878_v20  ;;  %v2362_v36 = vpop.eup %2361  ;;  %v3029_v45 = vadd.f32 %v2995_v30, %v1420_v19 }
 0x3ec   : > { %2375 = vrsqrt.f32 %v1372_v26  ;;  %v1346_v33 = vmul.f32 0.0078125, %v1320_v15  ;;  %2171 = vmatprep.mubr.f32.mxu0 %v2998_v63  ;;  %v1400_v47 = vmul.f32 %v2362_v36, %v2875_v18  ;;  %v1421_v49 = vmul.f32 %v2986_v13, %v1399_v38 }
 0x3ed   : > { %2377 = vrsqrt.f32 %v1361_v29  ;;  %v1417_v37 = vmul.f32 %v2986_v13, %v1395_v31  ;;  %v2364_v40 = vpop.eup %2363  ;;  %2172 = vmatmul.mubr.f32.vlgmr.msra.gmra.mxu0 %v3003_v34 }
 0x3ee   : > { %v1362_v41 = vadd.f32 1e-05, %v1346_v33  ;;  %v1397_v42 = vmul.f32 %v2364_v40, %v2889_v23  ;;  %v2366_v43 = vpop.eup %2365  ;;  %v1422_v18 = vmul.f32 %v2986_v13, %v1400_v47  ;;  %v3035_v61 = vadd.f32 %v2995_v30, %v1421_v49 }
 0x3ef   : > { %v3011_v20 = vadd.f32 %v2995_v30, %v1417_v37  ;;  %v1402_v55 = vmul.f32 %v2366_v43, %v2896_v35 }
 0x3f0   : > { %2379 = vrsqrt.f32 %v1362_v41  ;;  %v1419_v28 = vmul.f32 %v2986_v13, %v1397_v42  ;;  %v3045_v52 = vadd.f32 %v2995_v30, %v1422_v18 }
 0x3f1   : > { %v2368_v48 = vpop.eup %2367  ;;  %2180 = vmatprep.mubr.f32.mxu1 %v3011_v20  ;;  %v1424_v5 = vmul.f32 %v2986_v13, %v1402_v55 }
 0x3f2   : > { %v2370_v50 = vpop.eup %2369  ;;  %2181 = vmatmul.mubr.f32.vlgmr.msra.gmra.mxu1 %v3015_v6  ;;  %v1401_v23 = vmul.f32 %v2368_v48, %v2912_v44  ;;  %v3025_v51 = vadd.f32 %v2995_v30, %v1419_v28 }
 0x3f3   : > { %v1391_v53 = vmul.f32 %v2370_v50, %v2902_v39  ;;  %v3059_v10 = vadd.f32 %v2995_v30, %v1424_v5 }
 0x3f4   : > { %2183 = vmatprep.mubr.f32.mxu1 %v3025_v51  ;;  %v1423_v62 = vmul.f32 %v2986_v13, %v1401_v23 }
 0x3f5   : > { %v2372_v57 = vpop.eup %2371  ;;  %v1413_v44 = vmul.f32 %v2986_v13, %v1391_v53 }
 0x3f6   : > { %v2374_v2 = vpop.eup %2373  ;;  %2184 = vmatmul.mubr.f32.gmra.mxu1 %v3029_v45  ;;  %v1403_v39 = vmul.f32 %v2372_v57, %v2928_v54  ;;  %v3049_v59 = vadd.f32 %v2995_v30, %v1423_v62 }
 0x3f7   : > { %2186 = vmatprep.mubr.f32.mxu1 %v3035_v61  ;;  %v1435_v58 = vadd.f32 %v2995_v30, %v1413_v44  ;;  %v1392_v35 = vmul.f32 %v2374_v2, %v2918_v46 }
 0x3f8   : > { %v1425_v54 = vmul.f32 %v2986_v13, %v1403_v39 }
 0x3f9   : > { %v2376_v7 = vpop.eup %2375  ;;  %2174 = vmatprep.mubr.f32.mxu0 %v1435_v58  ;;  %v1414_v56 = vmul.f32 %v2986_v13, %v1392_v35 }
 0x3fa   : > { %v2378_v0 = vpop.eup %2377  ;;  %2187 = vmatmul.mubr.f32.gmra.mxu1 %v3045_v52  ;;  %v1404_v8 = vmul.f32 %v2376_v7, %v2941_v3  ;;  %v3063_v16 = vadd.f32 %v2995_v30, %v1425_v54 }
 0x3fb   : > { %2189 = vmatprep.mubr.f32.mxu1 %v3049_v59  ;;  %v1436_v46 = vadd.f32 %v2995_v30, %v1414_v56  ;;  %v1393_v9 = vmul.f32 %v2378_v0, %v2933_v60 }
 0x3fc   : > { %v1426_v12 = vmul.f32 %v2986_v13, %v1404_v8 }
 0x3fd   : > { %v2380_v14 = vpop.eup %2379  ;;  %2175 = vmatmul.mubr.f32.gmra.mxu0 %v1436_v46  ;;  %v1415_v17 = vmul.f32 %v2986_v13, %v1393_v9 }
 0x3fe   : > { %2190 = vmatmul.mubr.f32.gmra.mxu1 %v3059_v10  ;;  %v3068_v3 = vadd.f32 %v2995_v30, %v1426_v12  ;;  %v1394_v11 = vmul.f32 %v2380_v14, %v2947_v4 }
 0x3ff   : > { %2192 = vmatprep.mubr.f32.mxu1 %v3063_v16  ;;  %v1437_v60 = vadd.f32 %v2995_v30, %v1415_v17 }
 0x400   : > { %v1416_v21 = vmul.f32 %v2986_v13, %v1394_v11 }
 0x401   : > { %2177 = vmatprep.mubr.f32.mxu0 %v1437_v60 }
 0x402   : > { %2193 = vmatmul.mubr.f32.gmra.mxu1 %v3068_v3  ;;  %v1438_v22 = vadd.f32 %v2995_v30, %v1416_v21 }
 0x404   : > { %2178 = vmatmul.mubr.f32.gmra.mxu0 %v1438_v22 }
 0x4ad   : > { %v2173_v24 = vpop.f32.mrf.mxu0 }
 0x4ae   : > { %v1595_v25 = vmax.f32 %v2173_v24, 0.0 }
 0x4af   : > { %v1515_v1 = vpop.f32.mrf.mxu0 }
 0x4b0   : > { %v1594_v26 = vmax.f32 %v1515_v1, 0.0  ;;  %v3077_v29 = vadd.f32 %v1595_v25, %v3003_v34 }
 0x4b2   : > { %v2182_v4 = vpop.f32.mrf.mxu1  ;;  %1628 = vadd.xlane.f32.xlu1 %v3077_v29  ;;  %v1610_v15 = vadd.f32 %v1594_v26, %v2998_v63 }
 0x4b3   : > { %v1601_v19 = vmax.f32 %v2182_v4, 0.0 }
 0x4b4   : > { %1626 = vadd.xlane.f32.xlu0 %v1610_v15  ;;  %v1545_v13 = vpop.f32.mrf.mxu1 }
 0x4b5   : > { %v1600_v48 = vmax.f32 %v1545_v13, 0.0  ;;  %v1617_v23 = vadd.f32 %v1601_v19, %v3015_v6 }
 0x4b6   : > { %v2185_v31 = vpop.f32.mrf.mxu1 }
 0x4b7   : > { %v1603_v50 = vmax.f32 %v2185_v31, 0.0  ;;  %v1616_v18 = vadd.f32 %v1600_v48, %v3011_v20 }
 0x4b8   : > { %v1555_v33 = vpop.f32.mrf.mxu1 }
 0x4b9   : > { %v1602_v53 = vmax.f32 %v1555_v33, 0.0  ;;  %v3084_v44 = vadd.f32 %v1603_v50, %v3029_v45 }
 0x4ba   : > { %v2188_v38 = vpop.f32.mrf.mxu1 }
 0x4bb   : > { %v1605_v57 = vmax.f32 %v2188_v38, 0.0  ;;  %v3088_v2 = vadd.f32 %v1602_v53, %v3025_v51 }
 0x4bc   : > { %v1565_v42 = vpop.f32.mrf.mxu1 }
 0x4bd   : > { %v2176_v32 = vpop.f32.mrf.mxu0  ;;  %v1604_v62 = vmax.f32 %v1565_v42, 0.0  ;;  %v3092_v6 = vadd.f32 %v1605_v57, %v3045_v52 }
 0x4be   : > { %v1597_v27 = vmax.f32 %v2176_v32, 0.0  ;;  %v2191_v49 = vpop.f32.mrf.mxu1 }
 0x4bf   : > { %v1525_v30 = vpop.f32.mrf.mxu0  ;;  %v3096_v35 = vadd.f32 %v1604_v62, %v3035_v61 }
 0x4c0   : > { %v1596_v36 = vmax.f32 %v1525_v30, 0.0  ;;  %v1613_v37 = vadd.f32 %v1597_v27, %v1436_v46  ;;  %v1575_v55 = vpop.f32.mrf.mxu1 }
 0x4c1   : > { %v1606_v20 = vmax.f32 %v1575_v55, 0.0 }
 0x4c2   : > { %1632 = vadd.xlane.f32.xlu1 %v1613_v37  ;;  %v1612_v40 = vadd.f32 %v1596_v36, %v1435_v58  ;;  %v2194_v39 = vpop.f32.mrf.mxu1  ;;  %v1607_v58 = vmax.f32 %v2191_v49, 0.0 }
 0x4c3   : > { %v1609_v5 = vmax.f32 %v2194_v39, 0.0  ;;  %v3104_v56 = vadd.f32 %v1606_v20, %v3049_v59 }
 0x4c4   : > { %1630 = vadd.xlane.f32.xlu0 %v1612_v40  ;;  %v2179_v34 = vpop.f32.mrf.mxu0  ;;  %v1585_v45 = vpop.f32.mrf.mxu1  ;;  %v3100_v51 = vadd.f32 %v1607_v58, %v3059_v10 }
 0x4c5   : > { %v1599_v41 = vmax.f32 %v2179_v34, 0.0  ;;  %v1608_v7 = vmax.f32 %v1585_v45, 0.0  ;;  %v3108_v52 = vadd.f32 %v1609_v5, %v3068_v3 }
 0x4c6   : > { %v1535_v43 = vpop.f32.mrf.mxu0 }
 0x4c7   : > { %v1598_v47 = vmax.f32 %v1535_v43, 0.0  ;;  %v1615_v63 = vadd.f32 %v1599_v41, %v1438_v22  ;;  %v3112_v61 = vadd.f32 %v1608_v7, %v3063_v16 }
 0x4c9   : > { %1636 = vadd.xlane.f32.xlu1 %v1615_v63  ;;  %v1614_v28 = vadd.f32 %v1598_v47, %v1437_v60 }
 0x4cb   : > { %1634 = vadd.xlane.f32.xlu0 %v1614_v28 }
 0x4cd   : > { %1640 = vadd.xlane.f32.xlu1 %v1617_v23 }
 0x4cf   : > { %1638 = vadd.xlane.f32.xlu0 %v1616_v18 }
 0x4d1   : > { %1644 = vadd.xlane.f32.xlu1 %v3084_v44 }
 0x4d3   : > { %1642 = vadd.xlane.f32.xlu0 %v3088_v2 }
 0x4d5   : > { %1648 = vadd.xlane.f32.xlu1 %v3092_v6 }
 0x4d7   : > { %1646 = vadd.xlane.f32.xlu0 %v3096_v35 }
 0x4d9   : > { %1652 = vadd.xlane.f32.xlu1 %v3100_v51 }
 0x4db   : > { %1650 = vadd.xlane.f32.xlu0 %v3104_v56 }
 0x4dd   : > { %1656 = vadd.xlane.f32.xlu1 %v3108_v52 }
 0x4df   : > { %1654 = vadd.xlane.f32.xlu0 %v3112_v61 }
 0x53b   : > { %v1629_v54 = vpop.xlane.xlu1 %1628 }
 0x53c   : > { %v1659_v0 = vmul.f32 0.0078125, %v1629_v54 }
 0x53d   : > { %v1627_v8 = vpop.xlane.xlu0 %1626 }
 0x53e   : > { %v3116_v46 = vsub.f32 %v3077_v29, %v1659_v0  ;;  %v1658_v59 = vmul.f32 0.0078125, %v1627_v8 }
 0x540   : > { %v3118_v9 = vsub.f32 %v1610_v15, %v1658_v59  ;;  %v1691_v10 = vmul.f32 %v3116_v46, %v3116_v46 }
 0x542   : > { %1708 = vadd.xlane.f32.xlu1 %v1691_v10  ;;  %v1690_v12 = vmul.f32 %v3118_v9, %v3118_v9 }
 0x544   : > { %1706 = vadd.xlane.f32.xlu0 %v1690_v12 }
 0x54b   : > { %v1633_v14 = vpop.xlane.xlu1 %1632 }
 0x54c   : > { %v1661_v16 = vmul.f32 0.0078125, %v1633_v14 }
 0x54d   : > { %v1631_v17 = vpop.xlane.xlu0 %1630 }
 0x54e   : > { %v3124_v3 = vsub.f32 %v1613_v37, %v1661_v16  ;;  %v1660_v11 = vmul.f32 0.0078125, %v1631_v17 }
 0x550   : > { %v3126_v60 = vsub.f32 %v1612_v40, %v1660_v11  ;;  %v1693_v21 = vmul.f32 %v3124_v3, %v3124_v3 }
 0x552   : > { %1712 = vadd.xlane.f32.xlu1 %v1693_v21  ;;  %v1637_v22 = vpop.xlane.xlu1 %1636  ;;  %v1692_v24 = vmul.f32 %v3126_v60, %v3126_v60  ;;  %v3191_v21 = vld [vmem:[%s3290_s7] ss:$0 sm:$0xff] }
 0x553   : > { %v1663_v25 = vmul.f32 0.0078125, %v1637_v22 }
 0x554   : > { %1710 = vadd.xlane.f32.xlu0 %v1692_v24  ;;  %v1635_v1 = vpop.xlane.xlu0 %1634 }
 0x555   : > { %v3132_v26 = vsub.f32 %v1615_v63, %v1663_v25  ;;  %v1662_v29 = vmul.f32 0.0078125, %v1635_v1 }
 0x556   : > { %v1641_v4 = vpop.xlane.xlu1 %1640 }
 0x557   : > { %v3134_v15 = vsub.f32 %v1614_v28, %v1662_v29  ;;  %v1665_v13 = vmul.f32 0.0078125, %v1641_v4  ;;  %v1695_v31 = vmul.f32 %v3132_v26, %v3132_v26  ;;  %v3197_v29 = vld [vmem:[%s3291_s8] ss:$0 sm:$0xff] }
 0x558   : > { %v1639_v32 = vpop.xlane.xlu0 %1638 }
 0x559   : > { %v3138_v33 = vsub.f32 %v1617_v23, %v1665_v13  ;;  %v1664_v27 = vmul.f32 0.0078125, %v1639_v32  ;;  %1716 = vadd.xlane.f32.xlu1 %v1695_v31  ;;  %v1694_v30 = vmul.f32 %v3134_v15, %v3134_v15 }
 0x55a   : > { %v1645_v36 = vpop.xlane.xlu1 %1644 }
 0x55b   : > { %v3142_v37 = vsub.f32 %v1616_v18, %v1664_v27  ;;  %v1667_v38 = vmul.f32 0.0078125, %v1645_v36  ;;  %1714 = vadd.xlane.f32.xlu0 %v1694_v30  ;;  %v1697_v40 = vmul.f32 %v3138_v33, %v3138_v33 }
 0x55c   : > { %v1643_v34 = vpop.xlane.xlu0 %1642 }
 0x55d   : > { %v3147_v41 = vsub.f32 %v3084_v44, %v1667_v38  ;;  %v1666_v42 = vmul.f32 0.0078125, %v1643_v34  ;;  %1720 = vadd.xlane.f32.xlu1 %v1697_v40  ;;  %v1696_v43 = vmul.f32 %v3142_v37, %v3142_v37 }
 0x55e   : > { %v1649_v19 = vpop.xlane.xlu1 %1648 }
 0x55f   : > { %v3152_v47 = vsub.f32 %v3088_v2, %v1666_v42  ;;  %v1669_v63 = vmul.f32 0.0078125, %v1649_v19  ;;  %1718 = vadd.xlane.f32.xlu0 %v1696_v43  ;;  %v1699_v48 = vmul.f32 %v3147_v41, %v3147_v41 }
 0x560   : > { %v1647_v28 = vpop.xlane.xlu0 %1646 }
 0x561   : > { %v3157_v49 = vsub.f32 %v3092_v6, %v1669_v63  ;;  %v1668_v50 = vmul.f32 0.0078125, %v1647_v28  ;;  %1724 = vadd.xlane.f32.xlu1 %v1699_v48  ;;  %v1698_v23 = vmul.f32 %v3152_v47, %v3152_v47 }
 0x562   : > { %v1653_v53 = vpop.xlane.xlu1 %1652 }
 0x563   : > { %v3162_v18 = vsub.f32 %v3096_v35, %v1668_v50  ;;  %v1671_v55 = vmul.f32 0.0078125, %v1653_v53  ;;  %1722 = vadd.xlane.f32.xlu0 %v1698_v23  ;;  %v1701_v57 = vmul.f32 %v3157_v49, %v3157_v49 }
 0x564   : > { %v1651_v44 = vpop.xlane.xlu0 %1650 }
 0x565   : > { %v3167_v62 = vsub.f32 %v3100_v51, %v1671_v55  ;;  %v1670_v2 = vmul.f32 0.0078125, %v1651_v44  ;;  %1728 = vadd.xlane.f32.xlu1 %v1701_v57  ;;  %v1700_v39 = vmul.f32 %v3162_v18, %v3162_v18 }
 0x566   : > { %v1657_v58 = vpop.xlane.xlu1 %1656 }
 0x567   : > { %v3172_v6 = vsub.f32 %v3104_v56, %v1670_v2  ;;  %v1673_v20 = vmul.f32 0.0078125, %v1657_v58  ;;  %1726 = vadd.xlane.f32.xlu0 %v1700_v39  ;;  %v1703_v35 = vmul.f32 %v3167_v62, %v3167_v62 }
 0x568   : > { %v1655_v45 = vpop.xlane.xlu0 %1654 }
 0x569   : > { %v3177_v5 = vsub.f32 %v3108_v52, %v1673_v20  ;;  %v1672_v51 = vmul.f32 0.0078125, %v1655_v45  ;;  %1732 = vadd.xlane.f32.xlu1 %v1703_v35  ;;  %v1702_v7 = vmul.f32 %v3172_v6, %v3172_v6 }
 0x56b   : > { %v3182_v54 = vsub.f32 %v3112_v61, %v1672_v51  ;;  %1730 = vadd.xlane.f32.xlu0 %v1702_v7  ;;  %v1705_v56 = vmul.f32 %v3177_v5, %v3177_v5 }
 0x56d   : > { %1736 = vadd.xlane.f32.xlu1 %v1705_v56  ;;  %v1704_v0 = vmul.f32 %v3182_v54, %v3182_v54 }
 0x56f   : > { %1734 = vadd.xlane.f32.xlu0 %v1704_v0 }
 0x5cb   : > { %v1709_v8 = vpop.xlane.xlu1 %1708 }
 0x5cc   : > { %v1739_v52 = vmul.f32 0.0078125, %v1709_v8 }
 0x5cd   : > { %v1707_v59 = vpop.xlane.xlu0 %1706 }
 0x5ce   : > { %v1755_v10 = vadd.f32 1e-05, %v1739_v52  ;;  %v1738_v12 = vmul.f32 0.0078125, %v1707_v59 }
 0x5d0   : > { %2381 = vrsqrt.f32 %v1755_v10  ;;  %v1754_v14 = vadd.f32 1e-05, %v1738_v12 }
 0x5d2   : > { %2383 = vrsqrt.f32 %v1754_v14 }
 0x5db   : > { %v1713_v16 = vpop.xlane.xlu1 %1712 }
 0x5dc   : > { %v1741_v61 = vmul.f32 0.0078125, %v1713_v16 }
 0x5dd   : > { %v1711_v17 = vpop.xlane.xlu0 %1710  ;;  %v2382_v11 = vpop.eup %2381 }
 0x5de   : > { %v1757_v22 = vadd.f32 1e-05, %v1741_v61  ;;  %v1740_v24 = vmul.f32 0.0078125, %v1711_v17  ;;  %v1787_v25 = vmul.f32 %v2382_v11, %v3116_v46 }
 0x5df   : > { %v2384_v1 = vpop.eup %2383 }
 0x5e0   : > { %2385 = vrsqrt.f32 %v1757_v22  ;;  %v1756_v4 = vadd.f32 1e-05, %v1740_v24  ;;  %v1809_v13 = vmul.f32 %v3191_v21, %v1787_v25  ;;  %v1786_v31 = vmul.f32 %v2384_v1, %v3118_v9 }
 0x5e2   : > { %2387 = vrsqrt.f32 %v1756_v4  ;;  %v1717_v32 = vpop.xlane.xlu1 %1716  ;;  %v1831_v27 = vadd.f32 %v3197_v29, %v1809_v13  ;;  %v1808_v46 = vmul.f32 %v3191_v21, %v1786_v31 }
 0x5e3   : > { %v1743_v30 = vmul.f32 0.0078125, %v1717_v32 }
 0x5e4   : > { %v1715_v36 = vpop.xlane.xlu0 %1714  ;;  %v1863_v38 = vmax.f32 %v1831_v27, 0.0  ;;  %v1830_v40 = vadd.f32 %v3197_v29, %v1808_v46 }
 0x5e5   : > { %v1759_v34 = vadd.f32 1e-05, %v1743_v30  ;;  %v1742_v42 = vmul.f32 0.0078125, %v1715_v36 }
 0x5e6   : > { %v1721_v43 = vpop.xlane.xlu1 %1720  ;;  %1879 = vst [vmem:[%s2612_s0 + $0x8] sm:$0xff] %v1863_v38  ;;  %v1862_v19 = vmax.f32 %v1830_v40, 0.0 }
 0x5e7   : > { %2389 = vrsqrt.f32 %v1759_v34  ;;  %v1758_v63 = vadd.f32 1e-05, %v1742_v42  ;;  %v1745_v9 = vmul.f32 0.0078125, %v1721_v43 }
 0x5e8   : > { %v1719_v48 = vpop.xlane.xlu0 %1718  ;;  %1878 = vst [vmem:[%s2612_s0] sm:$0xff] %v1862_v19 }
 0x5e9   : > { %2391 = vrsqrt.f32 %v1758_v63  ;;  %v1761_v28 = vadd.f32 1e-05, %v1745_v9  ;;  %v1744_v50 = vmul.f32 0.0078125, %v1719_v48 }
 0x5ea   : > { %v1725_v23 = vpop.xlane.xlu1 %1724 }
 0x5eb   : > { %2393 = vrsqrt.f32 %v1761_v28  ;;  %v1760_v53 = vadd.f32 1e-05, %v1744_v50  ;;  %v1747_v55 = vmul.f32 0.0078125, %v1725_v23 }
 0x5ec   : > { %v1723_v57 = vpop.xlane.xlu0 %1722 }
 0x5ed   : > { %v2386_v44 = vpop.eup %2385  ;;  %2395 = vrsqrt.f32 %v1760_v53  ;;  %v1763_v2 = vadd.f32 1e-05, %v1747_v55  ;;  %v1746_v39 = vmul.f32 0.0078125, %v1723_v57 }
 0x5ee   : > { %v1789_v58 = vmul.f32 %v2386_v44, %v3124_v3  ;;  %v1729_v20 = vpop.xlane.xlu1 %1728 }
 0x5ef   : > { %v2388_v35 = vpop.eup %2387  ;;  %2397 = vrsqrt.f32 %v1763_v2  ;;  %v1762_v45 = vadd.f32 1e-05, %v1746_v39  ;;  %v1749_v51 = vmul.f32 0.0078125, %v1729_v20 }
 0x5f0   : > { %v1811_v7 = vmul.f32 %v3191_v21, %v1789_v58  ;;  %v1788_v56 = vmul.f32 %v2388_v35, %v3126_v60  ;;  %v1727_v0 = vpop.xlane.xlu0 %1726 }
 0x5f1   : > { %2399 = vrsqrt.f32 %v1762_v45  ;;  %v1765_v8 = vadd.f32 1e-05, %v1749_v51  ;;  %v1748_v52 = vmul.f32 0.0078125, %v1727_v0 }
 0x5f2   : > { %v1833_v59 = vadd.f32 %v3197_v29, %v1811_v7  ;;  %v1810_v10 = vmul.f32 %v3191_v21, %v1788_v56  ;;  %v1733_v12 = vpop.xlane.xlu1 %1732 }
 0x5f3   : > { %2401 = vrsqrt.f32 %v1765_v8  ;;  %v1764_v3 = vadd.f32 1e-05, %v1748_v52  ;;  %v1751_v14 = vmul.f32 0.0078125, %v1733_v12 }
 0x5f4   : > { %v2390_v16 = vpop.eup %2389  ;;  %v1865_v61 = vmax.f32 %v1833_v59, 0.0  ;;  %v1832_v17 = vadd.f32 %v3197_v29, %v1810_v10  ;;  %v1731_v11 = vpop.xlane.xlu0 %1730 }
 0x5f5   : > { %v1791_v60 = vmul.f32 %v2390_v16, %v3132_v26  ;;  %2403 = vrsqrt.f32 %v1764_v3  ;;  %v1767_v22 = vadd.f32 1e-05, %v1751_v14  ;;  %v1750_v24 = vmul.f32 0.0078125, %v1731_v11 }
 0x5f6   : > { %v2392_v25 = vpop.eup %2391  ;;  %1881 = vst [vmem:[%s2612_s0 + $0x18] sm:$0xff] %v1865_v61  ;;  %v1864_v1 = vmax.f32 %v1832_v17, 0.0  ;;  %v1737_v4 = vpop.xlane.xlu1 %1736 }
 0x5f7   : > { %v1813_v13 = vmul.f32 %v3191_v21, %v1791_v60  ;;  %v1790_v31 = vmul.f32 %v2392_v25, %v3134_v15  ;;  %2405 = vrsqrt.f32 %v1767_v22  ;;  %v1766_v32 = vadd.f32 1e-05, %v1750_v24 }
 0x5f8   : > { %v2394_v27 = vpop.eup %2393  ;;  %1880 = vst [vmem:[%s2612_s0 + $0x10] sm:$0xff] %v1864_v1  ;;  %v1753_v46 = vmul.f32 0.0078125, %v1737_v4  ;;  %v1735_v30 = vpop.xlane.xlu0 %1734 }
 0x5f9   : > { %v1835_v26 = vadd.f32 %v3197_v29, %v1813_v13  ;;  %v1812_v36 = vmul.f32 %v3191_v21, %v1790_v31  ;;  %v1793_v38 = vmul.f32 %v2394_v27, %v3138_v33  ;;  %2407 = vrsqrt.f32 %v1766_v32 }
 0x5fa   : > { %v2396_v40 = vpop.eup %2395  ;;  %v1769_v34 = vadd.f32 1e-05, %v1753_v46  ;;  %v1752_v42 = vmul.f32 0.0078125, %v1735_v30 }
 0x5fb   : > { %v1867_v43 = vmax.f32 %v1835_v26, 0.0  ;;  %v1834_v15 = vadd.f32 %v3197_v29, %v1812_v36  ;;  %v1815_v19 = vmul.f32 %v3191_v21, %v1793_v38  ;;  %v1792_v63 = vmul.f32 %v2396_v40, %v3142_v37 }
 0x5fc   : > { %v2398_v9 = vpop.eup %2397  ;;  %2409 = vrsqrt.f32 %v1769_v34  ;;  %v1768_v48 = vadd.f32 1e-05, %v1752_v42 }
 0x5fd   : > { %1883 = vst [vmem:[%s2612_s0 + $0x28] sm:$0xff] %v1867_v43  ;;  %v1866_v28 = vmax.f32 %v1834_v15, 0.0  ;;  %v1837_v33 = vadd.f32 %v3197_v29, %v1815_v19  ;;  %v1814_v50 = vmul.f32 %v3191_v21, %v1792_v63  ;;  %v1795_v23 = vmul.f32 %v2398_v9, %v3147_v41 }
 0x5fe   : > { %v2400_v53 = vpop.eup %2399  ;;  %2411 = vrsqrt.f32 %v1768_v48 }
 0x5ff   : > { %1882 = vst [vmem:[%s2612_s0 + $0x20] sm:$0xff] %v1866_v28  ;;  %v1869_v55 = vmax.f32 %v1837_v33, 0.0  ;;  %v1836_v57 = vadd.f32 %v3197_v29, %v1814_v50  ;;  %v1817_v37 = vmul.f32 %v3191_v21, %v1795_v23  ;;  %v1794_v44 = vmul.f32 %v2400_v53, %v3152_v47 }
 0x600   : > { %v2402_v2 = vpop.eup %2401 }
 0x601   : > { %1885 = vst [vmem:[%s2612_s0 + $0x38] sm:$0xff] %v1869_v55  ;;  %v1868_v39 = vmax.f32 %v1836_v57, 0.0  ;;  %v1839_v58 = vadd.f32 %v3197_v29, %v1817_v37  ;;  %v1816_v20 = vmul.f32 %v3191_v21, %v1794_v44  ;;  %v1797_v41 = vmul.f32 %v2402_v2, %v3157_v49 }
 0x602   : > { %v2404_v35 = vpop.eup %2403 }
 0x603   : > { %1884 = vst [vmem:[%s2612_s0 + $0x30] sm:$0xff] %v1868_v39  ;;  %v1871_v45 = vmax.f32 %v1839_v58, 0.0  ;;  %v1838_v51 = vadd.f32 %v3197_v29, %v1816_v20  ;;  %v1819_v7 = vmul.f32 %v3191_v21, %v1797_v41  ;;  %v1796_v47 = vmul.f32 %v2404_v35, %v3162_v18 }
 0x604   : > { %v2406_v56 = vpop.eup %2405 }
 0x605   : > { %1887 = vst [vmem:[%s2612_s0 + $0x48] sm:$0xff] %v1871_v45  ;;  %v1870_v0 = vmax.f32 %v1838_v51, 0.0  ;;  %v1841_v8 = vadd.f32 %v3197_v29, %v1819_v7  ;;  %v1818_v52 = vmul.f32 %v3191_v21, %v1796_v47  ;;  %v1799_v49 = vmul.f32 %v2406_v56, %v3167_v62 }
 0x606   : > { %v2408_v59 = vpop.eup %2407 }
 0x607   : > { %1886 = vst [vmem:[%s2612_s0 + $0x40] sm:$0xff] %v1870_v0  ;;  %v1873_v10 = vmax.f32 %v1841_v8, 0.0  ;;  %v1840_v12 = vadd.f32 %v3197_v29, %v1818_v52  ;;  %v1821_v3 = vmul.f32 %v3191_v21, %v1799_v49  ;;  %v1798_v18 = vmul.f32 %v2408_v59, %v3172_v6 }
 0x609   : > { %v2410_v14 = vpop.eup %2409  ;;  %1889 = vst [vmem:[%s2612_s0 + $0x58] sm:$0xff] %v1873_v10  ;;  %v1872_v16 = vmax.f32 %v1840_v12, 0.0  ;;  %v1843_v61 = vadd.f32 %v3197_v29, %v1821_v3  ;;  %v1820_v17 = vmul.f32 %v3191_v21, %v1798_v18 }
 0x60a   : > { %v1801_v62 = vmul.f32 %v2410_v14, %v3177_v5 }
 0x60b   : > { %v2412_v11 = vpop.eup %2411  ;;  %1888 = vst [vmem:[%s2612_s0 + $0x50] sm:$0xff] %v1872_v16  ;;  %v1875_v60 = vmax.f32 %v1843_v61, 0.0  ;;  %v1842_v22 = vadd.f32 %v3197_v29, %v1820_v17 }
 0x60c   : > { %v1823_v24 = vmul.f32 %v3191_v21, %v1801_v62  ;;  %v1800_v6 = vmul.f32 %v2412_v11, %v3182_v54 }
 0x60d   : > { %1891 = vst [vmem:[%s2612_s0 + $0x68] sm:$0xff] %v1875_v60  ;;  %v1874_v25 = vmax.f32 %v1842_v22, 0.0 }
 0x60e   : > { %v1845_v1 = vadd.f32 %v3197_v29, %v1823_v24  ;;  %v1822_v4 = vmul.f32 %v3191_v21, %v1800_v6 }
 0x60f   : > { %1890 = vst [vmem:[%s2612_s0 + $0x60] sm:$0xff] %v1874_v25 }
 0x610   : > { %v1877_v13 = vmax.f32 %v1845_v1, 0.0  ;;  %v1844_v5 = vadd.f32 %v3197_v29, %v1822_v4 }
 0x612   : > { %1893 = vst [vmem:[%s2612_s0 + $0x78] sm:$0xff] %v1877_v13  ;;  %v1876_v31 = vmax.f32 %v1844_v5, 0.0 }
 0x614   : > { %1892 = vst [vmem:[%s2612_s0 + $0x70] sm:$0xff] %v1876_v31 }
 0x615 PF: > { %s19_s15 = sadd.s32 1, %s2467_s15   ;;  %s3295_s30 = smov %s2447_s10 }
 0x616   : > { %p16_p0 = scmp.ge.s32.totalorder %s19_s15, 8   ;;  %s3296_s10 = smov %s2572_s22 }
 0x617   : > { %s3297_s11 = smov %s2459_s13  ;;  %s3298_s12 = smov %s2463_s14 }
 0x618   : > { %s3299_s13 = smov %s3302_s16  ;;  %s3300_s14 = smov %s3306_s17 }
 0x619   :  { %18 = sbr.rel (!%p16_p0) target bundleno = 6 (0x6), region = 143 }

</bundles_post_ra>
